<compile_context>
chip_gen: v7x
topology: tpu7x:2x2x1
jax: 0.10.0
libtpu: 0.0.40
codegen_flags: <defaults>
</compile_context>

<pallas_src>
import functools

import jax
import jax.numpy as jnp
from jax.experimental import pallas as pl
from jax.experimental.pallas import tpu as pltpu


def _gelu(x):
    # tanh-approximate GELU (maps to the EUP tanh slot).
    # TODO(synk): nn.GELU defaults to the exact erf form; erf has no guaranteed
    # Mosaic lowering, the tanh approximation differs by <1e-3 per element.
    c = 0.7978845608028654  # sqrt(2/pi)
    return 0.5 * x * (1.0 + jnp.tanh(c * (x + 0.044715 * x * x * x)))


def _shift_rows(a, dh):
    """out[:, i, j, :] = a[:, i+dh, j, :], zero-filled out of range."""
    if dh == 0:
        return a
    Bb, H, W, Ch = a.shape
    z = jnp.zeros((Bb, abs(dh), W, Ch), a.dtype)
    if dh > 0:
        return jnp.concatenate([a[:, dh:], z], axis=1)
    return jnp.concatenate([z, a[:, :H + dh]], axis=1)


def _shift_cols(a, dw):
    """out[:, i, j, :] = a[:, i, j+dw, :], zero-filled out of range."""
    if dw == 0:
        return a
    Bb, H, W, Ch = a.shape
    z = jnp.zeros((Bb, H, abs(dw), Ch), a.dtype)
    if dw > 0:
        return jnp.concatenate([a[:, :, dw:], z], axis=2)
    return jnp.concatenate([z, a[:, :, :W + dw]], axis=2)


def _dwmlp_kernel(x_ref, w1_ref, b1_ref, dwk_ref, b2_ref, w3_ref, b3_ref,
                  o_ref, *, H, W, block_b):
    N = H * W
    Bb = block_b
    C = x_ref.shape[-1]
    hidden = w1_ref.shape[1]
    Cout = w3_ref.shape[1]

    # ---- fc1 (1x1 conv == matmul, BN1 folded) + GELU ------------------------
    x = x_ref[...].reshape(Bb * N, C)                       # bf16, layout-preserving
    h = jnp.dot(x, w1_ref[...], preferred_element_type=jnp.float32)
    h = _gelu(h + b1_ref[...])                              # (Bb*N, hidden) f32

    # ---- depthwise 3x3, stride 1, padding 1 (BN2 folded) + GELU -------------
    # NOTE: reshape is layout-preserving when W % 8 == 0 (sublane tiling).
    h4 = h.reshape(Bb, H, W, hidden)
    dwk = dwk_ref[...]                                      # (9, hidden) f32
    taps = [dwk[t].reshape(1, 1, 1, hidden) for t in range(9)]
    acc = None
    for dh in (-1, 0, 1):                                   # 3 row shifts
        hs = _shift_rows(h4, dh)
        for dw in (-1, 0, 1):                               # 3 column shifts each
            term = _shift_cols(hs, dw) * taps[(dh + 1) * 3 + (dw + 1)]
            acc = term if acc is None else acc + term
    h2 = _gelu(acc + b2_ref[...])                           # (Bb, H, W, hidden)

    # ---- fc3 (1x1 conv == matmul) --------------------------------------------
    y = jnp.dot(h2.reshape(Bb * N, hidden).astype(jnp.bfloat16), w3_ref[...],
                preferred_element_type=jnp.float32)         # (Bb*N, Cout) f32
    y = y + b3_ref[...]
    # TODO(synk): when Cout < 128 the output store is lane-masked; packing two
    # rows into a 128-lane slab would avoid vst.msk but needs an in-kernel
    # lane-dim reshape (relayout) -- skipped here for robustness.
    o_ref[...] = y.reshape(Bb, N, Cout).astype(o_ref.dtype)


def _pick_block_b(B, N):
    """Pick images-per-grid-step: aim for matmul M >= 512 but keep >=2 steps."""
    target = max(1, -(-512 // N))          # ceil(512 / N)
    bb = min(B, target)
    while B % bb:
        bb -= 1
    if B > 1 and B // bb == 1:             # keep 2 steps for the 2nd TC on v7x
        bb = max(1, B // 2)
        while B % bb:
            bb -= 1
    return bb


def dwmlp_forward(x, params, *, H, W, down_sample=False, eps=1e-5, block_b=None):
    """Eval-mode DWMlp forward.  x: (B, N, C) with N == H*W."""
    if down_sample:
        # TODO(synk): stride-2 depthwise path (down_sample=True) not implemented.
        raise NotImplementedError("down_sample=True not supported")
    B, N, C = x.shape
    assert N == H * W
    out_dtype = x.dtype

    w_fc1, b_fc1 = params["fc1_w"], params["fc1_b"]          # (hid,C,1,1), (hid,)
    g1, be1, m1, v1 = params["bn1"]                          # each (hid,)
    w_fc2, b_fc2 = params["fc2_w"], params["fc2_b"]          # (hid,1,3,3), (hid,)
    g2, be2, m2, v2 = params["bn2"]
    w_fc3, b_fc3 = params["fc3_w"], params["fc3_b"]          # (out,hid,1,1), (out,)

    hidden = w_fc1.shape[0]
    Cout = w_fc3.shape[0]

    # Fold eval-mode BatchNorm (running stats) into the adjacent convs.
    # (Parameter-only glue; constant-folded when weights are static under jit.)
    s1 = g1 / jnp.sqrt(v1 + eps)
    w1_eff = (w_fc1.reshape(hidden, C) * s1[:, None]).T.astype(jnp.bfloat16)   # (C, hid)
    b1_eff = (b_fc1 * s1 + (be1 - m1 * s1)).reshape(1, hidden).astype(jnp.float32)

    s2 = g2 / jnp.sqrt(v2 + eps)
    dwk_eff = (w_fc2.reshape(hidden, 9) * s2[:, None]).T.astype(jnp.float32)   # (9, hid)
    b2_eff = (b_fc2 * s2 + (be2 - m2 * s2)).reshape(1, hidden).astype(jnp.float32)

    w3_eff = w_fc3.reshape(Cout, hidden).T.astype(jnp.bfloat16)                # (hid, out)
    b3_eff = b_fc3.reshape(1, Cout).astype(jnp.float32)

    # Stream activations as bf16 (halves HBM<->VMEM bytes); MXU accumulates f32.
    x_bf16 = x.astype(jnp.bfloat16)

    Bblk = block_b if block_b is not None else _pick_block_b(B, N)
    assert B % Bblk == 0
    grid = (B // Bblk,)

    # VMEM budget: double-buffered x/out blocks + weights + f32 intermediates.
    out_isz = jnp.dtype(out_dtype).itemsize
    vmem_needed = (
        2 * (Bblk * N * C * 2 + Bblk * N * Cout * out_isz)
        + 2 * ((C * hidden + hidden * Cout) * 2 + (9 + 2) * hidden * 4 + Cout * 4)
        + 10 * Bblk * N * hidden * 4)
    vmem_limit = int(min(max(vmem_needed, 32 * 1024 * 1024), 120 * 1024 * 1024))

    cost = pl.CostEstimate(
        flops=2 * B * N * (C * hidden + hidden * Cout) + 18 * B * N * hidden,
        transcendentals=2 * B * N * hidden,
        bytes_accessed=(B * N * C * 2 + B * N * Cout * out_isz
                        + (C * hidden + hidden * Cout) * 2
                        + (9 + 2) * hidden * 4 + Cout * 4),
    )

    return pl.pallas_call(
        functools.partial(_dwmlp_kernel, H=H, W=W, block_b=Bblk),
        out_shape=jax.ShapeDtypeStruct((B, N, Cout), out_dtype),
        grid=grid,
        in_specs=[
            pl.BlockSpec((Bblk, N, C), lambda b: (b, 0, 0)),     # x (bf16)
            pl.BlockSpec((C, hidden), lambda b: (0, 0)),         # W1^T (BN1 folded)
            pl.BlockSpec((1, hidden), lambda b: (0, 0)),         # b1
            pl.BlockSpec((9, hidden), lambda b: (0, 0)),         # depthwise taps
            pl.BlockSpec((1, hidden), lambda b: (0, 0)),         # b2
            pl.BlockSpec((hidden, Cout), lambda b: (0, 0)),      # W3^T
            pl.BlockSpec((1, Cout), lambda b: (0, 0)),           # b3
        ],
        out_specs=pl.BlockSpec((Bblk, N, Cout), lambda b: (b, 0, 0)),
        compiler_params=pltpu.CompilerParams(
            dimension_semantics=("parallel",),
            vmem_limit_bytes=vmem_limit),
        cost_estimate=cost,
    )(x_bf16, w1_eff, b1_eff, dwk_eff, b2_eff, w3_eff, b3_eff)


def _reference(x, w1, b1, dwk, b2, w3, b3, H, W):
    """Plain-JAX f32 reference using the same folded parameters."""
    B, N, C = x.shape
    hidden = w1.shape[1]
    h = _gelu(x.reshape(B * N, C).astype(jnp.float32) @ w1.astype(jnp.float32) + b1)
    h = h.reshape(B, H, W, hidden)
    hp = jnp.pad(h, ((0, 0), (1, 1), (1, 1), (0, 0)))
    acc = jnp.zeros_like(h)
    for kh in range(3):
        for kw in range(3):
            acc = acc + hp[:, kh:kh + H, kw:kw + W, :] * dwk[kh * 3 + kw]
    h2 = _gelu(acc + b2)
    y = h2.reshape(B * N, hidden) @ w3.astype(jnp.float32) + b3
    return y.reshape(B, N, -1)


if __name__ == "__main__":
    B = 2
    C = 64            # in_features == out_features
    hidden = 128      # hidden_features (lane-dense)
    Cout = C
    H = W = 16        # W % 8 == 0 keeps the (N,hid)<->(H,W,hid) reshape free
    N = H * W

    key = jax.random.PRNGKey(0)
    ks = jax.random.split(key, 15)

    x = jax.random.normal(ks[0], (B, N, C), jnp.float32)

    params = {
        "fc1_w": jax.random.normal(ks[1], (hidden, C, 1, 1), jnp.float32) * 0.1,
        "fc1_b": jax.random.normal(ks[2], (hidden,), jnp.float32) * 0.02,
        "bn1": (
            1.0 + 0.1 * jax.random.normal(ks[3], (hidden,), jnp.float32),    # gamma
            0.1 * jax.random.normal(ks[4], (hidden,), jnp.float32),          # beta
            0.1 * jax.random.normal(ks[5], (hidden,), jnp.float32),          # running_mean
            jnp.abs(jax.random.normal(ks[6], (hidden,), jnp.float32)) + 0.5, # running_var
        ),
        "fc2_w": jax.random.normal(ks[7], (hidden, 1, 3, 3), jnp.float32) * 0.1,
        "fc2_b": jax.random.normal(ks[8], (hidden,), jnp.float32) * 0.02,
        "bn2": (
            1.0 + 0.1 * jax.random.normal(ks[9], (hidden,), jnp.float32),
            0.1 * jax.random.normal(ks[10], (hidden,), jnp.float32),
            0.1 * jax.random.normal(ks[11], (hidden,), jnp.float32),
            jnp.abs(jax.random.normal(ks[12], (hidden,), jnp.float32)) + 0.5,
        ),
        "fc3_w": jax.random.normal(ks[13], (Cout, hidden, 1, 1), jnp.float32) * 0.1,
        "fc3_b": jax.random.normal(ks[14], (Cout,), jnp.float32) * 0.02,
    }

    out = dwmlp_forward(x, params, H=H, W=W)
    out = jax.block_until_ready(out)
    assert out.shape == (B, N, Cout)

    # Loose sanity check vs. a plain-JAX f32 reference (bf16 MXU operands ->
    # small relative differences expected).
    eps = 1e-5
    g1, be1, m1, v1 = params["bn1"]
    g2, be2, m2, v2 = params["bn2"]
    s1 = g1 / jnp.sqrt(v1 + eps)
    s2 = g2 / jnp.sqrt(v2 + eps)
    w1_r = (params["fc1_w"].reshape(hidden, C) * s1[:, None]).T
    b1_r = (params["fc1_b"] * s1 + (be1 - m1 * s1)).reshape(1, hidden)
    dwk_r = (params["fc2_w"].reshape(hidden, 9) * s2[:, None]).T
    b2_r = (params["fc2_b"] * s2 + (be2 - m2 * s2)).reshape(1, hidden)
    w3_r = params["fc3_w"].reshape(Cout, hidden).T
    b3_r = params["fc3_b"].reshape(1, Cout)
    ref = _reference(x, w1_r, b1_r, dwk_r, b2_r, w3_r, b3_r, H, W)
    assert jnp.max(jnp.abs(out.astype(jnp.float32) - ref)) < 1e-1

    print("KERNEL_OK")
</pallas_src>

<mosaic_0001>
module attributes {stable_mosaic.version = 11 : i64} {
  func.func @_dwmlp_kernel(%arg0: i32, %arg1: memref<1x256x64xbf16, #tpu.memory_space<vmem>>, %arg2: memref<64x128xbf16, #tpu.memory_space<vmem>>, %arg3: memref<1x128xf32, #tpu.memory_space<vmem>>, %arg4: memref<9x128xf32, #tpu.memory_space<vmem>>, %arg5: memref<1x128xf32, #tpu.memory_space<vmem>>, %arg6: memref<128x64xbf16, #tpu.memory_space<vmem>>, %arg7: memref<1x64xf32, #tpu.memory_space<vmem>>, %arg8: memref<1x256x64xf32, #tpu.memory_space<vmem>>) attributes {dimension_semantics = [#tpu.dimension_semantics<parallel>], iteration_bounds = array<i64: 2>, scalar_prefetch = 0 : i64, scratch_operands = 0 : i64, tpu.core_type = #tpu.core_type<tc>, window_params = [{transform_indices = @transform_0, window_bounds = array<i64: 1, 256, 64>}, {pipeline_mode = #tpu.pipeline_mode<synchronous>, transform_indices = @transform_1, window_bounds = array<i64: 64, 128>}, {pipeline_mode = #tpu.pipeline_mode<synchronous>, transform_indices = @transform_2, window_bounds = array<i64: 1, 128>}, {pipeline_mode = #tpu.pipeline_mode<synchronous>, transform_indices = @transform_3, window_bounds = array<i64: 9, 128>}, {pipeline_mode = #tpu.pipeline_mode<synchronous>, transform_indices = @transform_4, window_bounds = array<i64: 1, 128>}, {pipeline_mode = #tpu.pipeline_mode<synchronous>, transform_indices = @transform_5, window_bounds = array<i64: 128, 64>}, {pipeline_mode = #tpu.pipeline_mode<synchronous>, transform_indices = @transform_6, window_bounds = array<i64: 1, 64>}, {transform_indices = @transform_7, window_bounds = array<i64: 1, 256, 64>}]} {
    %c0 = arith.constant 0 : index
    %c0_0 = arith.constant 0 : index
    %c0_1 = arith.constant 0 : index
    %0 = vector.load %arg1[%c0, %c0_0, %c0_1] : memref<1x256x64xbf16, #tpu.memory_space<vmem>>, vector<1x256x64xbf16>
    %1 = vector.shape_cast %0 : vector<1x256x64xbf16> to vector<256x64xbf16>
    %c0_2 = arith.constant 0 : index
    %c0_3 = arith.constant 0 : index
    %2 = vector.load %arg2[%c0_2, %c0_3] : memref<64x128xbf16, #tpu.memory_space<vmem>>, vector<64x128xbf16>
    %cst = arith.constant dense<0.000000e+00> : vector<256x128xf32>
    %3 = tpu.matmul %1, %2, %cst {dimension_numbers = #tpu.dot_dimension_numbers<[1], [0], [0], [1], [0, 0, 1, 1], [], []>} : vector<256x64xbf16>, vector<64x128xbf16>, vector<256x128xf32> -> vector<256x128xf32>
    %c0_4 = arith.constant 0 : index
    %c0_5 = arith.constant 0 : index
    %4 = vector.load %arg3[%c0_4, %c0_5] : memref<1x128xf32, #tpu.memory_space<vmem>>, vector<1x128xf32>
    %5 = vector.broadcast %4 : vector<1x128xf32> to vector<256x128xf32>
    %6 = arith.addf %3, %5 : vector<256x128xf32>
    %cst_6 = arith.constant 5.000000e-01 : f32
    %7 = vector.broadcast %cst_6 : f32 to vector<256x128xf32>
    %8 = arith.mulf %7, %6 : vector<256x128xf32>
    %cst_7 = arith.constant 4.471500e-02 : f32
    %9 = vector.broadcast %cst_7 : f32 to vector<256x128xf32>
    %10 = arith.mulf %9, %6 : vector<256x128xf32>
    %11 = arith.mulf %10, %6 : vector<256x128xf32>
    %12 = arith.mulf %11, %6 : vector<256x128xf32>
    %13 = arith.addf %6, %12 : vector<256x128xf32>
    %cst_8 = arith.constant 0.797884583 : f32
    %14 = vector.broadcast %cst_8 : f32 to vector<256x128xf32>
    %15 = arith.mulf %14, %13 : vector<256x128xf32>
    %16 = math.tanh %15 : vector<256x128xf32>
    %cst_9 = arith.constant 1.000000e+00 : f32
    %17 = vector.broadcast %cst_9 : f32 to vector<256x128xf32>
    %18 = arith.addf %17, %16 : vector<256x128xf32>
    %19 = arith.mulf %8, %18 : vector<256x128xf32>
    %20 = vector.shape_cast %19 : vector<256x128xf32> to vector<1x16x16x128xf32>
    %c0_10 = arith.constant 0 : index
    %c0_11 = arith.constant 0 : index
    %21 = vector.load %arg4[%c0_10, %c0_11] : memref<9x128xf32, #tpu.memory_space<vmem>>, vector<9x128xf32>
    %22 = vector.extract_strided_slice %21 {offsets = [0, 0], sizes = [1, 128], strides = [1, 1]} : vector<9x128xf32> to vector<1x128xf32>
    %23 = vector.shape_cast %22 : vector<1x128xf32> to vector<128xf32>
    %24 = vector.shape_cast %23 : vector<128xf32> to vector<1x1x1x128xf32>
    %25 = vector.extract_strided_slice %21 {offsets = [1, 0], sizes = [1, 128], strides = [1, 1]} : vector<9x128xf32> to vector<1x128xf32>
    %26 = vector.shape_cast %25 : vector<1x128xf32> to vector<128xf32>
    %27 = vector.shape_cast %26 : vector<128xf32> to vector<1x1x1x128xf32>
    %28 = vector.extract_strided_slice %21 {offsets = [2, 0], sizes = [1, 128], strides = [1, 1]} : vector<9x128xf32> to vector<1x128xf32>
    %29 = vector.shape_cast %28 : vector<1x128xf32> to vector<128xf32>
    %30 = vector.shape_cast %29 : vector<128xf32> to vector<1x1x1x128xf32>
    %31 = vector.extract_strided_slice %21 {offsets = [3, 0], sizes = [1, 128], strides = [1, 1]} : vector<9x128xf32> to vector<1x128xf32>
    %32 = vector.shape_cast %31 : vector<1x128xf32> to vector<128xf32>
    %33 = vector.shape_cast %32 : vector<128xf32> to vector<1x1x1x128xf32>
    %34 = vector.extract_strided_slice %21 {offsets = [4, 0], sizes = [1, 128], strides = [1, 1]} : vector<9x128xf32> to vector<1x128xf32>
    %35 = vector.shape_cast %34 : vector<1x128xf32> to vector<128xf32>
    %36 = vector.shape_cast %35 : vector<128xf32> to vector<1x1x1x128xf32>
    %37 = vector.extract_strided_slice %21 {offsets = [5, 0], sizes = [1, 128], strides = [1, 1]} : vector<9x128xf32> to vector<1x128xf32>
    %38 = vector.shape_cast %37 : vector<1x128xf32> to vector<128xf32>
    %39 = vector.shape_cast %38 : vector<128xf32> to vector<1x1x1x128xf32>
    %40 = vector.extract_strided_slice %21 {offsets = [6, 0], sizes = [1, 128], strides = [1, 1]} : vector<9x128xf32> to vector<1x128xf32>
    %41 = vector.shape_cast %40 : vector<1x128xf32> to vector<128xf32>
    %42 = vector.shape_cast %41 : vector<128xf32> to vector<1x1x1x128xf32>
    %43 = vector.extract_strided_slice %21 {offsets = [7, 0], sizes = [1, 128], strides = [1, 1]} : vector<9x128xf32> to vector<1x128xf32>
    %44 = vector.shape_cast %43 : vector<1x128xf32> to vector<128xf32>
    %45 = vector.shape_cast %44 : vector<128xf32> to vector<1x1x1x128xf32>
    %46 = vector.extract_strided_slice %21 {offsets = [8, 0], sizes = [1, 128], strides = [1, 1]} : vector<9x128xf32> to vector<1x128xf32>
    %47 = vector.shape_cast %46 : vector<1x128xf32> to vector<128xf32>
    %48 = vector.shape_cast %47 : vector<128xf32> to vector<1x1x1x128xf32>
    %cst_12 = arith.constant 0.000000e+00 : f32
    %49 = vector.broadcast %cst_12 : f32 to vector<1x1x16x128xf32>
    %50 = vector.extract_strided_slice %20 {offsets = [0, 0, 0, 0], sizes = [1, 15, 16, 128], strides = [1, 1, 1, 1]} : vector<1x16x16x128xf32> to vector<1x15x16x128xf32>
    %51 = tpu.concatenate %49, %50 in 1 : vector<1x1x16x128xf32>, vector<1x15x16x128xf32> -> vector<1x16x16x128xf32>
    %cst_13 = arith.constant 0.000000e+00 : f32
    %52 = vector.broadcast %cst_13 : f32 to vector<1x16x1x128xf32>
    %53 = vector.extract_strided_slice %51 {offsets = [0, 0, 0, 0], sizes = [1, 16, 15, 128], strides = [1, 1, 1, 1]} : vector<1x16x16x128xf32> to vector<1x16x15x128xf32>
    %54 = tpu.concatenate %52, %53 in 2 : vector<1x16x1x128xf32>, vector<1x16x15x128xf32> -> vector<1x16x16x128xf32>
    %55 = vector.broadcast %24 : vector<1x1x1x128xf32> to vector<1x16x16x128xf32>
    %56 = arith.mulf %54, %55 : vector<1x16x16x128xf32>
    %57 = vector.broadcast %27 : vector<1x1x1x128xf32> to vector<1x16x16x128xf32>
    %58 = arith.mulf %51, %57 : vector<1x16x16x128xf32>
    %59 = arith.addf %56, %58 : vector<1x16x16x128xf32>
    %cst_14 = arith.constant 0.000000e+00 : f32
    %60 = vector.broadcast %cst_14 : f32 to vector<1x16x1x128xf32>
    %61 = vector.extract_strided_slice %51 {offsets = [0, 0, 1, 0], sizes = [1, 16, 15, 128], strides = [1, 1, 1, 1]} : vector<1x16x16x128xf32> to vector<1x16x15x128xf32>
    %62 = tpu.concatenate %61, %60 in 2 : vector<1x16x15x128xf32>, vector<1x16x1x128xf32> -> vector<1x16x16x128xf32>
    %63 = vector.broadcast %30 : vector<1x1x1x128xf32> to vector<1x16x16x128xf32>
    %64 = arith.mulf %62, %63 : vector<1x16x16x128xf32>
    %65 = arith.addf %59, %64 : vector<1x16x16x128xf32>
    %cst_15 = arith.constant 0.000000e+00 : f32
    %66 = vector.broadcast %cst_15 : f32 to vector<1x16x1x128xf32>
    %67 = vector.extract_strided_slice %20 {offsets = [0, 0, 0, 0], sizes = [1, 16, 15, 128], strides = [1, 1, 1, 1]} : vector<1x16x16x128xf32> to vector<1x16x15x128xf32>
    %68 = tpu.concatenate %66, %67 in 2 : vector<1x16x1x128xf32>, vector<1x16x15x128xf32> -> vector<1x16x16x128xf32>
    %69 = vector.broadcast %33 : vector<1x1x1x128xf32> to vector<1x16x16x128xf32>
    %70 = arith.mulf %68, %69 : vector<1x16x16x128xf32>
    %71 = arith.addf %65, %70 : vector<1x16x16x128xf32>
    %72 = vector.broadcast %36 : vector<1x1x1x128xf32> to vector<1x16x16x128xf32>
    %73 = arith.mulf %20, %72 : vector<1x16x16x128xf32>
    %74 = arith.addf %71, %73 : vector<1x16x16x128xf32>
    %cst_16 = arith.constant 0.000000e+00 : f32
    %75 = vector.broadcast %cst_16 : f32 to vector<1x16x1x128xf32>
    %76 = vector.extract_strided_slice %20 {offsets = [0, 0, 1, 0], sizes = [1, 16, 15, 128], strides = [1, 1, 1, 1]} : vector<1x16x16x128xf32> to vector<1x16x15x128xf32>
    %77 = tpu.concatenate %76, %75 in 2 : vector<1x16x15x128xf32>, vector<1x16x1x128xf32> -> vector<1x16x16x128xf32>
    %78 = vector.broadcast %39 : vector<1x1x1x128xf32> to vector<1x16x16x128xf32>
    %79 = arith.mulf %77, %78 : vector<1x16x16x128xf32>
    %80 = arith.addf %74, %79 : vector<1x16x16x128xf32>
    %cst_17 = arith.constant 0.000000e+00 : f32
    %81 = vector.broadcast %cst_17 : f32 to vector<1x1x16x128xf32>
    %82 = vector.extract_strided_slice %20 {offsets = [0, 1, 0, 0], sizes = [1, 15, 16, 128], strides = [1, 1, 1, 1]} : vector<1x16x16x128xf32> to vector<1x15x16x128xf32>
    %83 = tpu.concatenate %82, %81 in 1 : vector<1x15x16x128xf32>, vector<1x1x16x128xf32> -> vector<1x16x16x128xf32>
    %cst_18 = arith.constant 0.000000e+00 : f32
    %84 = vector.broadcast %cst_18 : f32 to vector<1x16x1x128xf32>
    %85 = vector.extract_strided_slice %83 {offsets = [0, 0, 0, 0], sizes = [1, 16, 15, 128], strides = [1, 1, 1, 1]} : vector<1x16x16x128xf32> to vector<1x16x15x128xf32>
    %86 = tpu.concatenate %84, %85 in 2 : vector<1x16x1x128xf32>, vector<1x16x15x128xf32> -> vector<1x16x16x128xf32>
    %87 = vector.broadcast %42 : vector<1x1x1x128xf32> to vector<1x16x16x128xf32>
    %88 = arith.mulf %86, %87 : vector<1x16x16x128xf32>
    %89 = arith.addf %80, %88 : vector<1x16x16x128xf32>
    %90 = vector.broadcast %45 : vector<1x1x1x128xf32> to vector<1x16x16x128xf32>
    %91 = arith.mulf %83, %90 : vector<1x16x16x128xf32>
    %92 = arith.addf %89, %91 : vector<1x16x16x128xf32>
    %cst_19 = arith.constant 0.000000e+00 : f32
    %93 = vector.broadcast %cst_19 : f32 to vector<1x16x1x128xf32>
    %94 = vector.extract_strided_slice %83 {offsets = [0, 0, 1, 0], sizes = [1, 16, 15, 128], strides = [1, 1, 1, 1]} : vector<1x16x16x128xf32> to vector<1x16x15x128xf32>
    %95 = tpu.concatenate %94, %93 in 2 : vector<1x16x15x128xf32>, vector<1x16x1x128xf32> -> vector<1x16x16x128xf32>
    %96 = vector.broadcast %48 : vector<1x1x1x128xf32> to vector<1x16x16x128xf32>
    %97 = arith.mulf %95, %96 : vector<1x16x16x128xf32>
    %98 = arith.addf %92, %97 : vector<1x16x16x128xf32>
    %c0_20 = arith.constant 0 : index
    %c0_21 = arith.constant 0 : index
    %99 = vector.load %arg5[%c0_20, %c0_21] : memref<1x128xf32, #tpu.memory_space<vmem>>, vector<1x128xf32>
    %100 = vector.shape_cast %99 : vector<1x128xf32> to vector<1x1x1x128xf32>
    %101 = vector.broadcast %100 : vector<1x1x1x128xf32> to vector<1x16x16x128xf32>
    %102 = arith.addf %98, %101 : vector<1x16x16x128xf32>
    %cst_22 = arith.constant 5.000000e-01 : f32
    %103 = vector.broadcast %cst_22 : f32 to vector<1x16x16x128xf32>
    %104 = arith.mulf %103, %102 : vector<1x16x16x128xf32>
    %cst_23 = arith.constant 4.471500e-02 : f32
    %105 = vector.broadcast %cst_23 : f32 to vector<1x16x16x128xf32>
    %106 = arith.mulf %105, %102 : vector<1x16x16x128xf32>
    %107 = arith.mulf %106, %102 : vector<1x16x16x128xf32>
    %108 = arith.mulf %107, %102 : vector<1x16x16x128xf32>
    %109 = arith.addf %102, %108 : vector<1x16x16x128xf32>
    %cst_24 = arith.constant 0.797884583 : f32
    %110 = vector.broadcast %cst_24 : f32 to vector<1x16x16x128xf32>
    %111 = arith.mulf %110, %109 : vector<1x16x16x128xf32>
    %112 = math.tanh %111 : vector<1x16x16x128xf32>
    %cst_25 = arith.constant 1.000000e+00 : f32
    %113 = vector.broadcast %cst_25 : f32 to vector<1x16x16x128xf32>
    %114 = arith.addf %113, %112 : vector<1x16x16x128xf32>
    %115 = arith.mulf %104, %114 : vector<1x16x16x128xf32>
    %116 = vector.shape_cast %115 : vector<1x16x16x128xf32> to vector<256x128xf32>
    %117 = arith.truncf %116 : vector<256x128xf32> to vector<256x128xbf16>
    %c0_26 = arith.constant 0 : index
    %c0_27 = arith.constant 0 : index
    %118 = vector.load %arg6[%c0_26, %c0_27] : memref<128x64xbf16, #tpu.memory_space<vmem>>, vector<128x64xbf16>
    %cst_28 = arith.constant dense<0.000000e+00> : vector<256x64xf32>
    %119 = tpu.matmul %117, %118, %cst_28 {dimension_numbers = #tpu.dot_dimension_numbers<[1], [0], [0], [1], [0, 0, 1, 1], [], []>} : vector<256x128xbf16>, vector<128x64xbf16>, vector<256x64xf32> -> vector<256x64xf32>
    %c0_29 = arith.constant 0 : index
    %c0_30 = arith.constant 0 : index
    %120 = vector.load %arg7[%c0_29, %c0_30] : memref<1x64xf32, #tpu.memory_space<vmem>>, vector<1x64xf32>
    %121 = vector.broadcast %120 : vector<1x64xf32> to vector<256x64xf32>
    %122 = arith.addf %119, %121 : vector<256x64xf32>
    %123 = vector.shape_cast %122 : vector<256x64xf32> to vector<1x256x64xf32>
    %c0_31 = arith.constant 0 : index
    %c0_32 = arith.constant 0 : index
    %c0_33 = arith.constant 0 : index
    %124 = vector.load %arg8[%c0_31, %c0_32, %c0_33] : memref<1x256x64xf32, #tpu.memory_space<vmem>>, vector<1x256x64xf32>
    tpu.vector_store %arg8[%c0_31, %c0_32, %c0_33], %123 {strides = array<i32>} : memref<1x256x64xf32, #tpu.memory_space<vmem>>, vector<1x256x64xf32>,
    return
  }
  func.func @transform_0(%arg0: i32) -> (i32, i32, i32) {
    %c0_i32 = arith.constant 0 : i32
    %c0_i32_0 = arith.constant 0 : i32
    %c0_i32_1 = arith.constant 0 : i32
    return %arg0, %c0_i32, %c0_i32_0 : i32, i32, i32
  }
  func.func @transform_1(%arg0: i32) -> (i32, i32) {
    %c0_i32 = arith.constant 0 : i32
    %c0_i32_0 = arith.constant 0 : i32
    %c0_i32_1 = arith.constant 0 : i32
    return %c0_i32, %c0_i32_0 : i32, i32
  }
  func.func @transform_2(%arg0: i32) -> (i32, i32) {
    %c0_i32 = arith.constant 0 : i32
    %c0_i32_0 = arith.constant 0 : i32
    %c0_i32_1 = arith.constant 0 : i32
    return %c0_i32, %c0_i32_0 : i32, i32
  }
  func.func @transform_3(%arg0: i32) -> (i32, i32) {
    %c0_i32 = arith.constant 0 : i32
    %c0_i32_0 = arith.constant 0 : i32
    %c0_i32_1 = arith.constant 0 : i32
    return %c0_i32, %c0_i32_0 : i32, i32
  }
  func.func @transform_4(%arg0: i32) -> (i32, i32) {
    %c0_i32 = arith.constant 0 : i32
    %c0_i32_0 = arith.constant 0 : i32
    %c0_i32_1 = arith.constant 0 : i32
    return %c0_i32, %c0_i32_0 : i32, i32
  }
  func.func @transform_5(%arg0: i32) -> (i32, i32) {
    %c0_i32 = arith.constant 0 : i32
    %c0_i32_0 = arith.constant 0 : i32
    %c0_i32_1 = arith.constant 0 : i32
    return %c0_i32, %c0_i32_0 : i32, i32
  }
  func.func @transform_6(%arg0: i32) -> (i32, i32) {
    %c0_i32 = arith.constant 0 : i32
    %c0_i32_0 = arith.constant 0 : i32
    %c0_i32_1 = arith.constant 0 : i32
    return %c0_i32, %c0_i32_0 : i32, i32
  }
  func.func @transform_7(%arg0: i32) -> (i32, i32, i32) {
    %c0_i32 = arith.constant 0 : i32
    %c0_i32_0 = arith.constant 0 : i32
    %c0_i32_1 = arith.constant 0 : i32
    return %arg0, %c0_i32, %c0_i32_0 : i32, i32, i32
  }
}

</mosaic_0001>

<bundles_post_ra>
// kernel: tpu_custom_call.1
= control target key start
LH: loop header
LB: loop body
LE: loop exit
PB: predicated region body
PF: predicated region fallthrough
CT: control target
= control target key end

     0   :  { %s2835_s24 = smov 0   ;;  %s4703_s0 = inlined_call_operand.vmem [shape: bf16[2,256,64], index: 0, kind: input, shape index: {}]   ;;  %s4704_s1 = inlined_call_operand.vmem [shape: bf16[64,128], index: 1, kind: input, shape index: {}]   ;;  %s4705_s2 = inlined_call_operand.vmem [shape: f32[1,128], index: 2, kind: input, shape index: {}]   ;;  %s4706_s3 = inlined_call_operand.vmem [shape: f32[9,128], index: 3, kind: input, shape index: {}]   ;;  %s4707_s4 = inlined_call_operand.vmem [shape: f32[1,128], index: 4, kind: input, shape index: {}]   ;;  %s4708_s5 = inlined_call_operand.vmem [shape: bf16[128,64], index: 5, kind: input, shape index: {}]   ;;  %s4709_s6 = inlined_call_operand.vmem [shape: f32[1,64], index: 6, kind: input, shape index: {}]   ;;  %s4710_s7 = inlined_call_operand.vmem [shape: f32[2,256,64], index: 7, kind: output, shape index: {}]  }
   0x1 LB: > { %s2408_s25 = sadd.s32 4294967295, %s2792_s24   ;;  %p2412_p0 = scmp.ge.s32.totalorder %s2792_s24, 1  ;;  %s2792_s24 = sphi %s2835_s24, %s17_s24  }
   0x2   : > { %p237_p1 = scmp.lt.s32.totalorder %s2792_s24, 3 }
   0x4   : > { %p238_p2 = pnand %p2412_p0, %p237_p1 }
   0x6   : > { %241 = sbr.rel (%p238_p2) target bundleno = 819 (0x333), region = 48 }
   0xd   : > { %v2626_v0 = vld [vmem:[%s4704_s1] sm:$0xff]   ;;  %p269_p3 = scmp.lt.s32.totalorder %s2408_s25, 1  ;;  %v2627_v1 = vld [vmem:[%s4704_s1 + $0x8] sm:$0xff]   ;;  %vm431_vm0 = vcmask 523264   ;;  %v2628_v2 = vld [vmem:[%s4704_s1 + $0x10] sm:$0xff]   ;;  %v1058_v22 = vlaneseq  ;;  %v2794_v27 = vmov 0.0  }
   0xe   : > { %2513 = vmatprep.subr.bf16.mxu0 %v2626_v0  ;;  %v2629_v4 = vld [vmem:[%s4704_s1 + $0x18] sm:$0xff]   ;;  %v2646_v20 = vld [vmem:[%s4708_s5] sm:$0xff]   ;;  %v2647_v21 = vld [vmem:[%s4708_s5 + $0x8] sm:$0xff]   ;;  %v2910_v28 = vrot.slane %v2794_v27, 7  ;;  %vm962_vm1 = vcmask 1040384   ;;  %v2934_v37 = vrot.slane %v2794_v27, 1 }
   0xf   : > { %s5079_s25 = smov (!%p269_p3, %s2408_s25), 1  ;;  %2514 = vmatpush3.bf16.msra.mxu0 %v2626_v0  ;;  %2601 = vmatprep.subr.bf16.mxu1 %v2646_v20  ;;  %v2901_v23 = vshrl.u32 %v1058_v22, 7  ;;  %v2908_v26 = vld [vmem:[%s4706_s3] sm:$0xff]  ;;  %v2648_v32 = vld [vmem:[%s4708_s5 + $0x10] sm:$0xff]   ;;  %vm1161_vm2 = vcmask 1046528  }
  0x10   : > { %2515 = vmatprep.subr.bf16.mxu0 %v2627_v1  ;;  %s2467_s9 = sshll.u32 %s5079_s25, 7  ;;  %2609 = vmatpush3.bf16.msra.mxu1 %v2646_v20  ;;  %4781 = vst [vmem:[#allocation2_spill] sm:$0xff] %v2910_v28  ;;  %v2924_v33 = vsel %vm962_vm1, 0.0, %v2910_v28  ;;  %v2929_v34 = vld [vmem:[%s4705_s2] ss:$0 sm:$0xff]  ;;  %4783 = vst [vmem:[#allocation4_spill] sm:$0xff] %v2934_v37 }
  0x11   : > { %s2858_s12 = scalar_lea.vmem %s4703_s0, %s2467_s9  ;;  %2602 = vmatprep.subr.bf16.mxu1 %v2647_v21  ;;  %v1060_v24 = vsub.s32 0, %v2901_v23  ;;  %v1096_v25 = vsub.s32 1, %v2901_v23  ;;  %v1259_v31 = vsub.s32 2, %v2901_v23  ;;  %4782 = vst [vmem:[#allocation3_spill] sm:$0xff] %v2924_v33  ;;  %v1403_v40 = vsub.s32 4, %v2901_v23  ;;  %s2468_s28 = sshll.u32 %s5079_s25, 8 }
  0x12   : > { %v2630_v3 = vld [vmem:[%s2858_s12] sm:$0xff]   ;;  %v2631_v5 = vld [vmem:[%s2858_s12 + $0x8] sm:$0xff]   ;;  %v2632_v6 = vld [vmem:[%s2858_s12 + $0x10] sm:$0xff]   ;;  %v1335_v43 = vsub.s32 3, %v2901_v23  ;;  %v1613_v46 = vsub.s32 7, %v2901_v23  ;;  %v2967_v58 = vsel %vm1161_vm2, %v2934_v37, 0.0  ;;  %s4602_s10 = scalar_lea.vmem %s4710_s7, %s2468_s28 }
  0x13   : > { %2516 = vmatpush3.bf16.msra.mxu0 %v2627_v1  ;;  %2521 = vmatprep.mubr.msk.bf16.mxu0 %vm431_vm0, %v2630_v3  ;;  %v2633_v7 = vld [vmem:[%s2858_s12 + $0x18] sm:$0xff]   ;;  %v2634_v8 = vld [vmem:[%s2858_s12 + $0x20] sm:$0xff]   ;;  %v2635_v9 = vld [vmem:[%s2858_s12 + $0x28] sm:$0xff]   ;;  %v2913_v29 = vrot.slane %v2908_v26, %v1060_v24  ;;  %v2916_v30 = vrot.slane %v2908_v26, %v1096_v25  ;;  %v2937_v38 = vrot.slane %v2908_v26, %v1259_v31  ;;  %v1545_v59 = vsub.s32 6, %v2901_v23 }
  0x14   : > { %2517 = vmatprep.subr.bf16.mxu0 %v2628_v2  ;;  %v2636_v10 = vld [vmem:[%s2858_s12 + $0x30] sm:$0xff]   ;;  %v2637_v11 = vld [vmem:[%s2858_s12 + $0x38] sm:$0xff]   ;;  %v2638_v12 = vld [vmem:[%s2858_s12 + $0x40] sm:$0xff]   ;;  %2610 = vmatpush3.bf16.msra.mxu1 %v2647_v21  ;;  %v2955_v52 = vrot.slane %v2908_v26, %v1403_v40  ;;  %4784 = vst [vmem:[#allocation5_spill] sm:$0xff] %v2967_v58  ;;  %v2971_v60 = vrot.slane %v2908_v26, %v1335_v43  ;;  %v1477_v3 = vsub.s32 5, %v2901_v23 }
  0x15   : > { %v2639_v13 = vld [vmem:[%s2858_s12 + $0x48] sm:$0xff]   ;;  %v2640_v14 = vld [vmem:[%s2858_s12 + $0x50] sm:$0xff]   ;;  %v2641_v15 = vld [vmem:[%s2858_s12 + $0x58] sm:$0xff]   ;;  %2603 = vmatprep.subr.bf16.mxu1 %v2648_v32  ;;  %v1062_v35 = vmul.f32 %v2913_v29, %v2924_v33  ;;  %v1098_v36 = vmul.f32 0.0, %v2916_v30  ;;  %v1261_v49 = vmul.f32 %v2937_v38, %v2934_v37  ;;  %v1063_v55 = vmul.f32 %v2913_v29, %v2910_v28 }
  0x16   : > { %v2642_v16 = vld [vmem:[%s2858_s12 + $0x60] sm:$0xff]   ;;  %v2643_v17 = vld [vmem:[%s2858_s12 + $0x68] sm:$0xff]   ;;  %v2644_v18 = vld [vmem:[%s2858_s12 + $0x70] sm:$0xff]   ;;  %v2976_v63 = vrot.slane %v2908_v26, %v1613_v46 }
  0x17   : > { %2518 = vmatpush3.bf16.msra.mxu0 %v2628_v2  ;;  %v2645_v19 = vld [vmem:[%s2858_s12 + $0x78] sm:$0xff]   ;;  %v1129_v48 = vadd.f32 %v1098_v36, %v1062_v35 }
  0x18   : > { %2519 = vmatprep.subr.bf16.mxu0 %v2629_v4  ;;  %2611 = vmatpush3.bf16.msra.mxu1 %v2648_v32 }
  0x19   : > { %v2979_v1 = vadd.f32 %v1261_v49, %v1129_v48 }
  0x1b   : > { %2520 = vmatpush3.bf16.msra.mxu0 %v2629_v4 }
  0x1c   : > { %2553 = vmatprep.subr.bf16.mxu0 %v2646_v20 }
  0x1e   : > { %2522 = vmatmul.mubr.msk.bf16.vlgmr.msra.gmra.mrb[0].mxu0 %vm431_vm0, %v2631_v5 }
  0x1f   : > { %2525 = vmatprep.mubr.msk.bf16.mxu0 %vm431_vm0, %v2632_v6  ;;  %2554 = vmatpush3.bf16.msra.mxu0 %v2646_v20  ;;  %v1130_v6 = vadd.f32 %v1098_v36, %v1063_v55 }
  0x20   : > { %2555 = vmatprep.subr.bf16.mxu0 %v2647_v21 }
  0x23   : > { %2556 = vmatpush3.bf16.msra.mxu0 %v2647_v21  ;;  %v3001_v21 = vrot.slane %v2908_v26, %v1477_v3 }
  0x24   : > { %2557 = vmatprep.subr.bf16.mxu0 %v2648_v32 }
  0x26   : > { %2526 = vmatmul.mubr.msk.bf16.gmra.mrb[4].mxu0 %vm431_vm0, %v2633_v7  ;;  %v1262_v7 = vmul.f32 %v2937_v38, %v2967_v58 }
  0x27   : > { %2529 = vmatprep.mubr.msk.bf16.mxu0 %vm431_vm0, %v2634_v8  ;;  %2558 = vmatpush3.bf16.msra.mxu0 %v2648_v32  ;;  %v2650_v32 = vld [vmem:[%s4708_s5 + $0x20] sm:$0xff]  }
  0x28   : > { %v3004_v27 = vadd.f32 %v1262_v7, %v1130_v6 }
  0x2e   : > { %2530 = vmatmul.mubr.msk.bf16.gmra.mrb[8].mxu0 %vm431_vm0, %v2635_v9  ;;  %v2649_v9 = vld [vmem:[%s4708_s5 + $0x18] sm:$0xff]  }
  0x2f   : > { %2533 = vmatprep.mubr.msk.bf16.mxu0 %vm431_vm0, %v2636_v10  ;;  %2559 = vmatprep.subr.bf16.mxu0 %v2649_v9 }
  0x30   : > { %2604 = vmatprep.subr.bf16.mxu1 %v2649_v9  ;;  %2560 = vmatpush3.bf16.msra.mxu0 %v2649_v9 }
  0x31   : > { %2612 = vmatpush3.bf16.msra.mxu1 %v2649_v9  ;;  %2561 = vmatprep.subr.bf16.mxu0 %v2650_v32 }
  0x32   : > { %2605 = vmatprep.subr.bf16.mxu1 %v2650_v32 }
  0x34   : > { %2562 = vmatpush3.bf16.msra.mxu0 %v2650_v32 }
  0x35   : > { %2613 = vmatpush3.bf16.msra.mxu1 %v2650_v32 }
  0x36   : > { %2534 = vmatmul.mubr.msk.bf16.gmra.mrb[12].mxu0 %vm431_vm0, %v2637_v11 }
  0x37   : > { %2537 = vmatprep.mubr.msk.bf16.mxu0 %vm431_vm0, %v2638_v12  ;;  %v2993_v12 = vrot.slane %v2908_v26, %v1545_v59 }
  0x3e   : > { %2538 = vmatmul.mubr.msk.bf16.gmra.mrb[16].mxu0 %vm431_vm0, %v2639_v13 }
  0x3f   : > { %2541 = vmatprep.mubr.msk.bf16.mxu0 %vm431_vm0, %v2640_v14 }
  0x46   : > { %2542 = vmatmul.mubr.msk.bf16.gmra.mrb[20].mxu0 %vm431_vm0, %v2641_v15 }
  0x47   : > { %2545 = vmatprep.mubr.msk.bf16.mxu0 %vm431_vm0, %v2642_v16 }
  0x4e   : > { %2546 = vmatmul.mubr.msk.bf16.gmra.mrb[24].mxu0 %vm431_vm0, %v2643_v17 }
  0x4f   : > { %2549 = vmatprep.mubr.msk.bf16.mxu0 %vm431_vm0, %v2644_v18 }
  0x56   : > { %2550 = vmatmul.mubr.msk.bf16.gmra.mrb[28].mxu0 %vm431_vm0, %v2645_v19 }
  0xf1   : > { %v2523_v39 = vpop.f32.mrb[0].mxu0 }
  0xf2   : > { %v2941_v41 = vadd.f32 %v2523_v39, %v2929_v34  ;;  %v514_v42 = vpop.f32.mrb[1].mxu0 }
  0xf3   : > { %v2945_v44 = vadd.f32 %v2929_v34, %v514_v42  ;;  %v2524_v45 = vpop.f32.mrb[2].mxu0 }
  0xf4   : > { %v675_v47 = vmul.f32 0.044715, %v2941_v41  ;;  %v2952_v50 = vadd.f32 %v2524_v45, %v2929_v34  ;;  %v517_v51 = vpop.f32.mrb[3].mxu0  ;;  %v3012_v43 = vmul.f32 0.5, %v2941_v41 }
  0xf5   : > { %v673_v53 = vmul.f32 0.044715, %v2945_v44  ;;  %v2959_v54 = vadd.f32 %v2929_v34, %v517_v51 }
  0xf6   : > { %v707_v56 = vmul.f32 %v675_v47, %v2941_v41  ;;  %v676_v57 = vmul.f32 0.044715, %v2952_v50  ;;  %v3015_v47 = vmul.f32 0.5, %v2945_v44  ;;  %v3021_v55 = vmul.f32 0.5, %v2952_v50 }
  0xf7   : > { %v705_v61 = vmul.f32 %v673_v53, %v2945_v44  ;;  %v674_v62 = vmul.f32 0.044715, %v2959_v54  ;;  %v2651_v53 = vld [vmem:[%s4708_s5 + $0x28] sm:$0xff]  }
  0xf8   : > { %v739_v0 = vmul.f32 %v707_v56, %v2941_v41  ;;  %v708_v2 = vmul.f32 %v676_v57, %v2952_v50  ;;  %2563 = vmatprep.subr.bf16.mxu0 %v2651_v53  ;;  %2606 = vmatprep.subr.bf16.mxu1 %v2651_v53 }
  0xf9   : > { %v737_v4 = vmul.f32 %v705_v61, %v2945_v44  ;;  %v706_v5 = vmul.f32 %v674_v62, %v2959_v54  ;;  %v2527_v8 = vpop.f32.mrb[4].mxu0  ;;  %v3025_v61 = vmul.f32 0.5, %v2959_v54  ;;  %2564 = vmatpush3.bf16.msra.mxu0 %v2651_v53  ;;  %2614 = vmatpush3.bf16.msra.mxu1 %v2651_v53 }
  0xfa   : > { %v771_v10 = vadd.f32 %v739_v0, %v2941_v41  ;;  %v740_v11 = vmul.f32 %v708_v2, %v2952_v50  ;;  %v539_v13 = vadd.f32 %v2527_v8, %v2929_v34  ;;  %v530_v14 = vpop.f32.mrb[5].mxu0 }
  0xfb   : > { %v769_v15 = vadd.f32 %v737_v4, %v2945_v44  ;;  %v738_v16 = vmul.f32 %v706_v5, %v2959_v54  ;;  %v531_v17 = vadd.f32 %v2929_v34, %v530_v14  ;;  %v2528_v18 = vpop.f32.mrb[6].mxu0 }
  0xfc   : > { %v803_v19 = vmul.f32 0.7978846, %v771_v10  ;;  %v772_v20 = vadd.f32 %v740_v11, %v2952_v50  ;;  %v679_v22 = vmul.f32 0.044715, %v539_v13  ;;  %v533_v23 = vpop.f32.mrb[7].mxu0  ;;  %v542_v26 = vadd.f32 %v2528_v18, %v2929_v34  ;;  %v2652_v10 = vld [vmem:[%s4708_s5 + $0x30] sm:$0xff]  }
  0xfd   : > { %v801_v24 = vmul.f32 0.7978846, %v769_v15  ;;  %v770_v25 = vadd.f32 %v738_v16, %v2959_v54  ;;  %v677_v31 = vmul.f32 0.044715, %v531_v17  ;;  %v534_v42 = vadd.f32 %v2929_v34, %v533_v23  ;;  %2565 = vmatprep.subr.bf16.mxu0 %v2652_v10  ;;  %2607 = vmatprep.subr.bf16.mxu1 %v2652_v10 }
  0xfe   : > { %2654 = vtanh.f32 %v803_v19  ;;  %v804_v35 = vmul.f32 0.7978846, %v772_v20  ;;  %v711_v36 = vmul.f32 %v679_v22, %v539_v13  ;;  %v680_v46 = vmul.f32 0.044715, %v542_v26  ;;  %2566 = vmatpush3.bf16.msra.mxu0 %v2652_v10  ;;  %2615 = vmatpush3.bf16.msra.mxu1 %v2652_v10 }
  0xff   : > { %2656 = vtanh.f32 %v801_v24  ;;  %v802_v39 = vmul.f32 0.7978846, %v770_v25  ;;  %v709_v40 = vmul.f32 %v677_v31, %v531_v17  ;;  %v678_v49 = vmul.f32 0.044715, %v534_v42 }
 0x100   : > { %2658 = vtanh.f32 %v804_v35  ;;  %v743_v45 = vmul.f32 %v711_v36, %v539_v13  ;;  %v712_v56 = vmul.f32 %v680_v46, %v542_v26  ;;  %v3030_v3 = vmul.f32 0.5, %v539_v13 }
 0x101   : > { %2660 = vtanh.f32 %v802_v39  ;;  %v741_v48 = vmul.f32 %v709_v40, %v531_v17  ;;  %v2531_v51 = vpop.f32.mrb[8].mxu0  ;;  %v710_v62 = vmul.f32 %v678_v49, %v534_v42  ;;  %v3032_v50 = vmul.f32 0.5, %v531_v17  ;;  %v2653_v39 = vld [vmem:[%s4708_s5 + $0x38] sm:$0xff]  }
 0x102   : > { %v775_v41 = vadd.f32 %v743_v45, %v539_v13  ;;  %v555_v57 = vadd.f32 %v2531_v51, %v2929_v34  ;;  %v546_v59 = vpop.f32.mrb[9].mxu0  ;;  %v744_v4 = vmul.f32 %v712_v56, %v542_v26  ;;  %v3034_v54 = vmul.f32 0.5, %v542_v26  ;;  %2567 = vmatprep.subr.bf16.mxu0 %v2653_v39  ;;  %2608 = vmatprep.subr.bf16.mxu1 %v2653_v39 }
 0x103   : > { %v773_v44 = vadd.f32 %v741_v48, %v531_v17  ;;  %v3028_v0 = vadd.f32 %v2929_v34, %v546_v59  ;;  %v2532_v2 = vpop.f32.mrb[10].mxu0  ;;  %v742_v8 = vmul.f32 %v710_v62, %v534_v42  ;;  %v3040_v13 = vmul.f32 0.5, %v534_v42  ;;  %2568 = vmatpush3.bf16.msra.mxu0 %v2653_v39  ;;  %2616 = vmatpush3.bf16.msra.mxu1 %v2653_v39 }
 0x104   : > { %v683_v5 = vmul.f32 0.044715, %v555_v57  ;;  %v549_v6 = vpop.f32.mrb[11].mxu0  ;;  %v807_v7 = vmul.f32 0.7978846, %v775_v41  ;;  %v776_v11 = vadd.f32 %v744_v4, %v542_v26  ;;  %v3043_v15 = vadd.f32 %v2532_v2, %v2929_v34 }
 0x105   : > { %v681_v9 = vmul.f32 0.044715, %v3028_v0  ;;  %v805_v16 = vmul.f32 0.7978846, %v773_v44  ;;  %v774_v17 = vadd.f32 %v742_v8, %v534_v42  ;;  %v3045_v18 = vmul.f32 0.5, %v555_v57 }
 0x106   : > { %v715_v14 = vmul.f32 %v683_v5, %v555_v57  ;;  %v808_v22 = vmul.f32 0.7978846, %v776_v11  ;;  %v684_v24 = vmul.f32 0.044715, %v3043_v15  ;;  %v3050_v25 = vadd.f32 %v2929_v34, %v549_v6 }
 0x107   : > { %v713_v19 = vmul.f32 %v681_v9, %v3028_v0  ;;  %2662 = vtanh.f32 %v807_v7  ;;  %v806_v35 = vmul.f32 0.7978846, %v774_v17  ;;  %v3059_v46 = vmul.f32 0.5, %v3028_v0 }
 0x108   : > { %v2655_v20 = vpop.eup %2654  ;;  %v747_v23 = vmul.f32 %v715_v14, %v555_v57  ;;  %v716_v48 = vmul.f32 %v684_v24, %v3043_v15  ;;  %2664 = vtanh.f32 %v805_v16  ;;  %v3068_v56 = vmul.f32 0.5, %v3043_v15 }
 0x109   : > { %v2657_v31 = vpop.eup %2656  ;;  %v867_v32 = vadd.f32 1.0, %v2655_v20  ;;  %v745_v36 = vmul.f32 %v713_v19, %v3028_v0  ;;  %v3053_v26 = vpop.f32.mrb[12].mxu0  ;;  %2666 = vtanh.f32 %v808_v22  ;;  %v3074_v62 = vmul.f32 0.5, %v3050_v25 }
 0x10a   : > { %v2659_v40 = vpop.eup %2658  ;;  %v865_v42 = vadd.f32 1.0, %v2657_v31  ;;  %v779_v45 = vadd.f32 %v747_v23, %v555_v57  ;;  %v3062_v49 = vpop.f32.mrb[13].mxu0  ;;  %2668 = vtanh.f32 %v806_v35  ;;  %v3084_v8 = vmul.f32 %v716_v48, %v3043_v15 }
 0x10b   : > { %v2661_v51 = vpop.eup %2660  ;;  %v3065_v53 = vmul.f32 %v867_v32, %v3012_v43  ;;  %v868_v41 = vadd.f32 1.0, %v2659_v40  ;;  %v3070_v59 = vpop.f32.mrb[14].mxu0  ;;  %v777_v5 = vadd.f32 %v745_v36, %v3028_v0 }
 0x10c   : > { %v897_v57 = vmul.f32 %v865_v42, %v3015_v47  ;;  %v866_v44 = vadd.f32 1.0, %v2661_v51  ;;  %v3076_v2 = vpop.f32.mrb[15].mxu0  ;;  %v811_v4 = vmul.f32 0.7978846, %v779_v45 }
 0x10d   : > { %v968_v43 = vrot.slane %v3065_v53, 7  ;;  %v1101_v6 = vmul.f32 %v2916_v30, %v3065_v53  ;;  %v3091_v10 = vmul.f32 %v2955_v52, %v3065_v53  ;;  %v3094_v11 = vmul.f32 %v868_v41, %v3021_v55 }
 0x10e   : > { %v965_v7 = vrot.slane %v897_v57, 7  ;;  %v898_v0 = vmul.f32 %v866_v44, %v3025_v61  ;;  %v1099_v17 = vmul.f32 %v2916_v30, %v897_v57  ;;  %v1164_v19 = vrot.slane %v897_v57, 1 }
 0x10f   : > { %v3087_v9 = vsel %vm962_vm1, 0.0, %v968_v43  ;;  %v969_v23 = vrot.slane %v3094_v11, 7  ;;  %2670 = vtanh.f32 %v811_v4  ;;  %v1405_v61 = vmul.f32 %v2955_v52, %v897_v57 }
 0x110   : > { %v1066_v14 = vmul.f32 %v2913_v29, %v3087_v9  ;;  %v1043_v16 = vsel %vm962_vm1, 0.0, %v965_v7  ;;  %v1339_v55 = vmul.f32 %v2971_v60, %v3087_v9  ;;  %v966_v31 = vrot.slane %v898_v0, 7 }
 0x111   : > { %v1064_v20 = vmul.f32 %v2913_v29, %v1043_v16  ;;  %v1337_v22 = vmul.f32 %v2971_v60, %v1043_v16  ;;  %v3104_v24 = vpop.f32.mrb[16].mxu0  ;;  %v3109_v32 = vmul.f32 0.7978846, %v777_v5  ;;  %v2663_v36 = vpop.eup %2662  ;;  %v3116_v42 = vsel %vm962_vm1, %v968_v43, %v969_v23 }
 0x112   : > { %v3111_v35 = vpop.f32.mrb[17].mxu0  ;;  %v3113_v39 = vadd.f32 %v1101_v6, %v1066_v14  ;;  %v1102_v45 = vmul.f32 %v2916_v30, %v3094_v11  ;;  %v1067_v41 = vmul.f32 %v2913_v29, %v3116_v42  ;;  %v967_v57 = vsel %vm962_vm1, %v965_v7, %v966_v31  ;;  %v2665_v5 = vpop.eup %2664 }
 0x113   : > { %v1131_v40 = vadd.f32 %v1099_v17, %v1064_v20  ;;  %v3120_v48 = vpop.f32.mrb[18].mxu0  ;;  %v1369_v51 = vadd.f32 %v1337_v22, %v2979_v1  ;;  %v1165_v44 = vrot.slane %v898_v0, 1  ;;  %v1065_v6 = vmul.f32 %v2913_v29, %v967_v57  ;;  %v2667_v17 = vpop.eup %2666 }
 0x114   : > { %4785 = vst [vmem:[#allocation6_spill] sm:$0xff] %v3113_v39  ;;  %v3126_v4 = vpop.f32.mrb[19].mxu0  ;;  %v1100_v43 = vmul.f32 %v2916_v30, %v898_v0  ;;  %v1338_v14 = vmul.f32 %v2971_v60, %v967_v57  ;;  %v1406_v16 = vmul.f32 %v2955_v52, %v898_v0  ;;  %v3132_v20 = vadd.f32 %v1102_v45, %v1067_v41  ;;  %v2669_v23 = vpop.eup %2668 }
 0x115   : > { %v1166_v1 = vsel %vm1161_vm2, %v1164_v19, %v1165_v44  ;;  %v1242_v22 = vsel %vm1161_vm2, %v1165_v44, 0.0  ;;  %v871_v7 = vadd.f32 1.0, %v2663_v36  ;;  %v1340_v57 = vmul.f32 %v2971_v60, %v3116_v42 }
 0x116   : > { %4786 = vst [vmem:[#allocation7_spill] sm:$0xff] %v3132_v20  ;;  %v1132_v31 = vadd.f32 %v1100_v43, %v1065_v6  ;;  %v1263_v47 = vmul.f32 %v2937_v38, %v1166_v1  ;;  %v1264_v58 = vmul.f32 %v2937_v38, %v1242_v22  ;;  %v1370_v37 = vadd.f32 %v1338_v14, %v3004_v27 }
 0x117   : > { %v1480_v0 = vmul.f32 %v3001_v21, %v1242_v22  ;;  %v3143_v45 = vmul.f32 %v871_v7, %v3030_v3  ;;  %v869_v19 = vadd.f32 1.0, %v2665_v5  ;;  %v872_v28 = vadd.f32 1.0, %v2667_v17 }
 0x118   : > { %v1295_v41 = vadd.f32 %v1263_v47, %v1131_v40  ;;  %v1296_v44 = vadd.f32 %v1264_v58, %v1132_v31  ;;  %v1438_v36 = vadd.f32 %v1406_v16, %v1370_v37  ;;  %v3147_v43 = vadd.f32 %v1405_v61, %v1369_v51 }
 0x119   : > { %4787 = vst [vmem:[#allocation8_spill] sm:$0xff] %v3143_v45  ;;  %v3145_v6 = vpop.f32.mrb[20].mxu0  ;;  %v1408_v27 = vmul.f32 %v2955_v52, %v3094_v11  ;;  %v901_v14 = vmul.f32 %v869_v19, %v3032_v50  ;;  %v2671_v3 = vpop.eup %2670  ;;  %v3158_v37 = vmul.f32 %v3001_v21, %v1166_v1  ;;  %v3167_v51 = vmul.f32 %v2916_v30, %v3143_v45 }
 0x11a   : > { %v3153_v22 = vpop.f32.mrb[21].mxu0  ;;  %v3155_v7 = vadd.f32 %v1339_v55, %v1295_v41  ;;  %v1372_v47 = vadd.f32 %v1340_v57, %v1296_v44  ;;  %v3160_v58 = vadd.f32 %v1480_v0, %v1438_v36  ;;  %v3170_v5 = vmul.f32 %v872_v28, %v3034_v54 }
 0x11b   : > { %v3162_v61 = vpop.f32.mrb[22].mxu0  ;;  %4789 = vst [vmem:[#allocation10_spill] sm:$0xff] %v3167_v51  ;;  %v971_v50 = vrot.slane %v901_v14, 7  ;;  %v3178_v17 = vmul.f32 %v2955_v52, %v3143_v45  ;;  %v1103_v1 = vmul.f32 %v2916_v30, %v901_v14  ;;  %v1170_v31 = vrot.slane %v901_v14, 1 }
 0x11c   : > { %4788 = vst [vmem:[#allocation9_spill] sm:$0xff] %v3160_v58  ;;  %4790 = vst [vmem:[#allocation11_spill] sm:$0xff] %v3170_v5  ;;  %v3172_v55 = vpop.f32.mrb[23].mxu0  ;;  %v3174_v16 = vadd.f32 %v1408_v27, %v1372_v47  ;;  %v3185_v0 = vmul.f32 %v2955_v52, %v901_v14  ;;  %v870_v19 = vadd.f32 1.0, %v2669_v23  ;;  %v875_v28 = vadd.f32 1.0, %v2671_v3 }
 0x11d   : > { %4791 = vst [vmem:[#allocation12_spill] sm:$0xff] %v3178_v17  ;;  %v3182_v57 = vsel %vm962_vm1, 0.0, %v971_v50  ;;  %v3190_v41 = vmul.f32 %v2976_v63, %v901_v14  ;;  %2672 = vtanh.f32 %v3109_v32  ;;  %v780_v44 = vadd.f32 %v3084_v8, %v3043_v15 }
 0x11e   : > { %4792 = vst [vmem:[#allocation13_spill] sm:$0xff] %v3182_v57  ;;  %4793 = vst [vmem:[#allocation14_spill] sm:$0xff] %v3185_v0  ;;  %v1068_v54 = vmul.f32 %v2913_v29, %v3182_v57  ;;  %v3198_v27 = vmul.f32 %v2916_v30, %v3170_v5  ;;  %v902_v23 = vmul.f32 %v870_v19, %v3040_v13  ;;  %v682_v15 = vmul.f32 0.044715, %v3050_v25 }
 0x11f   : > { %4794 = vst [vmem:[#allocation15_spill] sm:$0xff] %v3190_v41  ;;  %v3202_v3 = vmul.f32 %v875_v28, %v3045_v18  ;;  %v3206_v14 = vmul.f32 %v2993_v12, %v3182_v57  ;;  %v3210_v32 = vmul.f32 %v2955_v52, %v3170_v5  ;;  %v3215_v8 = vadd.f32 %v3053_v26, %v2929_v34 }
 0x120   : > { %4795 = vst [vmem:[#allocation16_spill] sm:$0xff] %v3198_v27  ;;  %v3219_v13 = vadd.f32 %v1103_v1, %v1068_v54  ;;  %v972_v18 = vrot.slane %v902_v23, 7  ;;  %v1171_v19 = vrot.slane %v902_v23, 1  ;;  %v812_v28 = vmul.f32 0.7978846, %v780_v44 }
 0x121   : > { %4796 = vst [vmem:[#allocation17_spill] sm:$0xff] %v3202_v3  ;;  %4797 = vst [vmem:[#allocation18_spill] sm:$0xff] %v3206_v14  ;;  %v3217_v47 = vpop.f32.mrb[24].mxu0  ;;  %v1104_v36 = vmul.f32 %v2916_v30, %v902_v23  ;;  %v574_v26 = vadd.f32 %v3070_v59, %v2929_v34  ;;  %v3241_v0 = vmul.f32 %v2955_v52, %v902_v23 }
 0x122   : > { %4798 = vst [vmem:[#allocation19_spill] sm:$0xff] %v3210_v32  ;;  %4799 = vst [vmem:[#allocation20_spill] sm:$0xff] %v3219_v13  ;;  %v3221_v40 = vpop.f32.mrb[25].mxu0  ;;  %v563_v32 = vadd.f32 %v2929_v34, %v3062_v49  ;;  %v3232_v1 = vsel %vm962_vm1, %v971_v50, %v972_v18  ;;  %v3235_v54 = vsel %vm1161_vm2, %v1170_v31, %v1171_v19  ;;  %v3238_v44 = vsel %vm1161_vm2, %v1171_v19, 0.0 }
 0x123   : > { %v3229_v17 = vpop.f32.mrb[26].mxu0  ;;  %4800 = vst [vmem:[#allocation21_spill] sm:$0xff] %v3232_v1  ;;  %4801 = vst [vmem:[#allocation22_spill] sm:$0xff] %v3235_v54  ;;  %v1069_v49 = vmul.f32 %v2913_v29, %v3232_v1  ;;  %v3248_v59 = vmul.f32 %v2976_v63, %v902_v23  ;;  %v1109_v50 = vmul.f32 %v2916_v30, %v3202_v3  ;;  %v4805_v18 = vrot.slane %v3202_v3, 7  ;;  %v3266_v23 = vld [vmem:[%s4706_s3 + $0x8] ss:$0 sm:$0xff] }
 0x124   : > { %4802 = vst [vmem:[#allocation23_spill] sm:$0xff] %v3238_v44  ;;  %4803 = vst [vmem:[#allocation24_spill] sm:$0xff] %v3241_v0  ;;  %v3243_v33 = vpop.f32.mrb[27].mxu0  ;;  %v3260_v0 = vmul.f32 %v2955_v52, %v3202_v3  ;;  %2674 = vtanh.f32 %v812_v28  ;;  %v714_v57 = vmul.f32 %v682_v15, %v3050_v25  ;;  %v3270_v31 = vmul.f32 %v2937_v38, %v3235_v54 }
 0x125   : > { %4804 = vst [vmem:[#allocation25_spill] sm:$0xff] %v3248_v59  ;;  %v3256_v19 = vsel %vm962_vm1, 0.0, %v4805_v18  ;;  %4808 = vst [vmem:[#allocation28_spill] sm:$0xff] %v3266_v23  ;;  %v1136_v13 = vadd.f32 %v1104_v36, %v1069_v49  ;;  %v1268_v18 = vmul.f32 %v2937_v38, %v3238_v44  ;;  %v3276_v20 = vmul.f32 %v2993_v12, %v3232_v1 }
 0x126   : > { %4806 = vst [vmem:[#allocation26_spill] sm:$0xff] %v3256_v19  ;;  %4807 = vst [vmem:[#allocation27_spill] sm:$0xff] %v3260_v0  ;;  %v3280_v15 = vmul.f32 %v3266_v23, %v3238_v44  ;;  %v746_v28 = vmul.f32 %v714_v57, %v3050_v25  ;;  %v687_v0 = vmul.f32 0.044715, %v3215_v8  ;;  %v685_v36 = vmul.f32 0.044715, %v563_v32 }
 0x127   : > { %4809 = vst [vmem:[#allocation29_spill] sm:$0xff] %v3270_v31  ;;  %4810 = vst [vmem:[#allocation30_spill] sm:$0xff] %v3276_v20  ;;  %v2673_v49 = vpop.eup %2672  ;;  %v3284_v39 = vadd.f32 %v1268_v18, %v1136_v13  ;;  %v1074_v31 = vmul.f32 %v2913_v29, %v3256_v19  ;;  %v3290_v51 = vmul.f32 %v2971_v60, %v3256_v19  ;;  %v688_v1 = vmul.f32 0.044715, %v574_v26 }
 0x128   : > { %4811 = vst [vmem:[#allocation31_spill] sm:$0xff] %v3280_v15  ;;  %v873_v44 = vadd.f32 1.0, %v2673_v49  ;;  %v778_v15 = vadd.f32 %v746_v28, %v3050_v25  ;;  %v719_v57 = vmul.f32 %v687_v0, %v3215_v8  ;;  %v717_v54 = vmul.f32 %v685_v36, %v563_v32 }
 0x129   : > { %4812 = vst [vmem:[#allocation32_spill] sm:$0xff] %v3284_v39  ;;  %4813 = vst [vmem:[#allocation33_spill] sm:$0xff] %v3290_v51  ;;  %v3292_v27 = vpop.f32.mrb[28].mxu0  ;;  %v3299_v13 = vmul.f32 0.5, %v3215_v8  ;;  %v720_v18 = vmul.f32 %v688_v1, %v574_v26  ;;  %v566_v39 = vadd.f32 %v2929_v34, %v3076_v2  ;;  %v587_v51 = vadd.f32 %v3104_v24, %v2929_v34 }
 0x12a   : > { %v3296_v45 = vpop.f32.mrb[29].mxu0  ;;  %v3308_v49 = vmul.f32 %v873_v44, %v3059_v46  ;;  %v810_v25 = vmul.f32 0.7978846, %v778_v15  ;;  %v751_v0 = vmul.f32 %v719_v57, %v3215_v8  ;;  %v749_v28 = vmul.f32 %v717_v54, %v563_v32 }
 0x12b   : > { %v3305_v19 = vpop.f32.mrb[30].mxu0  ;;  %v3313_v5 = vadd.f32 %v1109_v50, %v1074_v31  ;;  %v3315_v1 = vmul.f32 0.5, %v563_v32  ;;  %v752_v59 = vmul.f32 %v720_v18, %v574_v26  ;;  %v686_v2 = vmul.f32 0.044715, %v566_v39 }
 0x12c   : > { %4814 = vst [vmem:[#allocation34_spill] sm:$0xff] %v3308_v49  ;;  %v3311_v36 = vpop.f32.mrb[31].mxu0  ;;  %v4727_v41 = vrot.slane %v3308_v49, 7  ;;  %v3318_v24 = vmul.f32 0.5, %v574_v26  ;;  %v3320_v23 = vmul.f32 0.5, %v566_v39  ;;  %v579_v46 = vadd.f32 %v2929_v34, %v3111_v35 }
 0x12d   : > { %4815 = vst [vmem:[#allocation35_spill] sm:$0xff] %v3313_v5  ;;  %2676 = vtanh.f32 %v810_v25  ;;  %v783_v54 = vadd.f32 %v751_v0, %v3215_v8  ;;  %v781_v44 = vadd.f32 %v749_v28, %v563_v32  ;;  %v784_v15 = vadd.f32 %v752_v59, %v574_v26 }
 0x12e   : > { %v2675_v50 = vpop.eup %2674  ;;  %v3328_v31 = vsel %vm962_vm1, 0.0, %v4727_v41  ;;  %v718_v57 = vmul.f32 %v686_v2, %v566_v39  ;;  %v3330_v18 = vmul.f32 0.5, %v587_v51  ;;  %v691_v5 = vmul.f32 0.044715, %v587_v51 }
 0x12f   : > { %v1107_v20 = vmul.f32 %v2916_v30, %v3308_v49  ;;  %v876_v14 = vadd.f32 1.0, %v2675_v50  ;;  %v815_v35 = vmul.f32 0.7978846, %v783_v54  ;;  %v813_v25 = vmul.f32 0.7978846, %v781_v44 }
 0x130   : > { %v816_v58 = vmul.f32 0.7978846, %v784_v15  ;;  %v750_v8 = vmul.f32 %v718_v57, %v566_v39  ;;  %v723_v32 = vmul.f32 %v691_v5, %v587_v51  ;;  %v689_v26 = vmul.f32 0.044715, %v579_v46 }
 0x131   : > { %v1072_v59 = vmul.f32 %v2913_v29, %v3328_v31  ;;  %v3337_v0 = vmul.f32 %v876_v14, %v3068_v56  ;;  %2678 = vtanh.f32 %v815_v35  ;;  %v590_v28 = vadd.f32 %v3120_v48, %v2929_v34 }
 0x132   : > { %2680 = vtanh.f32 %v813_v25  ;;  %v782_v2 = vadd.f32 %v750_v8, %v566_v39  ;;  %v755_v41 = vmul.f32 %v723_v32, %v587_v51  ;;  %v721_v50 = vmul.f32 %v689_v26, %v579_v46 }
 0x133   : > { %4816 = vst [vmem:[#allocation36_spill] sm:$0xff] %v3337_v0  ;;  %v3344_v5 = vmul.f32 %v2955_v52, %v3308_v49  ;;  %v981_v44 = vrot.slane %v3337_v0, 7  ;;  %v3347_v15 = vmul.f32 0.5, %v579_v46  ;;  %2682 = vtanh.f32 %v816_v58 }
 0x134   : > { %v814_v56 = vmul.f32 0.7978846, %v782_v2  ;;  %v787_v14 = vadd.f32 %v755_v41, %v587_v51  ;;  %v753_v57 = vmul.f32 %v721_v50, %v579_v46  ;;  %v3349_v35 = vadd.f32 %v1107_v20, %v1072_v59 }
 0x135   : > { %4817 = vst [vmem:[#allocation37_spill] sm:$0xff] %v3344_v5  ;;  %v4819_v39 = vrot.slane %v3202_v3, 7  ;;  %v692_v25 = vmul.f32 0.044715, %v590_v28  ;;  %v582_v8 = vadd.f32 %v2929_v34, %v3126_v4  ;;  %v1110_v58 = vmul.f32 %v2916_v30, %v3337_v0 }
 0x136   : > { %4818 = vst [vmem:[#allocation38_spill] sm:$0xff] %v3349_v35  ;;  %2684 = vtanh.f32 %v814_v56  ;;  %v819_v51 = vmul.f32 0.7978846, %v787_v14  ;;  %v785_v26 = vadd.f32 %v753_v57, %v579_v46  ;;  %v3367_v4 = vadd.f32 %v3145_v6, %v2929_v34 }
 0x137   : > { %v3354_v48 = vsel %vm962_vm1, %v4819_v39, %v981_v44  ;;  %v2677_v41 = vpop.eup %2676  ;;  %v724_v59 = vmul.f32 %v692_v25, %v590_v28  ;;  %v690_v2 = vmul.f32 0.044715, %v582_v8  ;;  %v3371_v39 = vmul.f32 %v2955_v52, %v3337_v0 }
 0x138   : > { %4820 = vst [vmem:[#allocation39_spill] sm:$0xff] %v3354_v48  ;;  %v1075_v32 = vmul.f32 %v2913_v29, %v3354_v48  ;;  %v874_v44 = vadd.f32 1.0, %v2677_v41  ;;  %2686 = vtanh.f32 %v819_v51  ;;  %v817_v56 = vmul.f32 0.7978846, %v785_v26 }
 0x139   : > { %4822 = vst [vmem:[#allocation41_spill] sm:$0xff] %v3371_v39  ;;  %v756_v14 = vmul.f32 %v724_v59, %v590_v28  ;;  %v722_v54 = vmul.f32 %v690_v2, %v582_v8  ;;  %v3376_v46 = vmul.f32 0.5, %v590_v28  ;;  %v695_v57 = vmul.f32 0.044715, %v3367_v4 }
 0x13a   : > { %v3363_v50 = vadd.f32 %v1110_v58, %v1075_v32  ;;  %v3374_v20 = vmul.f32 %v874_v44, %v3074_v62  ;;  %v3381_v25 = vadd.f32 %v2929_v34, %v3153_v22  ;;  %v3385_v32 = vmul.f32 %v2971_v60, %v3354_v48 }
 0x13b   : > { %v2679_v6 = vpop.eup %2678  ;;  %2688 = vtanh.f32 %v817_v56  ;;  %v788_v58 = vadd.f32 %v756_v14, %v590_v28  ;;  %v754_v51 = vmul.f32 %v722_v54, %v582_v8  ;;  %v3388_v26 = vmul.f32 0.5, %v582_v8 }
 0x13c   : > { %4821 = vst [vmem:[#allocation40_spill] sm:$0xff] %v3363_v50  ;;  %4823 = vst [vmem:[#allocation42_spill] sm:$0xff] %v3374_v20  ;;  %v2681_v41 = vpop.eup %2680  ;;  %v978_v62 = vrot.slane %v3374_v20, 7  ;;  %v3391_v59 = vmul.f32 0.5, %v3367_v4  ;;  %v3395_v22 = vadd.f32 %v3162_v61, %v2929_v34  ;;  %v879_v2 = vadd.f32 1.0, %v2679_v6 }
 0x13d   : > { %4824 = vst [vmem:[#allocation43_spill] sm:$0xff] %v3385_v32  ;;  %v877_v44 = vadd.f32 1.0, %v2681_v41  ;;  %v820_v39 = vmul.f32 0.7978846, %v788_v58  ;;  %v786_v48 = vadd.f32 %v754_v51, %v582_v8  ;;  %v2683_v32 = vpop.eup %2682  ;;  %v4825_v28 = vrot.slane %v3308_v49, 7 }
 0x13e   : > { %v1108_v56 = vmul.f32 %v2916_v30, %v3374_v20  ;;  %v727_v14 = vmul.f32 %v695_v57, %v3367_v4  ;;  %v693_v50 = vmul.f32 0.044715, %v3381_v25  ;;  %v3409_v6 = vmul.f32 %v879_v2, %v3299_v13 }
 0x13f   : > { %v3400_v54 = vsel %vm962_vm1, %v4825_v28, %v978_v62  ;;  %v3412_v8 = vmul.f32 %v877_v44, %v3315_v1  ;;  %v880_v58 = vadd.f32 1.0, %v2683_v32  ;;  %v3417_v62 = vmul.f32 %v2955_v52, %v3374_v20 }
 0x140   : > { %v1073_v61 = vmul.f32 %v2913_v29, %v3400_v54  ;;  %4826 = vst [vmem:[#allocation44_spill] sm:$0xff] %v3409_v6  ;;  %v2685_v51 = vpop.eup %2684  ;;  %2690 = vtanh.f32 %v820_v39  ;;  %v3420_v57 = vmul.f32 0.5, %v3381_v25  ;;  %v986_v13 = vrot.slane %v3409_v6, 7 }
 0x141   : > { %4827 = vst [vmem:[#allocation45_spill] sm:$0xff] %v3417_v62  ;;  %v818_v2 = vmul.f32 0.7978846, %v786_v48  ;;  %v3426_v1 = vmul.f32 0.5, %v3395_v22  ;;  %v1113_v44 = vmul.f32 %v2916_v30, %v3409_v6  ;;  %v983_v41 = vrot.slane %v3412_v8, 7 }
 0x142   : > { %v3422_v28 = vadd.f32 %v1108_v56, %v1073_v61  ;;  %v2687_v32 = vpop.eup %2686  ;;  %v759_v62 = vmul.f32 %v727_v14, %v3367_v4  ;;  %v725_v39 = vmul.f32 %v693_v50, %v3381_v25  ;;  %v3434_v5 = vsel %vm962_vm1, 0.0, %v986_v13 }
 0x143   : > { %4829 = vst [vmem:[#allocation47_spill] sm:$0xff] %v3434_v5  ;;  %v3438_v48 = vmul.f32 %v880_v58, %v3318_v24  ;;  %v878_v61 = vadd.f32 1.0, %v2685_v51  ;;  %v1078_v3 = vmul.f32 %v2913_v29, %v3434_v5  ;;  %v3444_v0 = vmul.f32 %v2955_v52, %v3409_v6 }
 0x144   : > { %4828 = vst [vmem:[#allocation46_spill] sm:$0xff] %v3422_v28  ;;  %v3447_v14 = vsel %vm962_vm1, 0.0, %v983_v41  ;;  %v883_v50 = vadd.f32 1.0, %v2687_v32  ;;  %v1111_v24 = vmul.f32 %v2916_v30, %v3412_v8  ;;  %v3457_v56 = vmul.f32 %v2971_v60, %v3434_v5 }
 0x145   : > { %4830 = vst [vmem:[#allocation48_spill] sm:$0xff] %v3438_v48  ;;  %4831 = vst [vmem:[#allocation49_spill] sm:$0xff] %v3444_v0  ;;  %v2689_v28 = vpop.eup %2688  ;;  %v1076_v35 = vmul.f32 %v2913_v29, %v3447_v14  ;;  %v987_v51 = vrot.slane %v3438_v48, 7  ;;  %v3461_v0 = vmul.f32 %v2971_v60, %v3447_v14  ;;  %v3465_v32 = vmul.f32 %v2955_v52, %v3412_v8 }
 0x146   : > { %4832 = vst [vmem:[#allocation50_spill] sm:$0xff] %v3457_v56  ;;  %v3468_v6 = vmul.f32 %v878_v61, %v3320_v23  ;;  %v1114_v58 = vmul.f32 %v2916_v30, %v3438_v48  ;;  %v3476_v5 = vmul.f32 %v883_v50, %v3330_v18  ;;  %v881_v56 = vadd.f32 1.0, %v2689_v28 }
 0x147   : > { %4833 = vst [vmem:[#allocation51_spill] sm:$0xff] %v3461_v0  ;;  %4834 = vst [vmem:[#allocation52_spill] sm:$0xff] %v3465_v32  ;;  %v3471_v49 = vsel %vm962_vm1, %v986_v13, %v987_v51  ;;  %v3478_v20 = vadd.f32 %v1113_v44, %v1078_v3  ;;  %v3484_v61 = vadd.f32 %v1111_v24, %v1076_v35  ;;  %2692 = vtanh.f32 %v818_v2 }
 0x148   : > { %4835 = vst [vmem:[#allocation53_spill] sm:$0xff] %v3471_v49  ;;  %4836 = vst [vmem:[#allocation54_spill] sm:$0xff] %v3476_v5  ;;  %v1079_v0 = vmul.f32 %v2913_v29, %v3471_v49  ;;  %v984_v23 = vrot.slane %v3468_v6, 7  ;;  %v3488_v13 = vmul.f32 %v2971_v60, %v3471_v49  ;;  %v3492_v18 = vmul.f32 %v2955_v52, %v3438_v48 }
 0x149   : > { %4837 = vst [vmem:[#allocation55_spill] sm:$0xff] %v3478_v20  ;;  %v992_v3 = vrot.slane %v3476_v5, 7  ;;  %v1112_v35 = vmul.f32 %v2916_v30, %v3468_v6  ;;  %v3507_v32 = vmul.f32 %v2955_v52, %v3468_v6  ;;  %v3524_v49 = vmul.f32 %v2955_v52, %v3476_v5 }
 0x14a   : > { %4838 = vst [vmem:[#allocation56_spill] sm:$0xff] %v3488_v13  ;;  %4839 = vst [vmem:[#allocation57_spill] sm:$0xff] %v3492_v18  ;;  %v2691_v28 = vpop.eup %2690  ;;  %v3495_v44 = vadd.f32 %v1114_v58, %v1079_v0  ;;  %v3498_v50 = vsel %vm962_vm1, %v983_v41, %v984_v23  ;;  %v3513_v0 = vmul.f32 %v881_v56, %v3347_v15 }
 0x14b   : > { %v1077_v51 = vmul.f32 %v2913_v29, %v3498_v50  ;;  %4841 = vst [vmem:[#allocation59_spill] sm:$0xff] %v3507_v32  ;;  %v3510_v18 = vsel %vm962_vm1, 0.0, %v992_v3  ;;  %v1117_v58 = vmul.f32 %v2916_v30, %v3476_v5  ;;  %v884_v23 = vadd.f32 1.0, %v2691_v28  ;;  %4844 = vst [vmem:[#allocation62_spill] sm:$0xff] %v3524_v49 }
 0x14c   : > { %4840 = vst [vmem:[#allocation58_spill] sm:$0xff] %v3495_v44  ;;  %4842 = vst [vmem:[#allocation60_spill] sm:$0xff] %v3510_v18  ;;  %v1082_v41 = vmul.f32 %v2913_v29, %v3510_v18  ;;  %v4743_v32 = vrot.slane %v3513_v0, 7  ;;  %v3529_v15 = vmul.f32 %v2971_v60, %v3498_v50  ;;  %v3533_v56 = vmul.f32 %v2971_v60, %v3510_v18 }
 0x14d   : > { %4843 = vst [vmem:[#allocation61_spill] sm:$0xff] %v3513_v0  ;;  %v3519_v24 = vadd.f32 %v1112_v35, %v1077_v51  ;;  %v3536_v2 = vmul.f32 %v884_v23, %v3376_v46  ;;  %v791_v28 = vadd.f32 %v759_v62, %v3367_v4  ;;  %v1115_v51 = vmul.f32 %v2916_v30, %v3513_v0 }
 0x14e   : > { %4845 = vst [vmem:[#allocation63_spill] sm:$0xff] %v3529_v15  ;;  %4846 = vst [vmem:[#allocation64_spill] sm:$0xff] %v3533_v56  ;;  %v3542_v35 = vsel %vm962_vm1, 0.0, %v4743_v32  ;;  %v757_v13 = vmul.f32 %v725_v39, %v3381_v25  ;;  %v696_v49 = vmul.f32 0.044715, %v3395_v22  ;;  %v3548_v5 = vadd.f32 %v1117_v58, %v1082_v41 }
 0x14f   : > { %4847 = vst [vmem:[#allocation65_spill] sm:$0xff] %v3536_v2  ;;  %4848 = vst [vmem:[#allocation66_spill] sm:$0xff] %v3542_v35  ;;  %v993_v46 = vrot.slane %v3536_v2, 7  ;;  %v598_v4 = vadd.f32 %v2929_v34, %v3172_v55  ;;  %v1080_v62 = vmul.f32 %v2913_v29, %v3542_v35  ;;  %v3558_v23 = vmul.f32 %v2955_v52, %v3513_v0 }
 0x150   : > { %4849 = vst [vmem:[#allocation67_spill] sm:$0xff] %v3548_v5  ;;  %v823_v32 = vmul.f32 0.7978846, %v791_v28  ;;  %v789_v39 = vadd.f32 %v757_v13, %v3381_v25  ;;  %v3563_v41 = vmul.f32 %v2971_v60, %v3542_v35  ;;  %v1118_v55 = vmul.f32 %v2916_v30, %v3536_v2 }
 0x151   : > { %4850 = vst [vmem:[#allocation68_spill] sm:$0xff] %v3558_v23  ;;  %v3566_v58 = vsel %vm962_vm1, %v992_v3, %v993_v46  ;;  %v728_v56 = vmul.f32 %v696_v49, %v3395_v22  ;;  %v694_v13 = vmul.f32 0.044715, %v598_v4  ;;  %v619_v5 = vadd.f32 %v3217_v47, %v2929_v34 }
 0x152   : > { %4851 = vst [vmem:[#allocation69_spill] sm:$0xff] %v3563_v41  ;;  %4852 = vst [vmem:[#allocation70_spill] sm:$0xff] %v3566_v58  ;;  %v1083_v18 = vmul.f32 %v2913_v29, %v3566_v58  ;;  %2694 = vtanh.f32 %v823_v32  ;;  %v821_v28 = vmul.f32 0.7978846, %v789_v39  ;;  %v611_v3 = vadd.f32 %v2929_v34, %v3221_v40  ;;  %v2693_v32 = vpop.eup %2692 }
 0x153   : > { %v760_v25 = vmul.f32 %v728_v56, %v3395_v22  ;;  %v622_v49 = vadd.f32 %v3229_v17, %v2929_v34  ;;  %v614_v23 = vadd.f32 %v2929_v34, %v3243_v33  ;;  %v3587_v56 = vmul.f32 %v2955_v52, %v3536_v2 }
 0x154   : > { %v3579_v46 = vadd.f32 %v1118_v55, %v1083_v18  ;;  %2696 = vtanh.f32 %v821_v28  ;;  %v726_v47 = vmul.f32 %v694_v13, %v598_v4  ;;  %v699_v41 = vmul.f32 0.044715, %v619_v5 }
 0x155   : > { %4854 = vst [vmem:[#allocation72_spill] sm:$0xff] %v3587_v56  ;;  %v792_v39 = vadd.f32 %v760_v25, %v3395_v22  ;;  %v3590_v35 = vadd.f32 %v1115_v51, %v1080_v62  ;;  %v882_v40 = vadd.f32 1.0, %v2693_v32  ;;  %v3592_v18 = vmul.f32 0.5, %v598_v4 }
 0x156   : > { %4853 = vst [vmem:[#allocation71_spill] sm:$0xff] %v3579_v46  ;;  %v697_v55 = vmul.f32 0.044715, %v611_v3  ;;  %v758_v17 = vmul.f32 %v726_v47, %v598_v4  ;;  %v731_v46 = vmul.f32 %v699_v41, %v619_v5  ;;  %v700_v15 = vmul.f32 0.044715, %v622_v49 }
 0x157   : > { %4855 = vst [vmem:[#allocation73_spill] sm:$0xff] %v3590_v35  ;;  %v824_v28 = vmul.f32 0.7978846, %v792_v39  ;;  %v3596_v33 = vmul.f32 %v2971_v60, %v3566_v58  ;;  %v3599_v34 = vmul.f32 %v882_v40, %v3388_v26  ;;  %v698_v25 = vmul.f32 0.044715, %v614_v23 }
 0x158   : > { %v729_v22 = vmul.f32 %v697_v55, %v611_v3  ;;  %v790_v51 = vadd.f32 %v758_v17, %v598_v4  ;;  %v763_v62 = vmul.f32 %v731_v46, %v619_v5  ;;  %v732_v13 = vmul.f32 %v700_v15, %v622_v49 }
 0x159   : > { %4856 = vst [vmem:[#allocation74_spill] sm:$0xff] %v3596_v33  ;;  %2698 = vtanh.f32 %v824_v28  ;;  %v990_v32 = vrot.slane %v3599_v34, 7  ;;  %v3602_v56 = vmul.f32 0.5, %v619_v5  ;;  %v3604_v39 = vmul.f32 0.5, %v611_v3 }
 0x15a   : > { %v3606_v41 = vmul.f32 0.5, %v622_v49  ;;  %v822_v47 = vmul.f32 0.7978846, %v790_v51  ;;  %v795_v58 = vadd.f32 %v763_v62, %v619_v5  ;;  %v761_v33 = vmul.f32 %v729_v22, %v611_v3  ;;  %v2782_v5 = vld [vmem:[%s4705_s2] ss:$0 sm:$0xff] }
 0x15b   : > { %v764_v2 = vmul.f32 %v732_v13, %v622_v49  ;;  %v4857_v40 = vrot.slane %v3513_v0, 7  ;;  %v1116_v15 = vmul.f32 %v2916_v30, %v3599_v34  ;;  %v3615_v4 = vmul.f32 0.5, %v614_v23 }
 0x15c   : > { %v2695_v26 = vpop.eup %2694  ;;  %v730_v46 = vmul.f32 %v698_v25, %v614_v23  ;;  %2700 = vtanh.f32 %v822_v47  ;;  %v635_v22 = vadd.f32 %v2782_v5, %v3292_v27  ;;  %v827_v62 = vmul.f32 0.7978846, %v795_v58 }
 0x15d   : > { %v3611_v55 = vsel %vm962_vm1, %v4857_v40, %v990_v32  ;;  %v887_v17 = vadd.f32 1.0, %v2695_v26  ;;  %v793_v13 = vadd.f32 %v761_v33, %v611_v3  ;;  %v796_v32 = vadd.f32 %v764_v2, %v622_v49 }
 0x15e   : > { %v1081_v28 = vmul.f32 %v2913_v29, %v3611_v55  ;;  %v2697_v51 = vpop.eup %2696  ;;  %v762_v40 = vmul.f32 %v730_v46, %v614_v23  ;;  %v627_v26 = vadd.f32 %v2782_v5, %v3296_v45  ;;  %2702 = vtanh.f32 %v827_v62 }
 0x15f   : > { %v3626_v25 = vmul.f32 %v887_v17, %v3391_v59  ;;  %v885_v0 = vadd.f32 1.0, %v2697_v51  ;;  %v825_v47 = vmul.f32 0.7978846, %v793_v13  ;;  %v828_v44 = vmul.f32 0.7978846, %v796_v32 }
 0x160   : > { %v3623_v35 = vadd.f32 %v1116_v15, %v1081_v28  ;;  %v794_v20 = vadd.f32 %v762_v40, %v614_v23  ;;  %v3632_v27 = vmul.f32 %v2971_v60, %v3611_v55  ;;  %v3636_v2 = vmul.f32 %v2955_v52, %v3599_v34 }
 0x161   : > { %4858 = vst [vmem:[#allocation75_spill] sm:$0xff] %v3626_v25  ;;  %v998_v59 = vrot.slane %v3626_v25, 7  ;;  %v3640_v58 = vmul.f32 %v885_v0, %v3420_v57  ;;  %2704 = vtanh.f32 %v825_v47  ;;  %v703_v3 = vmul.f32 0.044715, %v635_v22 }
 0x162   : > { %v826_v45 = vmul.f32 0.7978846, %v794_v20  ;;  %2706 = vtanh.f32 %v828_v44  ;;  %v3645_v33 = vmul.f32 0.5, %v635_v22  ;;  %v701_v15 = vmul.f32 0.044715, %v627_v26 }
 0x163   : > { %4859 = vst [vmem:[#allocation76_spill] sm:$0xff] %v3640_v58  ;;  %v2699_v49 = vpop.eup %2698  ;;  %v3643_v23 = vsel %vm962_vm1, 0.0, %v998_v59  ;;  %v1121_v46 = vmul.f32 %v2916_v30, %v3626_v25  ;;  %v3652_v57 = vmul.f32 %v2955_v52, %v3626_v25  ;;  %v995_v20 = vrot.slane %v3640_v58, 7 }
 0x164   : > { %4860 = vst [vmem:[#allocation77_spill] sm:$0xff] %v3643_v23  ;;  %v1086_v0 = vmul.f32 %v2913_v29, %v3643_v23  ;;  %v888_v17 = vadd.f32 1.0, %v2699_v49  ;;  %2708 = vtanh.f32 %v826_v45  ;;  %v3657_v44 = vmul.f32 0.5, %v627_v26 }
 0x165   : > { %4861 = vst [vmem:[#allocation78_spill] sm:$0xff] %v3652_v57  ;;  %v3661_v51 = vmul.f32 %v2971_v60, %v3643_v23  ;;  %v3664_v62 = vsel %vm962_vm1, 0.0, %v995_v20  ;;  %v735_v13 = vmul.f32 %v703_v3, %v635_v22  ;;  %v733_v32 = vmul.f32 %v701_v15, %v627_v26 }
 0x166   : > { %v2701_v40 = vpop.eup %2700  ;;  %v1084_v47 = vmul.f32 %v2913_v29, %v3664_v62  ;;  %v1119_v28 = vmul.f32 %v2916_v30, %v3640_v58  ;;  %v3672_v49 = vmul.f32 %v888_v17, %v3426_v1  ;;  %v3676_v48 = vmul.f32 %v2955_v52, %v3640_v58 }
 0x167   : > { %4862 = vst [vmem:[#allocation79_spill] sm:$0xff] %v3661_v51  ;;  %v886_v57 = vadd.f32 1.0, %v2701_v40  ;;  %v767_v51 = vmul.f32 %v735_v13, %v635_v22  ;;  %v765_v3 = vmul.f32 %v733_v32, %v627_v26  ;;  %v3678_v15 = vadd.f32 %v1121_v46, %v1086_v0 }
 0x168   : > { %4863 = vst [vmem:[#allocation80_spill] sm:$0xff] %v3672_v49  ;;  %4864 = vst [vmem:[#allocation81_spill] sm:$0xff] %v3676_v48  ;;  %v3682_v23 = vmul.f32 %v2971_v60, %v3664_v62  ;;  %v999_v25 = vrot.slane %v3672_v49, 7  ;;  %v3686_v45 = vadd.f32 %v2782_v5, %v3305_v19  ;;  %v2703_v1 = vpop.eup %2702  ;;  %v3688_v17 = vadd.f32 %v1119_v28, %v1084_v47 }
 0x169   : > { %4865 = vst [vmem:[#allocation82_spill] sm:$0xff] %v3678_v15  ;;  %v3691_v58 = vmul.f32 %v886_v57, %v3592_v18  ;;  %v799_v40 = vadd.f32 %v767_v51, %v635_v22  ;;  %v3694_v13 = vadd.f32 %v2782_v5, %v3311_v36  ;;  %v1122_v0 = vmul.f32 %v2916_v30, %v3672_v49 }
 0x16a   : > { %4866 = vst [vmem:[#allocation83_spill] sm:$0xff] %v3682_v23  ;;  %v3697_v46 = vsel %vm962_vm1, %v998_v59, %v999_v25  ;;  %v891_v19 = vadd.f32 1.0, %v2703_v1  ;;  %v3706_v18 = vmul.f32 %v2955_v52, %v3672_v49  ;;  %v797_v5 = vadd.f32 %v765_v3, %v627_v26 }
 0x16b   : > { %4867 = vst [vmem:[#allocation84_spill] sm:$0xff] %v3697_v46  ;;  %v2705_v15 = vpop.eup %2704  ;;  %v1087_v28 = vmul.f32 %v2913_v29, %v3697_v46  ;;  %v996_v36 = vrot.slane %v3691_v58, 7  ;;  %v3713_v57 = vmul.f32 0.5, %v3686_v45  ;;  %v704_v51 = vmul.f32 0.044715, %v3686_v45 }
 0x16c   : > { %4868 = vst [vmem:[#allocation85_spill] sm:$0xff] %v3706_v18  ;;  %v2707_v22 = vpop.eup %2706  ;;  %v3710_v25 = vmul.f32 %v891_v19, %v3602_v56  ;;  %v889_v59 = vadd.f32 1.0, %v2705_v15  ;;  %v831_v18 = vmul.f32 0.7978846, %v799_v40  ;;  %v3723_v26 = vmul.f32 %v2971_v60, %v3697_v46 }
 0x16d   : > { %v3716_v47 = vadd.f32 %v1122_v0, %v1087_v28  ;;  %v3719_v1 = vsel %vm962_vm1, %v995_v20, %v996_v36  ;;  %v892_v32 = vadd.f32 1.0, %v2707_v22  ;;  %v1120_v3 = vmul.f32 %v2916_v30, %v3691_v58 }
 0x16e   : > { %4869 = vst [vmem:[#allocation86_spill] sm:$0xff] %v3710_v25  ;;  %4871 = vst [vmem:[#allocation88_spill] sm:$0xff] %v3719_v1  ;;  %v2709_v48 = vpop.eup %2708  ;;  %v1085_v56 = vmul.f32 %v2913_v29, %v3719_v1  ;;  %v1004_v15 = vrot.slane %v3710_v25, 7  ;;  %v3733_v20 = vmul.f32 %v2955_v52, %v3691_v58  ;;  %v3736_v40 = vmul.f32 %v889_v59, %v3604_v39 }
 0x16f   : > { %4870 = vst [vmem:[#allocation87_spill] sm:$0xff] %v3716_v47  ;;  %4872 = vst [vmem:[#allocation89_spill] sm:$0xff] %v3723_v26  ;;  %v3739_v19 = vmul.f32 %v892_v32, %v3606_v41  ;;  %v890_v22 = vadd.f32 1.0, %v2709_v48  ;;  %2710 = vtanh.f32 %v831_v18  ;;  %v3748_v0 = vmul.f32 %v2971_v60, %v3719_v1  ;;  %v4941_v1 = vld [vmem:[#allocation23_spill] sm:$0xff] }
 0x170   : > { %4873 = vst [vmem:[#allocation90_spill] sm:$0xff] %v3733_v20  ;;  %4874 = vst [vmem:[#allocation91_spill] sm:$0xff] %v3736_v40  ;;  %v3741_v28 = vadd.f32 %v1120_v3, %v1085_v56  ;;  %v3744_v36 = vsel %vm962_vm1, 0.0, %v1004_v15  ;;  %v1125_v39 = vmul.f32 %v2916_v30, %v3710_v25  ;;  %v1001_v41 = vrot.slane %v3736_v40, 7 }
 0x171   : > { %4875 = vst [vmem:[#allocation92_spill] sm:$0xff] %v3739_v19  ;;  %4876 = vst [vmem:[#allocation93_spill] sm:$0xff] %v3744_v36  ;;  %v1090_v26 = vmul.f32 %v2913_v29, %v3744_v36  ;;  %v3758_v59 = vmul.f32 %v2971_v60, %v3744_v36  ;;  %v3762_v48 = vmul.f32 %v2955_v52, %v3710_v25  ;;  %v1005_v18 = vrot.slane %v3739_v19, 7 }
 0x172   : > { %4877 = vst [vmem:[#allocation94_spill] sm:$0xff] %v3748_v0  ;;  %v3766_v56 = vsel %vm962_vm1, 0.0, %v1001_v41  ;;  %v1123_v3 = vmul.f32 %v2916_v30, %v3736_v40  ;;  %v3773_v32 = vmul.f32 %v2955_v52, %v3736_v40  ;;  %v3783_v25 = vmul.f32 %v890_v22, %v3615_v4 }
 0x173   : > { %4878 = vst [vmem:[#allocation95_spill] sm:$0xff] %v3758_v59  ;;  %4879 = vst [vmem:[#allocation96_spill] sm:$0xff] %v3762_v48  ;;  %v1088_v59 = vmul.f32 %v2913_v29, %v3766_v56  ;;  %v3778_v36 = vsel %vm962_vm1, %v1004_v15, %v1005_v18  ;;  %v1126_v48 = vmul.f32 %v2916_v30, %v3739_v19  ;;  %v829_v47 = vmul.f32 0.7978846, %v797_v5 }
 0x174   : > { %4880 = vst [vmem:[#allocation97_spill] sm:$0xff] %v3766_v56  ;;  %4881 = vst [vmem:[#allocation98_spill] sm:$0xff] %v3773_v32  ;;  %v3785_v20 = vadd.f32 %v1125_v39, %v1090_v26  ;;  %v1091_v46 = vmul.f32 %v2913_v29, %v3778_v36  ;;  %v736_v32 = vmul.f32 %v704_v51, %v3686_v45  ;;  %v1002_v4 = vrot.slane %v3783_v25, 7 }
 0x175   : > { %4882 = vst [vmem:[#allocation99_spill] sm:$0xff] %v3778_v36  ;;  %4883 = vst [vmem:[#allocation100_spill] sm:$0xff] %v3783_v25  ;;  %v3792_v40 = vmul.f32 %v2971_v60, %v3766_v56  ;;  %v3797_v18 = vmul.f32 %v2955_v52, %v3739_v19  ;;  %v3804_v22 = vmul.f32 %v2971_v60, %v3778_v36  ;;  %2712 = vtanh.f32 %v829_v47 }
 0x176   : > { %4884 = vst [vmem:[#allocation101_spill] sm:$0xff] %v3785_v20  ;;  %v3800_v26 = vadd.f32 %v1126_v48, %v1091_v46  ;;  %v768_v5 = vmul.f32 %v736_v32, %v3686_v45  ;;  %v3807_v51 = vadd.f32 %v1123_v3, %v1088_v59  ;;  %v3810_v39 = vsel %vm962_vm1, %v1001_v41, %v1002_v4 }
 0x177   : > { %4885 = vst [vmem:[#allocation102_spill] sm:$0xff] %v3792_v40  ;;  %4886 = vst [vmem:[#allocation103_spill] sm:$0xff] %v3797_v18  ;;  %v702_v15 = vmul.f32 0.044715, %v3694_v13  ;;  %v4891_v18 = vrot.slane %v3094_v11, 1  ;;  %v4892_v20 = vrot.slane %v3065_v53, 1  ;;  %v1089_v48 = vmul.f32 %v2913_v29, %v3810_v39 }
 0x178   : > { %4887 = vst [vmem:[#allocation104_spill] sm:$0xff] %v3800_v26  ;;  %4888 = vst [vmem:[#allocation105_spill] sm:$0xff] %v3804_v22  ;;  %v1124_v47 = vmul.f32 %v2916_v30, %v3783_v25  ;;  %v800_v32 = vadd.f32 %v768_v5, %v3686_v45  ;;  %v3829_v22 = vmul.f32 %v2955_v52, %v3783_v25 }
 0x179   : > { %4889 = vst [vmem:[#allocation106_spill] sm:$0xff] %v3807_v51  ;;  %4890 = vst [vmem:[#allocation107_spill] sm:$0xff] %v3810_v39  ;;  %v1169_v46 = vsel %vm1161_vm2, %v4892_v20, %v4891_v18  ;;  %v4893_v59 = vmov %v4891_v18  ;;  %v2711_v3 = vpop.eup %2710  ;;  %v734_v20 = vmul.f32 %v702_v15, %v3694_v13  ;;  %v1439_v18 = vadd.f32 %v3091_v10, %v3155_v7 }
 0x17a   : > { %v1243_v41 = vsel %vm1161_vm2, %v4893_v59, 0.0  ;;  %4894 = vst [vmem:[#allocation108_spill] sm:$0xff] %v3829_v22  ;;  %v3834_v36 = vadd.f32 %v1124_v47, %v1089_v48  ;;  %v895_v26 = vadd.f32 1.0, %v2711_v3  ;;  %v832_v45 = vmul.f32 0.7978846, %v800_v32 }
 0x17b   : > { %v1481_v5 = vmul.f32 %v3001_v21, %v1169_v46  ;;  %v766_v59 = vmul.f32 %v734_v20, %v3694_v13  ;;  %v1482_v40 = vmul.f32 %v3001_v21, %v1243_v41  ;;  %v1511_v4 = vadd.f32 %v3158_v37, %v3147_v43 }
 0x17c   : > { %4895 = vst [vmem:[#allocation109_spill] sm:$0xff] %v3834_v36  ;;  %v1547_v22 = vmul.f32 %v2993_v12, %v3087_v9  ;;  %v3844_v15 = vmul.f32 %v895_v26, %v3645_v33  ;;  %2714 = vtanh.f32 %v832_v45  ;;  %v3847_v10 = vmul.f32 0.5, %v3694_v13  ;;  %v4920_v36 = vld [vmem:[#allocation16_spill] sm:$0xff] }
 0x17d   : > { %v1513_v7 = vadd.f32 %v1481_v5, %v1439_v18  ;;  %v798_v48 = vadd.f32 %v766_v59, %v3694_v13  ;;  %v1514_v47 = vadd.f32 %v1482_v40, %v3174_v16  ;;  %v1548_v32 = vmul.f32 %v2993_v12, %v3116_v42  ;;  %v4898_v13 = vld [vmem:[#allocation9_spill] sm:$0xff]  ;;  %v4899_v16 = vld [vmem:[#allocation18_spill] sm:$0xff]  ;;  %v4901_v59 = vld [vmem:[#allocation28_spill] sm:$0xff] }
 0x17e   : > { %4896 = vst [vmem:[#allocation110_spill] sm:$0xff] %v3844_v15  ;;  %v1579_v3 = vadd.f32 %v1547_v22, %v1511_v4  ;;  %v3855_v43 = vmul.f32 %v2971_v60, %v3810_v39  ;;  %v3859_v37 = vmul.f32 %v2937_v38, %v1169_v46  ;;  %v1615_v33 = vmul.f32 %v2976_v63, %v3065_v53  ;;  %v4900_v18 = vld [vmem:[#allocation30_spill] sm:$0xff] }
 0x17f   : > { %v830_v26 = vmul.f32 0.7978846, %v798_v48  ;;  %v1580_v20 = vadd.f32 %v1548_v32, %v4898_v13  ;;  %v1581_v40 = vadd.f32 %v4899_v16, %v1513_v7  ;;  %v1582_v42 = vadd.f32 %v4900_v18, %v1514_v47  ;;  %v2713_v22 = vpop.eup %2712  ;;  %v3882_v47 = vld [vmem:[%s4707_s4] ss:$0 sm:$0xff]  ;;  %v4906_v16 = vld [vmem:[#allocation25_spill] sm:$0xff]  ;;  %v4916_v13 = vld [vmem:[#allocation31_spill] sm:$0xff] }
 0x180   : > { %4897 = vst [vmem:[#allocation111_spill] sm:$0xff] %v3855_v43  ;;  %v3867_v4 = vmul.f32 %v2937_v38, %v1243_v41  ;;  %v1616_v45 = vmul.f32 %v2976_v63, %v3094_v11  ;;  %v1646_v5 = vadd.f32 %v1615_v33, %v1579_v3  ;;  %v1682_v9 = vmul.f32 %v4901_v59, %v1169_v46  ;;  %v4904_v46 = vld [vmem:[#allocation15_spill] sm:$0xff] }
 0x181   : > { %v4902_v43 = vrot.slane %v3844_v15, 7  ;;  %v3877_v48 = vmul.f32 %v2955_v52, %v3844_v15  ;;  %v893_v7 = vadd.f32 1.0, %v2713_v22  ;;  %2716 = vtanh.f32 %v830_v26  ;;  %v4907_v22 = vld [vmem:[#allocation11_spill] sm:$0xff] }
 0x182   : > { %v1647_v32 = vadd.f32 %v1616_v45, %v1580_v20  ;;  %v1683_v11 = vmul.f32 %v4901_v59, %v1243_v41  ;;  %v1714_v3 = vadd.f32 %v1682_v9, %v1646_v5  ;;  %v1648_v33 = vadd.f32 %v4904_v46, %v1581_v40  ;;  %v4912_v40 = vld [vmem:[#allocation22_spill] sm:$0xff] }
 0x183   : > { %v1332_v53 = vsel %vm962_vm1, 0.0, %v4902_v43  ;;  %4903 = vst [vmem:[#allocation9_spill] sm:$0xff] %v3877_v48  ;;  %v3888_v43 = vmul.f32 %v893_v7, %v3657_v44  ;;  %v1649_v18 = vadd.f32 %v4906_v16, %v1582_v42  ;;  %v4908_v26 = vrot.slane %v4907_v22, 7  ;;  %v4909_v48 = vld [vmem:[#allocation8_spill] sm:$0xff] }
 0x184   : > { %v4910_v19 = vrot.slane %v4909_v48, 7  ;;  %v3900_v41 = vmul.f32 %v2976_v63, %v3844_v15  ;;  %v1715_v9 = vadd.f32 %v1683_v11, %v1647_v32  ;;  %v1753_v20 = vadd.f32 %v3882_v47, %v1714_v3 }
 0x185   : > { %4905 = vst [vmem:[#allocation18_spill] sm:$0xff] %v3888_v43  ;;  %v1684_v44 = vmul.f32 %v4901_v59, %v4912_v40  ;;  %v3906_v45 = vmul.f32 %v2971_v60, %v1332_v53  ;;  %v3909_v42 = vmul.f32 %v2993_v12, %v1332_v53  ;;  %v1007_v5 = vrot.slane %v3888_v43, 7 }
 0x186   : > { %v3896_v39 = vsel %vm962_vm1, %v4910_v19, %v4908_v26  ;;  %4911 = vst [vmem:[#allocation30_spill] sm:$0xff] %v3900_v41  ;;  %v3915_v7 = vsel %vm962_vm1, 0.0, %v4910_v19  ;;  %v2715_v46 = vpop.eup %2714  ;;  %v1754_v32 = vadd.f32 %v3882_v47, %v1715_v9  ;;  %v1817_v11 = vmul.f32 0.044715, %v1753_v20 }
 0x187   : > { %4913 = vst [vmem:[#allocation28_spill] sm:$0xff] %v3906_v45  ;;  %4914 = vst [vmem:[#allocation15_spill] sm:$0xff] %v3909_v42  ;;  %v1716_v3 = vadd.f32 %v1684_v44, %v1648_v33  ;;  %v1071_v59 = vmul.f32 %v2913_v29, %v3896_v39  ;;  %v3921_v16 = vsel %vm962_vm1, 0.0, %v1007_v5  ;;  %v1127_v53 = vmul.f32 %v2916_v30, %v3888_v43 }
 0x188   : > { %4915 = vst [vmem:[#allocation25_spill] sm:$0xff] %v3921_v16  ;;  %v896_v26 = vadd.f32 1.0, %v2715_v46  ;;  %v1717_v45 = vadd.f32 %v4916_v13, %v1649_v18  ;;  %v1092_v19 = vmul.f32 %v2913_v29, %v3921_v16  ;;  %v3931_v33 = vmul.f32 %v2955_v52, %v3888_v43 }
 0x189   : > { %v1818_v9 = vmul.f32 0.044715, %v1754_v32  ;;  %v1849_v42 = vmul.f32 %v1817_v11, %v1753_v20  ;;  %v1755_v56 = vadd.f32 %v3882_v47, %v1716_v3  ;;  %v1070_v46 = vmul.f32 %v2913_v29, %v3915_v7 }
 0x18a   : > { %4917 = vst [vmem:[#allocation11_spill] sm:$0xff] %v3931_v33  ;;  %v3934_v44 = vmul.f32 %v896_v26, %v3713_v57  ;;  %v3941_v13 = vmul.f32 %v2971_v60, %v3921_v16  ;;  %v3943_v18 = vmul.f32 0.5, %v1753_v20  ;;  %v1138_v43 = vadd.f32 %v4920_v36, %v1071_v59  ;;  %v4925_v57 = vld [vmem:[#allocation10_spill] sm:$0xff] }
 0x18b   : > { %v1850_v41 = vmul.f32 %v1818_v9, %v1754_v32  ;;  %v2717_v33 = vpop.eup %2716  ;;  %v3948_v11 = vmul.f32 0.5, %v1754_v32  ;;  %v1756_v3 = vadd.f32 %v3882_v47, %v1717_v45  ;;  %v3951_v26 = vadd.f32 %v1127_v53, %v1092_v19 }
 0x18c   : > { %4918 = vst [vmem:[#allocation8_spill] sm:$0xff] %v3934_v44  ;;  %4919 = vst [vmem:[#allocation22_spill] sm:$0xff] %v3941_v13  ;;  %v1328_v51 = vrot.slane %v3934_v44, 7  ;;  %v894_v25 = vadd.f32 1.0, %v2717_v33  ;;  %v1881_v0 = vmul.f32 %v1849_v42, %v1753_v20  ;;  %v4922_v13 = vrot.slane %v3844_v15, 7 }
 0x18d   : > { %4921 = vst [vmem:[#allocation31_spill] sm:$0xff] %v3951_v26  ;;  %v1882_v16 = vmul.f32 %v1850_v41, %v1754_v32  ;;  %v3960_v36 = vmul.f32 %v2955_v52, %v3934_v44  ;;  %v1819_v59 = vmul.f32 0.044715, %v1755_v56  ;;  %v1137_v23 = vadd.f32 %v4925_v57, %v1070_v46 }
 0x18e   : > { %v3956_v9 = vsel %vm962_vm1, %v4922_v13, %v1328_v51  ;;  %v3965_v45 = vmul.f32 %v2976_v63, %v3934_v44  ;;  %v3968_v53 = vmul.f32 %v894_v25, %v3847_v10  ;;  %v1913_v41 = vadd.f32 %v1881_v0, %v1753_v20 }
 0x18f   : > { %4923 = vst [vmem:[#allocation16_spill] sm:$0xff] %v3956_v9  ;;  %4924 = vst [vmem:[#allocation112_spill] sm:$0xff] %v3960_v36  ;;  %v3970_v42 = vmul.f32 0.5, %v1755_v56  ;;  %v4927_v51 = vrot.slane %v3934_v44, 1  ;;  %v1914_v33 = vadd.f32 %v1882_v16, %v1754_v32  ;;  %v1820_v13 = vmul.f32 0.044715, %v1756_v3 }
 0x190   : > { %4926 = vst [vmem:[#allocation10_spill] sm:$0xff] %v3965_v45  ;;  %v1851_v36 = vmul.f32 %v1819_v59, %v1755_v56  ;;  %v3979_v46 = vmul.f32 %v2971_v60, %v3956_v9  ;;  %v1008_v57 = vrot.slane %v3968_v53, 7  ;;  %v3982_v45 = vmul.f32 0.5, %v1756_v3  ;;  %v4930_v16 = vld [vmem:[#allocation6_spill] sm:$0xff]  ;;  %v4934_v44 = vld [vmem:[#allocation29_spill] sm:$0xff] }
 0x191   : > { %v3975_v19 = vsel %vm1161_vm2, %v4927_v51, 0.0  ;;  %v1173_v25 = vrot.slane %v4909_v48, 1  ;;  %v1945_v0 = vmul.f32 0.7978846, %v1913_v41  ;;  %v1946_v10 = vmul.f32 0.7978846, %v1914_v33 }
 0x192   : > { %4928 = vst [vmem:[#allocation113_spill] sm:$0xff] %v3975_v19  ;;  %4929 = vst [vmem:[#allocation114_spill] sm:$0xff] %v3979_v46  ;;  %v1852_v20 = vmul.f32 %v1820_v13, %v1756_v3  ;;  %v1883_v15 = vmul.f32 %v1851_v36, %v1755_v56  ;;  %v3986_v51 = vsel %vm962_vm1, %v1007_v5, %v1008_v57  ;;  %v1174_v32 = vrot.slane %v4907_v22, 1  ;;  %v4931_v19 = vld [vmem:[#allocation7_spill] sm:$0xff] }
 0x193   : > { %v1297_v59 = vadd.f32 %v3859_v37, %v4930_v16  ;;  %v1298_v46 = vadd.f32 %v3867_v4, %v4931_v19  ;;  %v1093_v9 = vmul.f32 %v2913_v29, %v3986_v51  ;;  %v1128_v41 = vmul.f32 %v2916_v30, %v3968_v53  ;;  %v4933_v29 = vld [vmem:[#allocation20_spill] sm:$0xff]  ;;  %v4935_v30 = vld [vmem:[#allocation13_spill] sm:$0xff] }
 0x194   : > { %2718 = vtanh.f32 %v1945_v0  ;;  %v1884_v33 = vmul.f32 %v1852_v20, %v1756_v3  ;;  %v1915_v36 = vadd.f32 %v1883_v15, %v1755_v56  ;;  %v1175_v5 = vsel %vm1161_vm2, %v1173_v25, %v1174_v32 }
 0x195   : > { %2720 = vtanh.f32 %v1946_v10  ;;  %v1245_v13 = vsel %vm1161_vm2, %v1174_v32, 0.0  ;;  %v3999_v57 = vadd.f32 %v1128_v41, %v1093_v9  ;;  %v1269_v16 = vmul.f32 %v2937_v38, %v1175_v5  ;;  %v4936_v10 = vld [vmem:[#allocation21_spill] sm:$0xff] }
 0x196   : > { %v1916_v37 = vadd.f32 %v1884_v33, %v1756_v3  ;;  %v1270_v4 = vmul.f32 %v2937_v38, %v1245_v13  ;;  %v1947_v19 = vmul.f32 0.7978846, %v1915_v36  ;;  %v1299_v26 = vadd.f32 %v4934_v44, %v4933_v29 }
 0x197   : > { %4932 = vst [vmem:[#allocation6_spill] sm:$0xff] %v3999_v57  ;;  %v1341_v0 = vmul.f32 %v2971_v60, %v4935_v30  ;;  %v1342_v56 = vmul.f32 %v2971_v60, %v4936_v10  ;;  %v1301_v25 = vadd.f32 %v1269_v16, %v1137_v23  ;;  %v1343_v3 = vmul.f32 %v2971_v60, %v3915_v7  ;;  %v4939_v30 = vld [vmem:[#allocation24_spill] sm:$0xff] }
 0x198   : > { %v1948_v15 = vmul.f32 0.7978846, %v1916_v37  ;;  %v1302_v20 = vadd.f32 %v1270_v4, %v1138_v43  ;;  %2722 = vtanh.f32 %v1947_v19  ;;  %v1344_v9 = vmul.f32 %v2971_v60, %v3896_v39  ;;  %v4937_v37 = vld [vmem:[#allocation32_spill] sm:$0xff]  ;;  %v4938_v19 = vld [vmem:[#allocation14_spill] sm:$0xff] }
 0x199   : > { %v1345_v32 = vmul.f32 %v2971_v60, %v3328_v31  ;;  %v1346_v44 = vmul.f32 %v2971_v60, %v3400_v54  ;;  %v1373_v41 = vadd.f32 %v1341_v0, %v1297_v59  ;;  %v1374_v33 = vadd.f32 %v1342_v56, %v1298_v46  ;;  %v4940_v57 = vld [vmem:[#allocation12_spill] sm:$0xff]  ;;  %v4942_v46 = vld [vmem:[#allocation19_spill] sm:$0xff] }
 0x19a   : > { %2724 = vtanh.f32 %v1948_v15  ;;  %v1375_v36 = vadd.f32 %v1343_v3, %v1299_v26  ;;  %v1376_v23 = vadd.f32 %v1344_v9, %v4937_v37  ;;  %v1483_v4 = vmul.f32 %v3001_v21, %v4912_v40 }
 0x19b   : > { %v4018_v43 = vadd.f32 %v1345_v32, %v1301_v25  ;;  %v4020_v16 = vadd.f32 %v1346_v44, %v1302_v20  ;;  %v1441_v29 = vadd.f32 %v4938_v19, %v1373_v41  ;;  %v1442_v10 = vadd.f32 %v4939_v30, %v1374_v33  ;;  %v4945_v19 = vld [vmem:[#allocation34_spill] sm:$0xff] }
 0x19c   : > { %v1443_v49 = vadd.f32 %v4940_v57, %v1375_v36  ;;  %v1484_v59 = vmul.f32 %v3001_v21, %v4941_v1  ;;  %v1444_v26 = vadd.f32 %v4942_v46, %v1376_v23  ;;  %v1485_v0 = vmul.f32 %v3001_v21, %v1175_v5 }
 0x19d   : > { %v1486_v56 = vmul.f32 %v3001_v21, %v1245_v13  ;;  %v1551_v15 = vmul.f32 %v2993_v12, %v3915_v7  ;;  %v1515_v40 = vadd.f32 %v1483_v4, %v1441_v29  ;;  %v1552_v3 = vmul.f32 %v2993_v12, %v3896_v39  ;;  %v4043_v7 = vld [vmem:[%s4706_s3 + $0x8] ss:$0 sm:$0xff]  ;;  %v4943_v4 = vld [vmem:[#allocation42_spill] sm:$0xff] }
 0x19e   : > { %v2719_v25 = vpop.eup %2718  ;;  %v1516_v20 = vadd.f32 %v1484_v59, %v1442_v10  ;;  %v1619_v57 = vmul.f32 %v2976_v63, %v4909_v48  ;;  %v1517_v32 = vadd.f32 %v1485_v0, %v1443_v49  ;;  %v1620_v41 = vmul.f32 %v2976_v63, %v4907_v22 }
 0x19f   : > { %v2721_v9 = vpop.eup %2720  ;;  %v2009_v1 = vadd.f32 1.0, %v2719_v25  ;;  %v1518_v44 = vadd.f32 %v1486_v56, %v1444_v26  ;;  %v1583_v36 = vadd.f32 %v1551_v15, %v1515_v40  ;;  %v1686_v39 = vmul.f32 %v4043_v7, %v1175_v5 }
 0x1a0   : > { %v2010_v33 = vadd.f32 1.0, %v2721_v9  ;;  %v1584_v37 = vadd.f32 %v1552_v3, %v1516_v20  ;;  %v1687_v48 = vmul.f32 %v4043_v7, %v1245_v13  ;;  %v4944_v49 = vrot.slane %v4943_v4, 1  ;;  %v4948_v9 = vld [vmem:[#allocation38_spill] sm:$0xff] }
 0x1a1   : > { %v2041_v23 = vmul.f32 %v2009_v1, %v3943_v18  ;;  %v4946_v29 = vrot.slane %v4945_v19, 1  ;;  %v1650_v46 = vadd.f32 %v1619_v57, %v1583_v36  ;;  %v1207_v18 = vrot.slane %v3968_v53, 1 }
 0x1a2   : > { %v4947_v30 = vmov %v4944_v49  ;;  %v2042_v59 = vmul.f32 %v2010_v33, %v3948_v11  ;;  %v1651_v26 = vadd.f32 %v1620_v41, %v1584_v37  ;;  %v2723_v0 = vpop.eup %2722  ;;  %v4061_v13 = vmul.f32 %v2955_v52, %v3968_v53  ;;  %v4949_v41 = vld [vmem:[#allocation46_spill] sm:$0xff] }
 0x1a3   : > { %v1178_v22 = vsel %vm1161_vm2, %v4946_v29, %v4944_v49  ;;  %v1246_v10 = vsel %vm1161_vm2, %v4947_v30, 0.0  ;;  %v1553_v15 = vmul.f32 %v2993_v12, %v3328_v31  ;;  %v2011_v20 = vadd.f32 1.0, %v2723_v0 }
 0x1a4   : > { %v1271_v5 = vmul.f32 %v2937_v38, %v1178_v22  ;;  %v1272_v56 = vmul.f32 %v2937_v38, %v1246_v10  ;;  %v2725_v25 = vpop.eup %2724  ;;  %v2073_v40 = vpack.c.bf16 %v2042_v59, %v2041_v23  ;;  %v1718_v11 = vadd.f32 %v1686_v39, %v1650_v46 }
 0x1a5   : > { %v1719_v3 = vadd.f32 %v1687_v48, %v1651_v26  ;;  %v2012_v57 = vadd.f32 1.0, %v2725_v25  ;;  %v1554_v52 = vmul.f32 %v2993_v12, %v3400_v54  ;;  %v2043_v36 = vmul.f32 %v2011_v20, %v3970_v42 }
 0x1a6   : > { %v4067_v1 = vadd.f32 %v1271_v5, %v4948_v9  ;;  %v4070_v33 = vadd.f32 %v1272_v56, %v4949_v41  ;;  %2569 = vmatprep.mubr.bf16.mxu0 %v2073_v40  ;;  %v1757_v31 = vadd.f32 %v3882_v47, %v1718_v11  ;;  %v1585_v39 = vadd.f32 %v1553_v15, %v1517_v32  ;;  %v4952_v56 = vld [vmem:[#allocation17_spill] sm:$0xff] }
 0x1a7   : > { %v4077_v37 = vadd.f32 %v3882_v47, %v1719_v3  ;;  %v2044_v23 = vmul.f32 %v2012_v57, %v3982_v45  ;;  %v1586_v48 = vadd.f32 %v1554_v52, %v1518_v44  ;;  %v1621_v49 = vmul.f32 %v2976_v63, %v4945_v19 }
 0x1a8   : > { %v1622_v29 = vmul.f32 %v2976_v63, %v4943_v4  ;;  %v4086_v54 = vmul.f32 %v2971_v60, %v3986_v51  ;;  %v1821_v42 = vmul.f32 0.044715, %v1757_v31  ;;  %v1487_v59 = vmul.f32 %v3001_v21, %v1178_v22  ;;  %v4950_v4 = vld [vmem:[#allocation36_spill] sm:$0xff] }
 0x1a9   : > { %v1822_v30 = vmul.f32 0.044715, %v4077_v37  ;;  %v2074_v46 = vpack.c.bf16 %v2044_v23, %v2043_v36  ;;  %v1652_v32 = vadd.f32 %v1621_v49, %v1585_v39  ;;  %v1688_v45 = vmul.f32 %v4043_v7, %v1178_v22  ;;  %v4955_v22 = vld [vmem:[#allocation37_spill] sm:$0xff]  ;;  %v4956_v23 = vld [vmem:[#allocation35_spill] sm:$0xff] }
 0x1aa   : > { %v1653_v26 = vadd.f32 %v1622_v29, %v1586_v48  ;;  %v1853_v44 = vmul.f32 %v1821_v42, %v1757_v31  ;;  %v1689_v5 = vmul.f32 %v4043_v7, %v1246_v10  ;;  %v4951_v0 = vrot.slane %v4950_v4, 1  ;;  %v4957_v49 = vld [vmem:[#allocation45_spill] sm:$0xff] }
 0x1ab   : > { %v1854_v19 = vmul.f32 %v1822_v30, %v4077_v37  ;;  %v4953_v60 = vrot.slane %v4952_v56, 1  ;;  %2570 = vmatmul.mubr.bf16.vlgmr.msra.gmra.mrb[32].mxu0 %v2074_v46  ;;  %v1720_v25 = vadd.f32 %v1688_v45, %v1652_v32  ;;  %v1445_v3 = vadd.f32 %v4955_v22, %v4018_v43  ;;  %v4958_v46 = vld [vmem:[#allocation40_spill] sm:$0xff]  ;;  %v4960_v22 = vld [vmem:[#allocation39_spill] sm:$0xff] }
 0x1ac   : > { %v4954_v40 = vmov %v4951_v0  ;;  %v1885_v57 = vmul.f32 %v1853_v44, %v1757_v31  ;;  %v1721_v41 = vadd.f32 %v1689_v5, %v1653_v26  ;;  %v1488_v36 = vmul.f32 %v3001_v21, %v1246_v10 }
 0x1ad   : > { %v1181_v15 = vsel %vm1161_vm2, %v4953_v60, %v4951_v0  ;;  %v1247_v20 = vsel %vm1161_vm2, %v4954_v40, 0.0  ;;  %v1886_v9 = vmul.f32 %v1854_v19, %v4077_v37  ;;  %v1759_v39 = vadd.f32 %v3882_v47, %v1720_v25  ;;  %v4959_v40 = vld [vmem:[#allocation26_spill] sm:$0xff] }
 0x1ae   : > { %v1273_v11 = vmul.f32 %v2937_v38, %v1181_v15  ;;  %v1274_v52 = vmul.f32 %v2937_v38, %v1247_v20  ;;  %v1446_v29 = vadd.f32 %v4957_v49, %v4020_v16  ;;  %v1917_v42 = vadd.f32 %v1885_v57, %v1757_v31 }
 0x1af   : > { %v1918_v30 = vadd.f32 %v1886_v9, %v4077_v37  ;;  %v1760_v43 = vadd.f32 %v3882_v47, %v1721_v41  ;;  %v4118_v26 = vmul.f32 0.5, %v1757_v31  ;;  %v1823_v45 = vmul.f32 0.044715, %v1759_v39 }
 0x1b0   : > { %v4109_v48 = vadd.f32 %v1273_v11, %v4956_v23  ;;  %v4116_v32 = vadd.f32 %v1274_v52, %v4958_v46  ;;  %v1489_v10 = vmul.f32 %v3001_v21, %v1181_v15  ;;  %v1519_v44 = vadd.f32 %v1487_v59, %v1445_v3 }
 0x1b1   : > { %v1949_v19 = vmul.f32 0.7978846, %v1917_v42  ;;  %v1950_v5 = vmul.f32 0.7978846, %v1918_v30  ;;  %v1490_v0 = vmul.f32 %v3001_v21, %v1247_v20  ;;  %v1520_v60 = vadd.f32 %v1488_v36, %v1446_v29 }
 0x1b2   : > { %v1824_v16 = vmul.f32 0.044715, %v1760_v43  ;;  %v1855_v25 = vmul.f32 %v1823_v45, %v1759_v39  ;;  %v1555_v11 = vmul.f32 %v2993_v12, %v4959_v40  ;;  %v1556_v57 = vmul.f32 %v2993_v12, %v4960_v22 }
 0x1b3   : > { %2726 = vtanh.f32 %v1949_v19  ;;  %v1623_v31 = vmul.f32 %v2976_v63, %v4952_v56  ;;  %v1624_v59 = vmul.f32 %v2976_v63, %v4950_v4  ;;  %v1690_v3 = vmul.f32 %v4043_v7, %v1181_v15  ;;  %v4964_v19 = vld [vmem:[#allocation33_spill] sm:$0xff] }
 0x1b4   : > { %2728 = vtanh.f32 %v1950_v5  ;;  %v1856_v9 = vmul.f32 %v1824_v16, %v1760_v43  ;;  %v1887_v41 = vmul.f32 %v1855_v25, %v1759_v39  ;;  %v1587_v52 = vadd.f32 %v1555_v11, %v1519_v44 }
 0x1b5   : > { %v1588_v36 = vadd.f32 %v1556_v57, %v1520_v60  ;;  %v1691_v23 = vmul.f32 %v4043_v7, %v1247_v20  ;;  %v4961_v49 = vrot.slane %v3468_v6, 1  ;;  %v4962_v29 = vrot.slane %v3412_v8, 1  ;;  %v4965_v60 = vld [vmem:[#allocation43_spill] sm:$0xff] }
 0x1b6   : > { %v1888_v4 = vmul.f32 %v1856_v9, %v1760_v43  ;;  %v1919_v15 = vadd.f32 %v1887_v41, %v1759_v39  ;;  %v1654_v46 = vadd.f32 %v1623_v31, %v1587_v52  ;;  %v1379_v5 = vadd.f32 %v4964_v19, %v4067_v1  ;;  %v4967_v41 = vld [vmem:[#allocation41_spill] sm:$0xff] }
 0x1b7   : > { %v1184_v42 = vsel %vm1161_vm2, %v4962_v29, %v4961_v49  ;;  %v4963_v56 = vmov %v4961_v49  ;;  %v1655_v44 = vadd.f32 %v1624_v59, %v1588_v36  ;;  %v1380_v16 = vadd.f32 %v4965_v60, %v4070_v33  ;;  %v4966_v59 = vld [vmem:[#allocation27_spill] sm:$0xff] }
 0x1b8   : > { %v4140_v30 = vsel %vm1161_vm2, %v4963_v56, 0.0  ;;  %v1275_v45 = vmul.f32 %v2937_v38, %v1184_v42  ;;  %v1920_v25 = vadd.f32 %v1888_v4, %v1760_v43  ;;  %v1951_v40 = vmul.f32 0.7978846, %v1919_v15 }
 0x1b9   : > { %v1276_v20 = vmul.f32 %v2937_v38, %v4140_v30  ;;  %v1722_v11 = vadd.f32 %v1690_v3, %v1654_v46  ;;  %v1723_v57 = vadd.f32 %v1691_v23, %v1655_v44  ;;  %v1447_v9 = vadd.f32 %v4966_v59, %v1379_v5 }
 0x1ba   : > { %v4150_v22 = vadd.f32 %v1275_v45, %v3484_v61  ;;  %v1448_v52 = vadd.f32 %v4967_v41, %v1380_v16  ;;  %v1790_v36 = vmul.f32 0.5, %v4077_v37  ;;  %v1952_v1 = vmul.f32 0.7978846, %v1920_v25 }
 0x1bb   : > { %v4153_v31 = vadd.f32 %v1276_v20, %v3519_v24  ;;  %2730 = vtanh.f32 %v1951_v40  ;;  %v1761_v33 = vadd.f32 %v3882_v47, %v1722_v11  ;;  %v1791_v49 = vmul.f32 0.5, %v1759_v39 }
 0x1bc   : > { %v1762_v3 = vadd.f32 %v3882_v47, %v1723_v57  ;;  %v1521_v29 = vadd.f32 %v1489_v10, %v1447_v9  ;;  %v1522_v61 = vadd.f32 %v1490_v0, %v1448_v52  ;;  %v1792_v56 = vmul.f32 0.5, %v1760_v43  ;;  %v4968_v57 = vld [vmem:[#allocation48_spill] sm:$0xff] }
 0x1bd   : > { %2732 = vtanh.f32 %v1952_v1  ;;  %v1825_v23 = vmul.f32 0.044715, %v1761_v33  ;;  %v1557_v24 = vmul.f32 %v2993_v12, %v3447_v14  ;;  %v2727_v4 = vpop.eup %2726  ;;  %v1491_v46 = vmul.f32 %v3001_v21, %v1184_v42  ;;  %v4970_v9 = vld [vmem:[#allocation44_spill] sm:$0xff] }
 0x1be   : > { %v1826_v15 = vmul.f32 0.044715, %v1762_v3  ;;  %v1558_v37 = vmul.f32 %v2993_v12, %v3498_v50  ;;  %v1625_v39 = vmul.f32 %v2976_v63, %v3412_v8  ;;  %v2729_v45 = vpop.eup %2728  ;;  %v2013_v44 = vadd.f32 1.0, %v2727_v4 }
 0x1bf   : > { %v1857_v10 = vmul.f32 %v1825_v23, %v1761_v33  ;;  %v1589_v0 = vadd.f32 %v1557_v24, %v1521_v29  ;;  %v1626_v43 = vmul.f32 %v2976_v63, %v3468_v6  ;;  %v2014_v20 = vadd.f32 1.0, %v2729_v45 }
 0x1c0   : > { %v1858_v19 = vmul.f32 %v1826_v15, %v1762_v3  ;;  %v1590_v14 = vadd.f32 %v1558_v37, %v1522_v61  ;;  %v1692_v5 = vmul.f32 %v4043_v7, %v1184_v42  ;;  %v2045_v60 = vmul.f32 %v2013_v44, %v4118_v26  ;;  %v4974_v44 = vld [vmem:[#allocation51_spill] sm:$0xff] }
 0x1c1   : > { %v1889_v16 = vmul.f32 %v1857_v10, %v1761_v33  ;;  %v1656_v25 = vadd.f32 %v1625_v39, %v1589_v0  ;;  %v1693_v50 = vmul.f32 %v4043_v7, %v4140_v30  ;;  %v2046_v8 = vmul.f32 %v2014_v20, %v1790_v36  ;;  %v4973_v39 = vld [vmem:[#allocation55_spill] sm:$0xff] }
 0x1c2   : > { %v1890_v40 = vmul.f32 %v1858_v19, %v1762_v3  ;;  %v1657_v11 = vadd.f32 %v1626_v43, %v1590_v14  ;;  %v4969_v59 = vrot.slane %v4968_v57, 1  ;;  %v4971_v41 = vrot.slane %v4970_v9, 1  ;;  %v4975_v19 = vld [vmem:[#allocation58_spill] sm:$0xff] }
 0x1c3   : > { %v1921_v52 = vadd.f32 %v1889_v16, %v1761_v33  ;;  %v1724_v1 = vadd.f32 %v1692_v5, %v1656_v25  ;;  %v2075_v61 = vpack.c.bf16 %v2046_v8, %v2045_v60  ;;  %v1381_v10 = vadd.f32 %v4974_v44, %v4109_v48  ;;  %v4976_v25 = vld [vmem:[#allocation63_spill] sm:$0xff] }
 0x1c4   : > { %v1187_v6 = vsel %vm1161_vm2, %v4971_v41, %v4969_v59  ;;  %v4972_v42 = vmov %v4969_v59  ;;  %v1922_v23 = vadd.f32 %v1890_v40, %v1762_v3  ;;  %v1725_v36 = vadd.f32 %v1693_v50, %v1657_v11  ;;  %v4977_v41 = vld [vmem:[#allocation52_spill] sm:$0xff] }
 0x1c5   : > { %v4181_v26 = vsel %vm1161_vm2, %v4972_v42, 0.0  ;;  %v1277_v29 = vmul.f32 %v2937_v38, %v1187_v6  ;;  %v2731_v4 = vpop.eup %2730  ;;  %v1953_v15 = vmul.f32 0.7978846, %v1921_v52  ;;  %v4187_v37 = vadd.f32 %v3882_v47, %v1724_v1  ;;  %2573 = vmatprep.mubr.bf16.mxu1 %v2075_v61  ;;  %v4978_v1 = vld [vmem:[#allocation59_spill] sm:$0xff] }
 0x1c6   : > { %v1278_v24 = vmul.f32 %v2937_v38, %v4181_v26  ;;  %v2015_v0 = vadd.f32 1.0, %v2731_v4  ;;  %v1954_v43 = vmul.f32 0.7978846, %v1922_v23  ;;  %v1764_v20 = vadd.f32 %v3882_v47, %v1725_v36  ;;  %v4979_v23 = vld [vmem:[#allocation47_spill] sm:$0xff] }
 0x1c7   : > { %v4190_v45 = vadd.f32 %v1277_v29, %v4973_v39  ;;  %v2733_v5 = vpop.eup %2732  ;;  %2734 = vtanh.f32 %v1953_v15  ;;  %v1492_v60 = vmul.f32 %v3001_v21, %v4140_v30  ;;  %v1827_v16 = vmul.f32 0.044715, %v4187_v37  ;;  %v4980_v15 = vld [vmem:[#allocation53_spill] sm:$0xff] }
 0x1c8   : > { %v4196_v14 = vadd.f32 %v1278_v24, %v4975_v19  ;;  %v1382_v50 = vadd.f32 %v4976_v25, %v4116_v32  ;;  %v2016_v8 = vadd.f32 1.0, %v2733_v5  ;;  %v1793_v48 = vmul.f32 0.5, %v1761_v33 }
 0x1c9   : > { %v1794_v40 = vmul.f32 0.5, %v1762_v3  ;;  %2736 = vtanh.f32 %v1954_v43  ;;  %v1828_v11 = vmul.f32 0.044715, %v1764_v20  ;;  %v1859_v59 = vmul.f32 %v1827_v16, %v4187_v37 }
 0x1ca   : > { %v1449_v52 = vadd.f32 %v4977_v41, %v1381_v10  ;;  %v1450_v42 = vadd.f32 %v4978_v1, %v1382_v50  ;;  %v2047_v29 = vmul.f32 %v2015_v0, %v1791_v49  ;;  %v2048_v61 = vmul.f32 %v2016_v8, %v1792_v56 }
 0x1cb   : > { %v1493_v30 = vmul.f32 %v3001_v21, %v1187_v6  ;;  %v1559_v36 = vmul.f32 %v2993_v12, %v4979_v23  ;;  %v1860_v24 = vmul.f32 %v1828_v11, %v1764_v20  ;;  %v1891_v32 = vmul.f32 %v1859_v59, %v4187_v37 }
 0x1cc   : > { %v1523_v33 = vadd.f32 %v1491_v46, %v1449_v52  ;;  %v1524_v3 = vadd.f32 %v1492_v60, %v1450_v42  ;;  %v2076_v4 = vpack.c.bf16 %v2048_v61, %v2047_v29  ;;  %v1560_v39 = vmul.f32 %v2993_v12, %v4980_v15  ;;  %v4982_v60 = vld [vmem:[#allocation61_spill] sm:$0xff]  ;;  %v4985_v52 = vld [vmem:[#allocation50_spill] sm:$0xff]  ;;  %v4986_v42 = vld [vmem:[#allocation56_spill] sm:$0xff] }
 0x1cd   : > { %v1627_v44 = vmul.f32 %v2976_v63, %v4970_v9  ;;  %v1628_v49 = vmul.f32 %v2976_v63, %v4968_v57  ;;  %v1892_v56 = vmul.f32 %v1860_v24, %v1764_v20  ;;  %v1923_v10 = vadd.f32 %v1891_v32, %v4187_v37  ;;  %v4987_v24 = vld [vmem:[#allocation73_spill] sm:$0xff] }
 0x1ce   : > { %v1591_v0 = vadd.f32 %v1559_v36, %v1523_v33  ;;  %v1694_v43 = vmul.f32 %v4043_v7, %v1187_v6  ;;  %2574 = vmatmul.mubr.bf16.vlgmr.msra.gmra.mrb[0].mxu1 %v2076_v4  ;;  %v1592_v19 = vadd.f32 %v1560_v39, %v1524_v3  ;;  %v1695_v46 = vmul.f32 %v4043_v7, %v4181_v26  ;;  %v4988_v39 = vld [vmem:[#allocation49_spill] sm:$0xff] }
 0x1cf   : > { %v4981_v5 = vrot.slane %v3599_v34, 1  ;;  %v4983_v16 = vrot.slane %v4982_v60, 1  ;;  %v1924_v50 = vadd.f32 %v1892_v56, %v1764_v20  ;;  %v1955_v8 = vmul.f32 0.7978846, %v1923_v10 }
 0x1d0   : > { %v1658_v11 = vadd.f32 %v1627_v44, %v1591_v0  ;;  %v1659_v59 = vadd.f32 %v1628_v49, %v1592_v19  ;;  %v1383_v1 = vadd.f32 %v4985_v52, %v4150_v22  ;;  %v1384_v29 = vadd.f32 %v4986_v42, %v4153_v31  ;;  %v4989_v31 = vld [vmem:[#allocation57_spill] sm:$0xff] }
 0x1d1   : > { %v1190_v9 = vsel %vm1161_vm2, %v4983_v16, %v4981_v5  ;;  %v4984_v25 = vmov %v4981_v5  ;;  %v2735_v61 = vpop.eup %2734  ;;  %v1956_v23 = vmul.f32 0.7978846, %v1924_v50  ;;  %2738 = vtanh.f32 %v1955_v8 }
 0x1d2   : > { %v4228_v57 = vsel %vm1161_vm2, %v4984_v25, 0.0  ;;  %v1279_v6 = vmul.f32 %v2937_v38, %v1190_v9  ;;  %v1726_v36 = vadd.f32 %v1694_v43, %v1658_v11  ;;  %v2017_v3 = vadd.f32 1.0, %v2735_v61  ;;  %v4990_v11 = vld [vmem:[#allocation66_spill] sm:$0xff] }
 0x1d3   : > { %v1280_v41 = vmul.f32 %v2937_v38, %v4228_v57  ;;  %v2737_v33 = vpop.eup %2736  ;;  %v1727_v4 = vadd.f32 %v1695_v46, %v1659_v59  ;;  %v1451_v44 = vadd.f32 %v4988_v39, %v1383_v1  ;;  %2740 = vtanh.f32 %v1956_v23  ;;  %v4993_v23 = vld [vmem:[#allocation54_spill] sm:$0xff] }
 0x1d4   : > { %v4238_v32 = vadd.f32 %v1279_v6, %v4987_v24  ;;  %v2018_v49 = vadd.f32 1.0, %v2737_v33  ;;  %v1765_v22 = vadd.f32 %v3882_v47, %v1726_v36  ;;  %v1452_v56 = vadd.f32 %v4989_v31, %v1384_v29  ;;  %v4991_v29 = vld [vmem:[#allocation65_spill] sm:$0xff] }
 0x1d5   : > { %v4241_v15 = vadd.f32 %v1280_v41, %v3623_v35  ;;  %v1795_v10 = vmul.f32 0.5, %v4187_v37  ;;  %v1796_v0 = vmul.f32 0.5, %v1764_v20  ;;  %v1494_v43 = vmul.f32 %v3001_v21, %v4181_v26 }
 0x1d6   : > { %v1766_v19 = vadd.f32 %v3882_v47, %v1727_v4  ;;  %v2049_v46 = vmul.f32 %v2017_v3, %v1793_v48  ;;  %v2050_v5 = vmul.f32 %v2018_v49, %v1794_v40  ;;  %v1829_v35 = vmul.f32 0.044715, %v1765_v22  ;;  %v4996_v49 = vld [vmem:[#allocation69_spill] sm:$0xff] }
 0x1d7   : > { %v1525_v16 = vadd.f32 %v1493_v30, %v1451_v44  ;;  %v1495_v50 = vmul.f32 %v3001_v21, %v1190_v9  ;;  %v1526_v8 = vadd.f32 %v1494_v43, %v1452_v56  ;;  %v1561_v6 = vmul.f32 %v2993_v12, %v4990_v11  ;;  %v4998_v11 = vld [vmem:[#allocation71_spill] sm:$0xff] }
 0x1d8   : > { %v1830_v25 = vmul.f32 0.044715, %v1766_v19  ;;  %v2077_v59 = vpack.c.bf16 %v2050_v5, %v2049_v46  ;;  %v1861_v41 = vmul.f32 %v1829_v35, %v1765_v22  ;;  %v1562_v37 = vmul.f32 %v2993_v12, %v3611_v55  ;;  %v4997_v5 = vld [vmem:[#allocation67_spill] sm:$0xff] }
 0x1d9   : > { %v1629_v26 = vmul.f32 %v2976_v63, %v4982_v60  ;;  %v1593_v48 = vadd.f32 %v1561_v6, %v1525_v16  ;;  %v1630_v40 = vmul.f32 %v2976_v63, %v3599_v34  ;;  %v1696_v30 = vmul.f32 %v4043_v7, %v1190_v9 }
 0x1da   : > { %v1862_v20 = vmul.f32 %v1830_v25, %v1766_v19  ;;  %2577 = vmatprep.mubr.bf16.mxu1 %v2077_v59  ;;  %v1893_v52 = vmul.f32 %v1861_v41, %v1765_v22  ;;  %v1594_v1 = vadd.f32 %v1562_v37, %v1526_v8  ;;  %v1697_v42 = vmul.f32 %v4043_v7, %v4228_v57 }
 0x1db   : > { %v4992_v61 = vrot.slane %v4991_v29, 1  ;;  %v4994_v55 = vrot.slane %v4993_v23, 1  ;;  %v1660_v24 = vadd.f32 %v1629_v26, %v1593_v48  ;;  %v2739_v3 = vpop.eup %2738  ;;  %v1385_v31 = vadd.f32 %v4996_v49, %v4190_v45  ;;  %v4999_v48 = vld [vmem:[#allocation68_spill] sm:$0xff] }
 0x1dc   : > { %v1894_v60 = vmul.f32 %v1862_v20, %v1766_v19  ;;  %v1925_v4 = vadd.f32 %v1893_v52, %v1765_v22  ;;  %v1661_v39 = vadd.f32 %v1630_v40, %v1594_v1  ;;  %v2019_v56 = vadd.f32 1.0, %v2739_v3  ;;  %v5000_v3 = vld [vmem:[#allocation60_spill] sm:$0xff] }
 0x1dd   : > { %v1193_v36 = vsel %vm1161_vm2, %v4994_v55, %v4992_v61  ;;  %v4995_v33 = vmov %v4992_v61  ;;  %v1728_v46 = vadd.f32 %v1696_v30, %v1660_v24  ;;  %v2741_v16 = vpop.eup %2740  ;;  %v1386_v59 = vadd.f32 %v3632_v27, %v4196_v14 }
 0x1de   : > { %v4270_v34 = vsel %vm1161_vm2, %v4995_v33, 0.0  ;;  %v1281_v9 = vmul.f32 %v2937_v38, %v1193_v36  ;;  %v1926_v43 = vadd.f32 %v1894_v60, %v1766_v19  ;;  %v1957_v25 = vmul.f32 0.7978846, %v1925_v4 }
 0x1df   : > { %v1282_v44 = vmul.f32 %v2937_v38, %v4270_v34  ;;  %v1729_v8 = vadd.f32 %v1697_v42, %v1661_v39  ;;  %v2020_v41 = vadd.f32 1.0, %v2741_v16  ;;  %v1496_v45 = vmul.f32 %v3001_v21, %v4228_v57  ;;  %v5001_v39 = vld [vmem:[#allocation70_spill] sm:$0xff] }
 0x1e0   : > { %v4278_v35 = vadd.f32 %v1281_v9, %v4997_v5  ;;  %v1958_v37 = vmul.f32 0.7978846, %v1926_v43  ;;  %v1767_v26 = vadd.f32 %v3882_v47, %v1728_v46  ;;  %2742 = vtanh.f32 %v1957_v25  ;;  %v5003_v43 = vld [vmem:[#allocation76_spill] sm:$0xff] }
 0x1e1   : > { %v4281_v6 = vadd.f32 %v1282_v44, %v4998_v11  ;;  %v1768_v20 = vadd.f32 %v3882_v47, %v1729_v8  ;;  %v1453_v40 = vadd.f32 %v4999_v48, %v1385_v31  ;;  %v1454_v30 = vadd.f32 %v3636_v2, %v1386_v59 }
 0x1e2   : > { %v2051_v52 = vmul.f32 %v2019_v56, %v1795_v10  ;;  %v2052_v1 = vmul.f32 %v2020_v41, %v1796_v0  ;;  %2744 = vtanh.f32 %v1958_v37  ;;  %v1831_v42 = vmul.f32 0.044715, %v1767_v26 }
 0x1e3   : > { %v1797_v61 = vmul.f32 0.5, %v1765_v22  ;;  %v1798_v27 = vmul.f32 0.5, %v1766_v19  ;;  %v1832_v14 = vmul.f32 0.044715, %v1768_v20  ;;  %v1497_v55 = vmul.f32 %v3001_v21, %v1193_v36 }
 0x1e4   : > { %v2078_v60 = vpack.c.bf16 %v2052_v1, %v2051_v52  ;;  %v1863_v57 = vmul.f32 %v1831_v42, %v1767_v26  ;;  %v1527_v24 = vadd.f32 %v1495_v50, %v1453_v40  ;;  %v1528_v33 = vadd.f32 %v1496_v45, %v1454_v30  ;;  %v5007_v40 = vld [vmem:[#allocation74_spill] sm:$0xff] }
 0x1e5   : > { %v1864_v9 = vmul.f32 %v1832_v14, %v1768_v20  ;;  %v1563_v4 = vmul.f32 %v2993_v12, %v5000_v3  ;;  %v1564_v2 = vmul.f32 %v2993_v12, %v5001_v39  ;;  %v1631_v10 = vmul.f32 %v2976_v63, %v4993_v23  ;;  %v5008_v52 = vld [vmem:[#allocation62_spill] sm:$0xff] }
 0x1e6   : > { %2578 = vmatmul.mubr.bf16.gmra.mrb[4].mxu1 %v2078_v60  ;;  %v1895_v22 = vmul.f32 %v1863_v57, %v1767_v26  ;;  %v1632_v0 = vmul.f32 %v2976_v63, %v4991_v29  ;;  %v1698_v19 = vmul.f32 %v4043_v7, %v1193_v36  ;;  %v1699_v50 = vmul.f32 %v4043_v7, %v4270_v34  ;;  %v5006_v36 = vld [vmem:[#allocation64_spill] sm:$0xff] }
 0x1e7   : > { %v1896_v44 = vmul.f32 %v1864_v9, %v1768_v20  ;;  %v1595_v49 = vadd.f32 %v1563_v4, %v1527_v24  ;;  %v1596_v31 = vadd.f32 %v1564_v2, %v1528_v33  ;;  %v5002_v56 = vrot.slane %v3691_v58, 1 }
 0x1e8   : > { %v5004_v46 = vrot.slane %v5003_v43, 1  ;;  %v1927_v23 = vadd.f32 %v1895_v22, %v1767_v26  ;;  %v1387_v8 = vadd.f32 %v5006_v36, %v4238_v32  ;;  %v1388_v30 = vadd.f32 %v5007_v40, %v4241_v15  ;;  %v5011_v36 = vld [vmem:[#allocation80_spill] sm:$0xff] }
 0x1e9   : > { %v5005_v16 = vmov %v5002_v56  ;;  %v1928_v11 = vadd.f32 %v1896_v44, %v1768_v20  ;;  %v1662_v59 = vadd.f32 %v1631_v10, %v1595_v49  ;;  %v1663_v41 = vadd.f32 %v1632_v0, %v1596_v31  ;;  %v5010_v31 = vld [vmem:[#allocation88_spill] sm:$0xff] }
 0x1ea   : > { %v1196_v5 = vsel %vm1161_vm2, %v5004_v46, %v5002_v56  ;;  %v4311_v25 = vsel %vm1161_vm2, %v5005_v16, 0.0  ;;  %v1959_v45 = vmul.f32 0.7978846, %v1927_v23  ;;  %v1455_v1 = vadd.f32 %v5008_v52, %v1387_v8  ;;  %v2743_v42 = vpop.eup %2742 }
 0x1eb   : > { %v1283_v29 = vmul.f32 %v2937_v38, %v1196_v5  ;;  %v1284_v37 = vmul.f32 %v2937_v38, %v4311_v25  ;;  %v1960_v14 = vmul.f32 0.7978846, %v1928_v11  ;;  %v1730_v60 = vadd.f32 %v1698_v19, %v1662_v59  ;;  %v5013_v11 = vld [vmem:[#allocation75_spill] sm:$0xff] }
 0x1ec   : > { %v1731_v57 = vadd.f32 %v1699_v50, %v1663_v41  ;;  %v2745_v24 = vpop.eup %2744  ;;  %v2021_v33 = vadd.f32 1.0, %v2743_v42  ;;  %2746 = vtanh.f32 %v1959_v45  ;;  %v1498_v9 = vmul.f32 %v3001_v21, %v4270_v34 }
 0x1ed   : > { %v4319_v48 = vadd.f32 %v1283_v29, %v3688_v17  ;;  %v4325_v32 = vadd.f32 %v1284_v37, %v3741_v28  ;;  %v5009_v17 = vld [vmem:[#allocation72_spill] sm:$0xff]  ;;  %v2022_v4 = vadd.f32 1.0, %v2745_v24  ;;  %2748 = vtanh.f32 %v1960_v14  ;;  %v5017_v14 = vld [vmem:[#allocation94_spill] sm:$0xff] }
 0x1ee   : > { %v1456_v3 = vadd.f32 %v5009_v17, %v1388_v30  ;;  %v1769_v15 = vadd.f32 %v3882_v47, %v1730_v60  ;;  %v1770_v39 = vadd.f32 %v3882_v47, %v1731_v57  ;;  %v1799_v2 = vmul.f32 0.5, %v1767_v26  ;;  %v5018_v57 = vld [vmem:[#allocation81_spill] sm:$0xff] }
 0x1ef   : > { %v1800_v10 = vmul.f32 0.5, %v1768_v20  ;;  %v1529_v22 = vadd.f32 %v1497_v55, %v1455_v1  ;;  %v2053_v28 = vmul.f32 %v2021_v33, %v1797_v61  ;;  %v2054_v19 = vmul.f32 %v2022_v4, %v1798_v27  ;;  %v5019_v4 = vld [vmem:[#allocation82_spill] sm:$0xff] }
 0x1f0   : > { %v1530_v0 = vadd.f32 %v1498_v9, %v1456_v3  ;;  %v1833_v50 = vmul.f32 0.044715, %v1769_v15  ;;  %v1499_v44 = vmul.f32 %v3001_v21, %v1196_v5  ;;  %v1834_v49 = vmul.f32 0.044715, %v1770_v39 }
 0x1f1   : > { %v1565_v34 = vmul.f32 %v2993_v12, %v3664_v62  ;;  %v1566_v56 = vmul.f32 %v2993_v12, %v5010_v31  ;;  %v1633_v46 = vmul.f32 %v2976_v63, %v5003_v43  ;;  %v2079_v23 = vpack.c.bf16 %v2054_v19, %v2053_v28  ;;  %v5020_v19 = vld [vmem:[#allocation87_spill] sm:$0xff] }
 0x1f2   : > { %v1865_v26 = vmul.f32 %v1833_v50, %v1769_v15  ;;  %v1634_v20 = vmul.f32 %v2976_v63, %v3691_v58  ;;  %v1700_v61 = vmul.f32 %v4043_v7, %v1196_v5  ;;  %v1866_v27 = vmul.f32 %v1834_v49, %v1770_v39  ;;  %v5016_v5 = vld [vmem:[#allocation83_spill] sm:$0xff]  ;;  %v5021_v49 = vld [vmem:[#allocation90_spill] sm:$0xff] }
 0x1f3   : > { %v1597_v55 = vadd.f32 %v1565_v34, %v1529_v22  ;;  %v1598_v16 = vadd.f32 %v1566_v56, %v1530_v0  ;;  %v1701_v29 = vmul.f32 %v4043_v7, %v4311_v25  ;;  %2581 = vmatprep.mubr.bf16.mxu1 %v2079_v23  ;;  %v5012_v8 = vrot.slane %v5011_v36, 1 }
 0x1f4   : > { %v1897_v62 = vmul.f32 %v1865_v26, %v1769_v15  ;;  %v5014_v59 = vrot.slane %v5013_v11, 1  ;;  %v1389_v37 = vadd.f32 %v5016_v5, %v4278_v35  ;;  %v1898_v45 = vmul.f32 %v1866_v27, %v1770_v39 }
 0x1f5   : > { %v5015_v41 = vmov %v5012_v8  ;;  %v1664_v40 = vadd.f32 %v1633_v46, %v1597_v55  ;;  %v1665_v30 = vadd.f32 %v1634_v20, %v1598_v16  ;;  %v1390_v60 = vadd.f32 %v5017_v14, %v4281_v6 }
 0x1f6   : > { %v1199_v43 = vsel %vm1161_vm2, %v5014_v59, %v5012_v8  ;;  %v4352_v58 = vsel %vm1161_vm2, %v5015_v41, 0.0  ;;  %v1929_v1 = vadd.f32 %v1897_v62, %v1769_v15  ;;  %v1457_v24 = vadd.f32 %v5018_v57, %v1389_v37  ;;  %v2747_v33 = vpop.eup %2746  ;;  %v5022_v41 = vld [vmem:[#allocation77_spill] sm:$0xff] }
 0x1f7   : > { %v1285_v52 = vmul.f32 %v2937_v38, %v1199_v43  ;;  %v1286_v42 = vmul.f32 %v2937_v38, %v4352_v58  ;;  %v1930_v9 = vadd.f32 %v1898_v45, %v1770_v39  ;;  %v1732_v17 = vadd.f32 %v1700_v61, %v1664_v40  ;;  %v2749_v22 = vpop.eup %2748 }
 0x1f8   : > { %v1733_v3 = vadd.f32 %v1701_v29, %v1665_v30  ;;  %v2023_v0 = vadd.f32 1.0, %v2747_v33  ;;  %v1961_v28 = vmul.f32 0.7978846, %v1929_v1  ;;  %v1458_v34 = vadd.f32 %v5021_v49, %v1390_v60  ;;  %v5024_v30 = vld [vmem:[#allocation100_spill] sm:$0xff]  ;;  %v5026_v1 = vld [vmem:[#allocation91_spill] sm:$0xff] }
 0x1f9   : > { %v4363_v35 = vadd.f32 %v1285_v52, %v5019_v4  ;;  %v4366_v50 = vadd.f32 %v1286_v42, %v5020_v19  ;;  %v2024_v31 = vadd.f32 1.0, %v2749_v22  ;;  %v1962_v56 = vmul.f32 0.7978846, %v1930_v9  ;;  %v5031_v19 = vld [vmem:[#allocation89_spill] sm:$0xff] }
 0x1fa   : > { %v1771_v6 = vadd.f32 %v3882_v47, %v1732_v17  ;;  %v1772_v46 = vadd.f32 %v3882_v47, %v1733_v3  ;;  %v1801_v23 = vmul.f32 0.5, %v1769_v15  ;;  %v1802_v26 = vmul.f32 0.5, %v1770_v39  ;;  %v5023_v47 = vld [vmem:[#allocation84_spill] sm:$0xff]  ;;  %v5029_v17 = vld [vmem:[#allocation79_spill] sm:$0xff] }
 0x1fb   : > { %2750 = vtanh.f32 %v1961_v28  ;;  %v1500_v20 = vmul.f32 %v3001_v21, %v4311_v25  ;;  %v2055_v61 = vmul.f32 %v2023_v0, %v1799_v2  ;;  %v2056_v27 = vmul.f32 %v2024_v31, %v1800_v10  ;;  %v5030_v0 = vld [vmem:[#allocation106_spill] sm:$0xff] }
 0x1fc   : > { %2752 = vtanh.f32 %v1962_v56  ;;  %v1501_v55 = vmul.f32 %v3001_v21, %v1199_v43  ;;  %v1835_v16 = vmul.f32 0.044715, %v1771_v6  ;;  %v1836_v29 = vmul.f32 0.044715, %v1772_v46  ;;  %v5032_v56 = vld [vmem:[#allocation109_spill] sm:$0xff] }
 0x1fd   : > { %v1531_v62 = vadd.f32 %v1499_v44, %v1457_v24  ;;  %v1532_v8 = vadd.f32 %v1500_v20, %v1458_v34  ;;  %v2080_v59 = vpack.c.bf16 %v2056_v27, %v2055_v61  ;;  %v1567_v5 = vmul.f32 %v2993_v12, %v5022_v41  ;;  %v5033_v61 = vld [vmem:[#allocation78_spill] sm:$0xff] }
 0x1fe   : > { %v1568_v15 = vmul.f32 %v2993_v12, %v5023_v47  ;;  %v1635_v39 = vmul.f32 %v2976_v63, %v5013_v11  ;;  %v1867_v25 = vmul.f32 %v1835_v16, %v1771_v6  ;;  %v1868_v2 = vmul.f32 %v1836_v29, %v1772_v46 }
 0x1ff   : > { %v1636_v10 = vmul.f32 %v2976_v63, %v5011_v36  ;;  %v1702_v37 = vmul.f32 %v4043_v7, %v1199_v43  ;;  %2582 = vmatmul.mubr.bf16.gmra.mrb[8].mxu1 %v2080_v59  ;;  %v1599_v44 = vadd.f32 %v1567_v5, %v1531_v62  ;;  %v1703_v40 = vmul.f32 %v4043_v7, %v4352_v58 }
 0x200   : > { %v1600_v45 = vadd.f32 %v1568_v15, %v1532_v8  ;;  %v5025_v52 = vrot.slane %v5024_v30, 1  ;;  %v5027_v42 = vrot.slane %v5026_v1, 1  ;;  %v1899_v11 = vmul.f32 %v1867_v25, %v1771_v6  ;;  %v5034_v8 = vld [vmem:[#allocation85_spill] sm:$0xff] }
 0x201   : > { %v1900_v60 = vmul.f32 %v1868_v2, %v1772_v46  ;;  %v1666_v24 = vadd.f32 %v1635_v39, %v1599_v44  ;;  %v1391_v3 = vadd.f32 %v5029_v17, %v4319_v48  ;;  %v1392_v49 = vadd.f32 %v5031_v19, %v4325_v32  ;;  %v4415_v32 = vld [vmem:[%s4707_s4] ss:$0 sm:$0xff]  ;;  %v5037_v17 = vld [vmem:[#allocation92_spill] sm:$0xff] }
 0x202   : > { %v1202_v14 = vsel %vm1161_vm2, %v5027_v42, %v5025_v52  ;;  %v5028_v57 = vmov %v5025_v52  ;;  %v1667_v33 = vadd.f32 %v1636_v10, %v1600_v45  ;;  %v1931_v4 = vadd.f32 %v1899_v11, %v1771_v6  ;;  %v5035_v52 = vld [vmem:[#allocation97_spill] sm:$0xff]  ;;  %v5036_v11 = vld [vmem:[#allocation107_spill] sm:$0xff] }
 0x203   : > { %v4393_v36 = vsel %vm1161_vm2, %v5028_v57, 0.0  ;;  %v1287_v43 = vmul.f32 %v2937_v38, %v1202_v14  ;;  %v1932_v22 = vadd.f32 %v1900_v60, %v1772_v46  ;;  %v1734_v34 = vadd.f32 %v1702_v37, %v1666_v24 }
 0x204   : > { %v1288_v9 = vmul.f32 %v2937_v38, %v4393_v36  ;;  %v1735_v31 = vadd.f32 %v1703_v40, %v1667_v33  ;;  %v1459_v27 = vadd.f32 %v5033_v61, %v1391_v3  ;;  %v1963_v29 = vmul.f32 0.7978846, %v1931_v4  ;;  %v5039_v4 = vld [vmem:[#allocation86_spill] sm:$0xff] }
 0x205   : > { %v4401_v28 = vadd.f32 %v1287_v43, %v5030_v0  ;;  %v2751_v16 = vpop.eup %2750  ;;  %v1964_v62 = vmul.f32 0.7978846, %v1932_v22  ;;  %v1502_v48 = vmul.f32 %v3001_v21, %v4352_v58  ;;  %v1460_v59 = vadd.f32 %v5034_v8, %v1392_v49  ;;  %v5042_v61 = vld [vmem:[#allocation102_spill] sm:$0xff] }
 0x206   : > { %v4406_v20 = vadd.f32 %v1288_v9, %v5032_v56  ;;  %v2753_v41 = vpop.eup %2752  ;;  %v2025_v5 = vadd.f32 1.0, %v2751_v16  ;;  %v1803_v47 = vmul.f32 0.5, %v1771_v6  ;;  %v1773_v15 = vadd.f32 %v4415_v32, %v1734_v34  ;;  %v5043_v16 = vld [vmem:[#allocation111_spill] sm:$0xff] }
 0x207   : > { %v1774_v39 = vadd.f32 %v4415_v32, %v1735_v31  ;;  %v2026_v25 = vadd.f32 1.0, %v2753_v41  ;;  %2754 = vtanh.f32 %v1963_v29  ;;  %v1533_v2 = vadd.f32 %v1501_v55, %v1459_v27 }
 0x208   : > { %v1534_v10 = vadd.f32 %v1502_v48, %v1460_v59  ;;  %v2057_v37 = vmul.f32 %v2025_v5, %v1801_v23  ;;  %v1804_v58 = vmul.f32 0.5, %v1772_v46  ;;  %2756 = vtanh.f32 %v1964_v62  ;;  %v5044_v59 = vld [vmem:[#allocation101_spill] sm:$0xff] }
 0x209   : > { %v1503_v44 = vmul.f32 %v3001_v21, %v1202_v14  ;;  %v2058_v45 = vmul.f32 %v2026_v25, %v1802_v26  ;;  %v1837_v6 = vmul.f32 0.044715, %v1773_v15  ;;  %v1838_v40 = vmul.f32 0.044715, %v1774_v39  ;;  %v5045_v25 = vld [vmem:[#allocation104_spill] sm:$0xff] }
 0x20a   : > { %v1569_v42 = vmul.f32 %v2993_v12, %v5035_v52  ;;  %v1570_v60 = vmul.f32 %v2993_v12, %v5036_v11  ;;  %v1637_v57 = vmul.f32 %v2976_v63, %v5026_v1  ;;  %v1638_v55 = vmul.f32 %v2976_v63, %v5024_v30 }
 0x20b   : > { %v1704_v46 = vmul.f32 %v4043_v7, %v1202_v14  ;;  %v2081_v23 = vpack.c.bf16 %v2058_v45, %v2057_v37  ;;  %v1869_v43 = vmul.f32 %v1837_v6, %v1773_v15  ;;  %v1870_v24 = vmul.f32 %v1838_v40, %v1774_v39  ;;  %v5047_v45 = vld [vmem:[#allocation108_spill] sm:$0xff] }
 0x20c   : > { %v1601_v26 = vadd.f32 %v1569_v42, %v1533_v2  ;;  %v1602_v33 = vadd.f32 %v1570_v60, %v1534_v10  ;;  %v1705_v9 = vmul.f32 %v4043_v7, %v4393_v36  ;;  %v5038_v3 = vrot.slane %v5037_v17, 1  ;;  %v5046_v10 = vld [vmem:[#allocation98_spill] sm:$0xff] }
 0x20d   : > { %v5040_v22 = vrot.slane %v5039_v4, 1  ;;  %2585 = vmatprep.mubr.bf16.mxu1 %v2081_v23  ;;  %v1901_v14 = vmul.f32 %v1869_v43, %v1773_v15  ;;  %v1902_v19 = vmul.f32 %v1870_v24, %v1774_v39  ;;  %v1393_v27 = vadd.f32 %v5042_v61, %v4363_v35 }
 0x20e   : > { %v5041_v1 = vmov %v5038_v3  ;;  %v1668_v49 = vadd.f32 %v1637_v57, %v1601_v26  ;;  %v1669_v31 = vadd.f32 %v1638_v55, %v1602_v33  ;;  %v1394_v29 = vadd.f32 %v5043_v16, %v4366_v50  ;;  %v5050_v16 = vld [vmem:[#allocation18_spill] sm:$0xff] }
 0x20f   : > { %v1205_v0 = vsel %vm1161_vm2, %v5040_v22, %v5038_v3  ;;  %v4439_v30 = vsel %vm1161_vm2, %v5041_v1, 0.0  ;;  %v1933_v62 = vadd.f32 %v1901_v14, %v1773_v15  ;;  %v1934_v48 = vadd.f32 %v1902_v19, %v1774_v39  ;;  %v5048_v1 = vld [vmem:[#allocation93_spill] sm:$0xff] }
 0x210   : > { %v1289_v34 = vmul.f32 %v2937_v38, %v1205_v0  ;;  %v1290_v56 = vmul.f32 %v2937_v38, %v4439_v30  ;;  %v1736_v8 = vadd.f32 %v1704_v46, %v1668_v49  ;;  %v1737_v5 = vadd.f32 %v1705_v9, %v1669_v31 }
 0x211   : > { %v1461_v37 = vadd.f32 %v5046_v10, %v1393_v27  ;;  %v1462_v6 = vadd.f32 %v5047_v45, %v1394_v29  ;;  %v2755_v40 = vpop.eup %2754  ;;  %v1965_v52 = vmul.f32 0.7978846, %v1933_v62  ;;  %v1966_v35 = vmul.f32 0.7978846, %v1934_v48  ;;  %v5053_v45 = vld [vmem:[#allocation31_spill] sm:$0xff] }
 0x212   : > { %v4449_v41 = vadd.f32 %v1289_v34, %v5044_v59  ;;  %v4452_v2 = vadd.f32 %v1290_v56, %v5045_v25  ;;  %v1504_v50 = vmul.f32 %v3001_v21, %v4393_v36  ;;  %v1775_v42 = vadd.f32 %v4415_v32, %v1736_v8  ;;  %v2757_v11 = vpop.eup %2756 }
 0x213   : > { %v2027_v60 = vadd.f32 1.0, %v2755_v40  ;;  %v1805_v57 = vmul.f32 0.5, %v1773_v15  ;;  %v1776_v55 = vadd.f32 %v4415_v32, %v1737_v5  ;;  %v1535_v46 = vadd.f32 %v1503_v44, %v1461_v37  ;;  %v5049_v15 = vld [vmem:[#allocation99_spill] sm:$0xff]  ;;  %v5054_v40 = vld [vmem:[#allocation105_spill] sm:$0xff] }
 0x214   : > { %v2028_v23 = vadd.f32 1.0, %v2757_v11  ;;  %v1806_v43 = vmul.f32 0.5, %v1774_v39  ;;  %2758 = vtanh.f32 %v1965_v52  ;;  %v1839_v24 = vmul.f32 0.044715, %v1775_v42 }
 0x215   : > { %v2059_v26 = vmul.f32 %v2027_v60, %v1803_v47  ;;  %2760 = vtanh.f32 %v1966_v35  ;;  %v1840_v33 = vmul.f32 0.044715, %v1776_v55  ;;  %v1505_v9 = vmul.f32 %v3001_v21, %v1205_v0  ;;  %v5056_v60 = vld [vmem:[#allocation96_spill] sm:$0xff] }
 0x216   : > { %v2060_v3 = vmul.f32 %v2028_v23, %v1804_v58  ;;  %v1871_v22 = vmul.f32 %v1839_v24, %v1775_v42  ;;  %v1536_v36 = vadd.f32 %v1504_v50, %v1462_v6  ;;  %v1571_v14 = vmul.f32 %v2993_v12, %v5048_v1  ;;  %v5057_v24 = vld [vmem:[#allocation103_spill] sm:$0xff] }
 0x217   : > { %v1872_v19 = vmul.f32 %v1840_v33, %v1776_v55  ;;  %v1572_v49 = vmul.f32 %v2993_v12, %v5049_v15  ;;  %v1639_v39 = vmul.f32 %v2976_v63, %v5039_v4  ;;  %v1640_v47 = vmul.f32 %v2976_v63, %v5037_v17 }
 0x218   : > { %v2082_v44 = vpack.c.bf16 %v2060_v3, %v2059_v26  ;;  %v1903_v34 = vmul.f32 %v1871_v22, %v1775_v42  ;;  %v1603_v31 = vadd.f32 %v1571_v14, %v1535_v46  ;;  %v1706_v58 = vmul.f32 %v4043_v7, %v1205_v0 }
 0x219   : > { %v1904_v56 = vmul.f32 %v1872_v19, %v1776_v55  ;;  %v1604_v61 = vadd.f32 %v1572_v49, %v1536_v36  ;;  %v1707_v27 = vmul.f32 %v4043_v7, %v4439_v30  ;;  %v5051_v29 = vrot.slane %v5050_v16, 1  ;;  %v5052_v7 = vld [vmem:[#allocation95_spill] sm:$0xff] }
 0x21a   : > { %2586 = vmatmul.mubr.bf16.gmra.mrb[12].mxu1 %v2082_v44  ;;  %v1935_v4 = vadd.f32 %v1903_v34, %v1775_v42  ;;  %v1670_v48 = vadd.f32 %v1639_v39, %v1603_v31  ;;  %v1256_v17 = vsel %vm1161_vm2, %v1207_v18, 0.0  ;;  %v1395_v25 = vadd.f32 %v5052_v7, %v4401_v28  ;;  %v5058_v34 = vld [vmem:[#allocation25_spill] sm:$0xff]  ;;  %v5062_v7 = vld [vmem:[#allocation110_spill] sm:$0xff] }
 0x21b   : > { %v1208_v62 = vsel %vm1161_vm2, %v5051_v29, %v1207_v18  ;;  %v1936_v8 = vadd.f32 %v1904_v56, %v1776_v55  ;;  %v1671_v59 = vadd.f32 %v1640_v47, %v1604_v61  ;;  %v1292_v5 = vmul.f32 %v2937_v38, %v1256_v17  ;;  %v5055_v18 = vld [vmem:[#allocation6_spill] sm:$0xff] }
 0x21c   : > { %v1291_v0 = vmul.f32 %v2937_v38, %v1208_v62  ;;  %v1967_v10 = vmul.f32 0.7978846, %v1935_v4  ;;  %v1738_v37 = vadd.f32 %v1706_v58, %v1670_v48  ;;  %v1396_v52 = vadd.f32 %v5054_v40, %v4406_v20  ;;  %v5064_v40 = vld [vmem:[#allocation11_spill] sm:$0xff] }
 0x21d   : > { %v1968_v35 = vmul.f32 0.7978846, %v1936_v8  ;;  %v1739_v50 = vadd.f32 %v1707_v27, %v1671_v59  ;;  %v4490_v11 = vadd.f32 %v1292_v5, %v5055_v18  ;;  %v1463_v46 = vadd.f32 %v5056_v60, %v1395_v25  ;;  %v5060_v5 = vld [vmem:[#allocation8_spill] sm:$0xff] }
 0x21e   : > { %v4485_v6 = vadd.f32 %v1291_v0, %v5053_v45  ;;  %v2759_v23 = vpop.eup %2758  ;;  %2762 = vtanh.f32 %v1967_v10  ;;  %v1506_v38 = vmul.f32 %v3001_v21, %v4439_v30  ;;  %v1777_v28 = vadd.f32 %v4415_v32, %v1738_v37  ;;  %v5065_v18 = vld [vmem:[#allocation16_spill] sm:$0xff] }
 0x21f   : > { %v1464_v26 = vadd.f32 %v5057_v24, %v1396_v52  ;;  %v2761_v33 = vpop.eup %2760  ;;  %v2029_v3 = vadd.f32 1.0, %v2759_v23  ;;  %v1807_v22 = vmul.f32 0.5, %v1775_v42  ;;  %2764 = vtanh.f32 %v1968_v35 }
 0x220   : > { %v4498_v20 = vadd.f32 %v4415_v32, %v1739_v50  ;;  %v2030_v36 = vadd.f32 1.0, %v2761_v33  ;;  %v1808_v1 = vmul.f32 0.5, %v1776_v55  ;;  %v1841_v14 = vmul.f32 0.044715, %v1777_v28 }
 0x221   : > { %v1537_v19 = vadd.f32 %v1505_v9, %v1463_v46  ;;  %v2061_v15 = vmul.f32 %v2029_v3, %v1805_v57  ;;  %v1507_v30 = vmul.f32 %v3001_v21, %v1208_v62  ;;  %v1538_v39 = vadd.f32 %v1506_v38, %v1464_v26  ;;  %v4514_v9 = vld [vmem:[%s4706_s3 + $0x8] ss:$0 sm:$0xff] }
 0x222   : > { %v1842_v49 = vmul.f32 0.044715, %v4498_v20  ;;  %v2062_v47 = vmul.f32 %v2030_v36, %v1806_v43  ;;  %v1873_v44 = vmul.f32 %v1841_v14, %v1777_v28  ;;  %v1573_v31 = vmul.f32 %v2993_v12, %v5058_v34  ;;  %v5067_v14 = vld [vmem:[#allocation15_spill] sm:$0xff]  ;;  %v5068_v34 = vld [vmem:[#allocation30_spill] sm:$0xff] }
 0x223   : > { %v1574_v42 = vmul.f32 %v2993_v12, %v3986_v51  ;;  %v1641_v55 = vmul.f32 %v2976_v63, %v5050_v16  ;;  %v1642_v57 = vmul.f32 %v2976_v63, %v3968_v53  ;;  %v1708_v43 = vmul.f32 %v4514_v9, %v1208_v62  ;;  %v5059_v16 = vld [vmem:[#allocation22_spill] sm:$0xff] }
 0x224   : > { %v1874_v58 = vmul.f32 %v1842_v49, %v4498_v20  ;;  %v2083_v56 = vpack.c.bf16 %v2062_v47, %v2061_v15  ;;  %v1905_v61 = vmul.f32 %v1873_v44, %v1777_v28  ;;  %v1605_v27 = vadd.f32 %v1573_v31, %v1537_v19 }
 0x225   : > { %v1606_v29 = vadd.f32 %v1574_v42, %v1538_v39  ;;  %v1709_v4 = vmul.f32 %v4514_v9, %v1256_v17  ;;  %v1397_v48 = vadd.f32 %v5059_v16, %v4449_v41  ;;  %v1398_v53 = vadd.f32 %v4086_v54, %v4452_v2  ;;  %v5069_v42 = vld [vmem:[#allocation10_spill] sm:$0xff] }
 0x226   : > { %v1906_v51 = vmul.f32 %v1874_v58, %v4498_v20  ;;  %2589 = vmatprep.mubr.bf16.mxu1 %v2083_v56  ;;  %v1937_v0 = vadd.f32 %v1905_v61, %v1777_v28  ;;  %v1672_v8 = vadd.f32 %v1641_v55, %v1605_v27  ;;  %v5061_v62 = vrot.slane %v5060_v5, 1  ;;  %v5074_v5 = vld [vmem:[#allocation112_spill] sm:$0xff] }
 0x227   : > { %v1673_v59 = vadd.f32 %v1642_v57, %v1606_v29  ;;  %v5063_v25 = vrot.slane %v5062_v7, 1  ;;  %v1508_v45 = vmul.f32 %v3001_v21, %v1256_v17  ;;  %v1465_v52 = vadd.f32 %v5064_v40, %v1397_v48  ;;  %v5071_v29 = vld [vmem:[#allocation114_spill] sm:$0xff]  ;;  %v5072_v48 = vld [vmem:[#allocation9_spill] sm:$0xff] }
 0x228   : > { %v1938_v37 = vadd.f32 %v1906_v51, %v4498_v20  ;;  %v1466_v41 = vadd.f32 %v4061_v13, %v1398_v53  ;;  %v2763_v35 = vpop.eup %2762  ;;  %v1969_v54 = vmul.f32 0.7978846, %v1937_v0  ;;  %v1740_v2 = vadd.f32 %v1708_v43, %v1672_v8  ;;  %v5066_v13 = vld [vmem:[#allocation113_spill] sm:$0xff]  ;;  %v5073_v0 = vld [vmem:[#allocation3_spill] sm:$0xff] }
 0x229   : > { %v1471_v10 = vsel %vm1161_vm2, %v5063_v25, %v5061_v62  ;;  %v1741_v50 = vadd.f32 %v1709_v4, %v1673_v59  ;;  %v1576_v60 = vmul.f32 %v2993_v12, %v5065_v18  ;;  %v2765_v46 = vpop.eup %2764  ;;  %v2031_v23 = vadd.f32 1.0, %v2763_v35  ;;  %v5075_v62 = vld [vmem:[#allocation2_spill] sm:$0xff] }
 0x22a   : > { %v1970_v38 = vmul.f32 0.7978846, %v1938_v37  ;;  %v1539_v24 = vadd.f32 %v1507_v30, %v1465_v52  ;;  %v1540_v26 = vadd.f32 %v1508_v45, %v1466_v41  ;;  %v2032_v33 = vadd.f32 1.0, %v2765_v46 }
 0x22b   : > { %2766 = vtanh.f32 %v1969_v54  ;;  %v4535_v17 = vadd.f32 %v4415_v32, %v1740_v2  ;;  %v4538_v3 = vadd.f32 %v4415_v32, %v1741_v50  ;;  %v1510_v36 = vmul.f32 %v3001_v21, %v5066_v13  ;;  %v5076_v50 = vld [vmem:[#allocation4_spill] sm:$0xff] }
 0x22c   : > { %2768 = vtanh.f32 %v1970_v38  ;;  %v1607_v19 = vadd.f32 %v5067_v14, %v1539_v24  ;;  %v1608_v15 = vadd.f32 %v1576_v60, %v1540_v26  ;;  %v2063_v49 = vmul.f32 %v2031_v23, %v1807_v22  ;;  %v5070_v22 = vld [vmem:[#allocation28_spill] sm:$0xff] }
 0x22d   : > { %v2064_v39 = vmul.f32 %v2032_v33, %v1808_v1  ;;  %v1809_v47 = vmul.f32 0.5, %v1777_v28  ;;  %v1843_v30 = vmul.f32 0.044715, %v4535_v17  ;;  %v1844_v44 = vmul.f32 0.044715, %v4538_v3 }
 0x22e   : > { %v1674_v31 = vadd.f32 %v5068_v34, %v1607_v19  ;;  %v1675_v58 = vadd.f32 %v5069_v42, %v1608_v15  ;;  %v1710_v55 = vmul.f32 %v4514_v9, %v1471_v10  ;;  %v1711_v56 = vmul.f32 %v4514_v9, %v5066_v13  ;;  %v5077_v15 = vld [vmem:[#allocation5_spill] sm:$0xff] }
 0x22f   : > { %v2084_v57 = vpack.c.bf16 %v2064_v39, %v2063_v49  ;;  %v1875_v43 = vmul.f32 %v1843_v30, %v4535_v17  ;;  %v1399_v1 = vadd.f32 %v5070_v22, %v4485_v6  ;;  %v1876_v28 = vmul.f32 %v1844_v44, %v4538_v3 }
 0x230   : > { %v1509_v61 = vmul.f32 %v3001_v21, %v1471_v10  ;;  %v1742_v27 = vadd.f32 %v1710_v55, %v1674_v31  ;;  %v1400_v51 = vadd.f32 %v5071_v29, %v4490_v11  ;;  %v1743_v16 = vadd.f32 %v1711_v56, %v1675_v58 }
 0x231   : > { %2590 = vmatmul.mubr.bf16.gmra.mrb[16].mxu1 %v2084_v57  ;;  %v1907_v4 = vmul.f32 %v1875_v43, %v4535_v17  ;;  %v1467_v53 = vadd.f32 %v5072_v48, %v1399_v1  ;;  %v1577_v8 = vmul.f32 %v2993_v12, %v5073_v0  ;;  %v1908_v59 = vmul.f32 %v1876_v28, %v4538_v3 }
 0x232   : > { %v4563_v6 = vadd.f32 %v4415_v32, %v1742_v27  ;;  %v1468_v21 = vadd.f32 %v5074_v5, %v1400_v51  ;;  %v1578_v7 = vmul.f32 %v2993_v12, %v5075_v62  ;;  %v4570_v25 = vadd.f32 %v4415_v32, %v1743_v16 }
 0x233   : > { %v1939_v11 = vadd.f32 %v1907_v4, %v4535_v17  ;;  %v1541_v10 = vadd.f32 %v1509_v61, %v1467_v53  ;;  %v1645_v37 = vmul.f32 0.0, %v2976_v63  ;;  %v1810_v45 = vmul.f32 0.5, %v4498_v20 }
 0x234   : > { %v1940_v40 = vadd.f32 %v1908_v59, %v4538_v3  ;;  %v1845_v52 = vmul.f32 0.044715, %v4563_v6  ;;  %v1542_v41 = vadd.f32 %v1510_v36, %v1468_v21  ;;  %v1846_v2 = vmul.f32 0.044715, %v4570_v25 }
 0x235   : > { %v2767_v35 = vpop.eup %2766  ;;  %v1971_v54 = vmul.f32 0.7978846, %v1939_v11  ;;  %v1609_v12 = vadd.f32 %v1577_v8, %v1541_v10  ;;  %v1712_v18 = vmul.f32 %v4514_v9, %v5076_v50  ;;  %v1713_v49 = vmul.f32 %v4514_v9, %v5077_v15 }
 0x236   : > { %v2769_v60 = vpop.eup %2768  ;;  %v2033_v46 = vadd.f32 1.0, %v2767_v35  ;;  %v1972_v23 = vmul.f32 0.7978846, %v1940_v40  ;;  %v1877_v63 = vmul.f32 %v1845_v52, %v4563_v6  ;;  %v1610_v38 = vadd.f32 %v1578_v7, %v1542_v41 }
 0x237   : > { %v2034_v20 = vadd.f32 1.0, %v2769_v60  ;;  %2770 = vtanh.f32 %v1971_v54  ;;  %v1878_v24 = vmul.f32 %v1846_v2, %v4570_v25  ;;  %v1676_v26 = vadd.f32 %v1645_v37, %v1609_v12 }
 0x238   : > { %v2065_v33 = vmul.f32 %v2033_v46, %v1809_v47  ;;  %2772 = vtanh.f32 %v1972_v23  ;;  %v1909_v13 = vmul.f32 %v1877_v63, %v4563_v6  ;;  %v1677_v36 = vadd.f32 %v1645_v37, %v1610_v38 }
 0x239   : > { %v2066_v14 = vmul.f32 %v2034_v20, %v1810_v45  ;;  %v1910_v19 = vmul.f32 %v1878_v24, %v4570_v25  ;;  %v1744_v39 = vadd.f32 %v1712_v18, %v1676_v26  ;;  %v1811_v61 = vmul.f32 0.5, %v4535_v17 }
 0x23a   : > { %v1941_v30 = vadd.f32 %v1909_v13, %v4563_v6  ;;  %v1745_v31 = vadd.f32 %v1713_v49, %v1677_v36  ;;  %v1812_v29 = vmul.f32 0.5, %v4538_v3  ;;  %v1813_v17 = vmul.f32 0.5, %v4563_v6  ;;  %v4597_v6 = vld [vmem:[%s4709_s6] ss:$0 sm:$0xff] }
 0x23b   : > { %v2085_v44 = vpack.c.bf16 %v2066_v14, %v2065_v33  ;;  %v1942_v34 = vadd.f32 %v1910_v19, %v4570_v25  ;;  %v1783_v42 = vadd.f32 %v4415_v32, %v1744_v39  ;;  %v1814_v7 = vmul.f32 0.5, %v4570_v25 }
 0x23c   : > { %v1973_v47 = vmul.f32 0.7978846, %v1941_v30  ;;  %v1784_v55 = vadd.f32 %v4415_v32, %v1745_v31 }
 0x23d   : > { %2593 = vmatprep.mubr.bf16.mxu1 %v2085_v44  ;;  %v1974_v58 = vmul.f32 0.7978846, %v1942_v34  ;;  %v1847_v57 = vmul.f32 0.044715, %v1783_v42  ;;  %v1815_v41 = vmul.f32 0.5, %v1783_v42 }
 0x23e   : > { %2774 = vtanh.f32 %v1973_v47  ;;  %v1848_v43 = vmul.f32 0.044715, %v1784_v55  ;;  %v1816_v35 = vmul.f32 0.5, %v1784_v55 }
 0x23f   : > { %2776 = vtanh.f32 %v1974_v58  ;;  %v1879_v56 = vmul.f32 %v1847_v57, %v1783_v42 }
 0x240   : > { %v1880_v22 = vmul.f32 %v1848_v43, %v1784_v55 }
 0x241   : > { %v2771_v9 = vpop.eup %2770  ;;  %v1911_v1 = vmul.f32 %v1879_v56, %v1783_v42 }
 0x242   : > { %v2773_v28 = vpop.eup %2772  ;;  %v2035_v27 = vadd.f32 1.0, %v2771_v9  ;;  %v1912_v4 = vmul.f32 %v1880_v22, %v1784_v55 }
 0x243   : > { %v2036_v51 = vadd.f32 1.0, %v2773_v28  ;;  %v1943_v16 = vadd.f32 %v1911_v1, %v1783_v42 }
 0x244   : > { %v2067_v48 = vmul.f32 %v2035_v27, %v1811_v61  ;;  %v1944_v32 = vadd.f32 %v1912_v4, %v1784_v55 }
 0x245   : > { %v2068_v53 = vmul.f32 %v2036_v51, %v1812_v29  ;;  %v1975_v0 = vmul.f32 0.7978846, %v1943_v16 }
 0x246   : > { %v1976_v59 = vmul.f32 0.7978846, %v1944_v32 }
 0x247   : > { %v2086_v8 = vpack.c.bf16 %v2068_v53, %v2067_v48  ;;  %2778 = vtanh.f32 %v1975_v0 }
 0x248   : > { %v2775_v5 = vpop.eup %2774  ;;  %2780 = vtanh.f32 %v1976_v59 }
 0x249   : > { %v2777_v21 = vpop.eup %2776  ;;  %2594 = vmatmul.mubr.bf16.gmra.mrb[20].mxu1 %v2086_v8  ;;  %v2037_v62 = vadd.f32 1.0, %v2775_v5 }
 0x24a   : > { %v2038_v3 = vadd.f32 1.0, %v2777_v21 }
 0x24b   : > { %v2069_v11 = vmul.f32 %v2037_v62, %v1813_v17 }
 0x24c   : > { %v2070_v10 = vmul.f32 %v2038_v3, %v1814_v7 }
 0x24e   : > { %v2087_v37 = vpack.c.bf16 %v2070_v10, %v2069_v11 }
 0x250   : > { %2597 = vmatprep.mubr.bf16.mxu1 %v2087_v37 }
 0x251   : > { %v2779_v45 = vpop.eup %2778 }
 0x252   : > { %v2039_v40 = vadd.f32 1.0, %v2779_v45  ;;  %v2781_v52 = vpop.eup %2780 }
 0x253   : > { %v2040_v54 = vadd.f32 1.0, %v2781_v52 }
 0x254   : > { %v2071_v2 = vmul.f32 %v2039_v40, %v1815_v41 }
 0x255   : > { %v2072_v12 = vmul.f32 %v2040_v54, %v1816_v35 }
 0x257   : > { %v2088_v50 = vpack.c.bf16 %v2072_v12, %v2071_v2 }
 0x259   : > { %2598 = vmatmul.mubr.bf16.gmra.mrb[24].mxu1 %v2088_v50 }
 0x27e   : > { %v2571_v25 = vpop.f32.mrb[32].mxu0 }
 0x27f   : > { %v2203_v18 = vadd.f32 %v2571_v25, %v4597_v6  ;;  %v2194_v60 = vpop.f32.mrb[33].mxu0 }
 0x280   : > { %v2195_v46 = vadd.f32 %v4597_v6, %v2194_v60  ;;  %v2572_v23 = vpop.f32.mrb[34].mxu0 }
 0x281   : > { %2323 = vst.msk [vmem:[%s4602_s10 + $0x10] sm:$0xff] %vm431_vm0, %v2203_v18  ;;  %v2206_v63 = vadd.f32 %v2572_v23, %v4597_v6  ;;  %v2197_v38 = vpop.f32.mrb[35].mxu0 }
 0x282   : > { %2321 = vst.msk [vmem:[%s4602_s10] sm:$0xff] %vm431_vm0, %v2195_v46  ;;  %v2198_v20 = vadd.f32 %v4597_v6, %v2197_v38 }
 0x283   : > { %2324 = vst.msk [vmem:[%s4602_s10 + $0x18] sm:$0xff] %vm431_vm0, %v2206_v63 }
 0x284   : > { %2322 = vst.msk [vmem:[%s4602_s10 + $0x8] sm:$0xff] %vm431_vm0, %v2198_v20 }
 0x2a1   : > { %v2575_v24 = vpop.f32.mrb[0].mxu1 }
 0x2a2   : > { %v2219_v26 = vadd.f32 %v2575_v24, %v4597_v6  ;;  %v2210_v33 = vpop.f32.mrb[1].mxu1 }
 0x2a3   : > { %v2211_v13 = vadd.f32 %v4597_v6, %v2210_v33  ;;  %v2576_v36 = vpop.f32.mrb[2].mxu1 }
 0x2a4   : > { %2327 = vst.msk [vmem:[%s4602_s10 + $0x30] sm:$0xff] %vm431_vm0, %v2219_v26  ;;  %v2222_v14 = vadd.f32 %v2576_v36, %v4597_v6  ;;  %v2213_v19 = vpop.f32.mrb[3].mxu1 }
 0x2a5   : > { %2325 = vst.msk [vmem:[%s4602_s10 + $0x20] sm:$0xff] %vm431_vm0, %v2211_v13  ;;  %v2214_v15 = vadd.f32 %v4597_v6, %v2213_v19 }
 0x2a6   : > { %2328 = vst.msk [vmem:[%s4602_s10 + $0x38] sm:$0xff] %vm431_vm0, %v2222_v14 }
 0x2a7   : > { %2326 = vst.msk [vmem:[%s4602_s10 + $0x28] sm:$0xff] %vm431_vm0, %v2214_v15 }
 0x2b9   : > { %v2579_v49 = vpop.f32.mrb[4].mxu1 }
 0x2ba   : > { %v2235_v39 = vadd.f32 %v2579_v49, %v4597_v6  ;;  %v2226_v30 = vpop.f32.mrb[5].mxu1 }
 0x2bb   : > { %v2227_v44 = vadd.f32 %v4597_v6, %v2226_v30  ;;  %v2580_v34 = vpop.f32.mrb[6].mxu1 }
 0x2bc   : > { %2331 = vst.msk [vmem:[%s4602_s10 + $0x50] sm:$0xff] %vm431_vm0, %v2235_v39  ;;  %v2238_v31 = vadd.f32 %v2580_v34, %v4597_v6  ;;  %v2229_v42 = vpop.f32.mrb[7].mxu1 }
 0x2bd   : > { %2329 = vst.msk [vmem:[%s4602_s10 + $0x40] sm:$0xff] %vm431_vm0, %v2227_v44  ;;  %v2230_v47 = vadd.f32 %v4597_v6, %v2229_v42 }
 0x2be   : > { %2332 = vst.msk [vmem:[%s4602_s10 + $0x58] sm:$0xff] %vm431_vm0, %v2238_v31 }
 0x2bf   : > { %2330 = vst.msk [vmem:[%s4602_s10 + $0x48] sm:$0xff] %vm431_vm0, %v2230_v47 }
 0x2d2   : > { %v2583_v58 = vpop.f32.mrb[8].mxu1 }
 0x2d3   : > { %v2251_v55 = vadd.f32 %v2583_v58, %v4597_v6  ;;  %v2242_v57 = vpop.f32.mrb[9].mxu1 }
 0x2d4   : > { %v2243_v43 = vadd.f32 %v4597_v6, %v2242_v57  ;;  %v2584_v56 = vpop.f32.mrb[10].mxu1 }
 0x2d5   : > { %2335 = vst.msk [vmem:[%s4602_s10 + $0x70] sm:$0xff] %vm431_vm0, %v2251_v55  ;;  %v2254_v9 = vadd.f32 %v2584_v56, %v4597_v6  ;;  %v2245_v22 = vpop.f32.mrb[11].mxu1 }
 0x2d6   : > { %2333 = vst.msk [vmem:[%s4602_s10 + $0x60] sm:$0xff] %vm431_vm0, %v2243_v43  ;;  %v2246_v1 = vadd.f32 %v4597_v6, %v2245_v22 }
 0x2d7   : > { %2336 = vst.msk [vmem:[%s4602_s10 + $0x78] sm:$0xff] %vm431_vm0, %v2254_v9 }
 0x2d8   : > { %2334 = vst.msk [vmem:[%s4602_s10 + $0x68] sm:$0xff] %vm431_vm0, %v2246_v1 }
 0x2ed   : > { %v2587_v28 = vpop.f32.mrb[12].mxu1 }
 0x2ee   : > { %v2267_v61 = vadd.f32 %v2587_v28, %v4597_v6  ;;  %v2258_v27 = vpop.f32.mrb[13].mxu1 }
 0x2ef   : > { %v2259_v29 = vadd.f32 %v4597_v6, %v2258_v27  ;;  %v2588_v51 = vpop.f32.mrb[14].mxu1 }
 0x2f0   : > { %2339 = vst.msk [vmem:[%s4602_s10 + $0x90] sm:$0xff] %vm431_vm0, %v2267_v61  ;;  %v2270_v4 = vadd.f32 %v2588_v51, %v4597_v6  ;;  %v2261_v16 = vpop.f32.mrb[15].mxu1 }
 0x2f1   : > { %2337 = vst.msk [vmem:[%s4602_s10 + $0x80] sm:$0xff] %vm431_vm0, %v2259_v29  ;;  %v2262_v48 = vadd.f32 %v4597_v6, %v2261_v16 }
 0x2f2   : > { %2340 = vst.msk [vmem:[%s4602_s10 + $0x98] sm:$0xff] %vm431_vm0, %v2270_v4 }
 0x2f3   : > { %2338 = vst.msk [vmem:[%s4602_s10 + $0x88] sm:$0xff] %vm431_vm0, %v2262_v48 }
 0x304   : > { %v2591_v53 = vpop.f32.mrb[16].mxu1 }
 0x305   : > { %v2283_v32 = vadd.f32 %v2591_v53, %v4597_v6  ;;  %v2274_v0 = vpop.f32.mrb[17].mxu1 }
 0x306   : > { %v2275_v8 = vadd.f32 %v4597_v6, %v2274_v0  ;;  %v2592_v59 = vpop.f32.mrb[18].mxu1 }
 0x307   : > { %2343 = vst.msk [vmem:[%s4602_s10 + $0xb0] sm:$0xff] %vm431_vm0, %v2283_v32  ;;  %v2286_v5 = vadd.f32 %v2592_v59, %v4597_v6  ;;  %v2277_v21 = vpop.f32.mrb[19].mxu1 }
 0x308   : > { %2341 = vst.msk [vmem:[%s4602_s10 + $0xa0] sm:$0xff] %vm431_vm0, %v2275_v8  ;;  %v2278_v62 = vadd.f32 %v4597_v6, %v2277_v21 }
 0x309   : > { %2344 = vst.msk [vmem:[%s4602_s10 + $0xb8] sm:$0xff] %vm431_vm0, %v2286_v5 }
 0x30a   : > { %2342 = vst.msk [vmem:[%s4602_s10 + $0xa8] sm:$0xff] %vm431_vm0, %v2278_v62 }
 0x31c   : > { %v2595_v17 = vpop.f32.mrb[20].mxu1 }
 0x31d   : > { %v2299_v7 = vadd.f32 %v2595_v17, %v4597_v6  ;;  %v2290_v3 = vpop.f32.mrb[21].mxu1 }
 0x31e   : > { %v2291_v11 = vadd.f32 %v4597_v6, %v2290_v3  ;;  %v2596_v10 = vpop.f32.mrb[22].mxu1 }
 0x31f   : > { %2347 = vst.msk [vmem:[%s4602_s10 + $0xd0] sm:$0xff] %vm431_vm0, %v2299_v7  ;;  %v2302_v37 = vadd.f32 %v2596_v10, %v4597_v6  ;;  %v2293_v45 = vpop.f32.mrb[23].mxu1 }
 0x320   : > { %2345 = vst.msk [vmem:[%s4602_s10 + $0xc0] sm:$0xff] %vm431_vm0, %v2291_v11  ;;  %v2294_v40 = vadd.f32 %v4597_v6, %v2293_v45 }
 0x321   : > { %2348 = vst.msk [vmem:[%s4602_s10 + $0xd8] sm:$0xff] %vm431_vm0, %v2302_v37 }
 0x322   : > { %2346 = vst.msk [vmem:[%s4602_s10 + $0xc8] sm:$0xff] %vm431_vm0, %v2294_v40 }
 0x32c   : > { %v2599_v52 = vpop.f32.mrb[24].mxu1 }
 0x32d   : > { %v2315_v41 = vadd.f32 %v2599_v52, %v4597_v6  ;;  %v2306_v35 = vpop.f32.mrb[25].mxu1 }
 0x32e   : > { %v2307_v54 = vadd.f32 %v4597_v6, %v2306_v35  ;;  %v2600_v2 = vpop.f32.mrb[26].mxu1 }
 0x32f   : > { %2351 = vst.msk [vmem:[%s4602_s10 + $0xf0] sm:$0xff] %vm431_vm0, %v2315_v41  ;;  %v2318_v12 = vadd.f32 %v2600_v2, %v4597_v6  ;;  %v2309_v50 = vpop.f32.mrb[27].mxu1 }
 0x330   : > { %2349 = vst.msk [vmem:[%s4602_s10 + $0xe0] sm:$0xff] %vm431_vm0, %v2307_v54  ;;  %v2310_v25 = vadd.f32 %v4597_v6, %v2309_v50 }
 0x331   : > { %2352 = vst.msk [vmem:[%s4602_s10 + $0xf8] sm:$0xff] %vm431_vm0, %v2318_v12 }
 0x332   : > { %2350 = vst.msk [vmem:[%s4602_s10 + $0xe8] sm:$0xff] %vm431_vm0, %v2310_v25 }
 0x333 PF: > { %s17_s24 = sadd.s32 1, %s2792_s24  }
 0x334   : > { %p14_p4 = scmp.ge.s32.totalorder %s17_s24, 4  }
 0x336   :  { %16 = sbr.rel (!%p14_p4) target bundleno = 1 (0x1), region = 78 }

</bundles_post_ra>
